<compile_context>
chip_gen: v5e
topology: v5e:2x2
jax: 0.10.0
libtpu: 0.0.40
codegen_flags: <defaults>
</compile_context>

<pallas_src>
import jax
import jax.numpy as jnp
from jax.experimental import pallas as pl
from jax.experimental.pallas import tpu as pltpu


# --------------------------------------------------------------------------- #
# Kernel
# --------------------------------------------------------------------------- #
def _classifier_kernel(x_ref, y_ref,
                       wbb_ref, bbb_ref,
                       wfc_ref, bfc_ref,
                       w1a_ref, w1b_ref, b1_ref,
                       w2_ref, b2_ref,
                       out_ref,
                       acc_ref):
    """grid = (batch_tiles, hw_tiles); axis 1 is the GAP reduction axis."""
    k = pl.program_id(1)
    bt = out_ref.shape[0]                      # batch-tile rows (static)

    @pl.when(k == 0)
    def _init():
        acc_ref[...] = jnp.zeros_like(acc_ref)

    # ---- partial global-average-pool: spatial sums for this HW tile ---------
    # x-branch rows live in acc[:bt], y-branch rows in acc[bt:], so the
    # shared-weight matmuls below run once on a (2*bt, C) LHS.
    xs = jnp.sum(x_ref[...].astype(jnp.float32), axis=-1)        # (bt, C)
    ys = jnp.sum(y_ref[...].astype(jnp.float32), axis=-1)        # (bt, C)
    acc_ref[pl.ds(0, bt), :] += xs
    acc_ref[pl.ds(bt, bt), :] += ys

    @pl.when(k == pl.num_programs(1) - 1)
    def _finalize():
        # backbone stand-in linear C -> 1000(pad 1024); 1/(H*W) folded into wbb
        g = acc_ref[...].astype(jnp.bfloat16)                    # (2*bt, C)
        feat = jnp.dot(g, wbb_ref[...],
                       preferred_element_type=jnp.float32) + bbb_ref[...]

        # self.fc : 1000 -> 512, both branches in a single matmul
        z = jnp.dot(feat.astype(jnp.bfloat16), wfc_ref[...],
                    preferred_element_type=jnp.float32) + bfc_ref[...]
        xfc = z[:bt].astype(jnp.bfloat16)
        yfc = z[bt:].astype(jnp.bfloat16)

        # torch.cat((x, y), axis=1) @ W1^T  ==  x @ W1a + y @ W1b
        res = (jnp.dot(xfc, w1a_ref[...], preferred_element_type=jnp.float32)
               + jnp.dot(yfc, w1b_ref[...], preferred_element_type=jnp.float32)
               + b1_ref[...])

        # self.dropout(p=0.2): identity in eval mode.

        # self.fc2 : 512 -> num_classes (padded to 128 lanes)
        out = jnp.dot(res.astype(jnp.bfloat16), w2_ref[...],
                      preferred_element_type=jnp.float32) + b2_ref[...]
        out_ref[...] = out.astype(out_ref.dtype)


# --------------------------------------------------------------------------- #
# Parameter preprocessing (hoisted out of the forward path; run once)
# --------------------------------------------------------------------------- #
def prepare_params(params, image_hw):
    bf16, f32 = jnp.bfloat16, jnp.float32
    feat = params["wbb"].shape[0]              # 1000
    hidden = params["wfc"].shape[0]            # 512
    num_classes = params["w2"].shape[0]
    feat_p = ((feat + 127) // 128) * 128       # 1024
    nc_p = ((num_classes + 127) // 128) * 128  # 128

    # backbone stand-in: (C, 1000) -> pad lanes to 1024, fold GAP 1/(H*W) in
    wbb_t = jnp.pad(params["wbb"].T / float(image_hw),
                    ((0, 0), (0, feat_p - feat))).astype(bf16)
    bbb = jnp.pad(params["bbb"], (0, feat_p - feat)).reshape(1, -1).astype(f32)
    # fc: pad the (dead) input rows matching the padded feature lanes
    wfc_t = jnp.pad(params["wfc"].T, ((0, feat_p - feat), (0, 0))).astype(bf16)
    bfc = params["bfc"].reshape(1, -1).astype(f32)
    # fc1 split: cat(x, y) @ W1^T == x @ W1a + y @ W1b
    w1 = params["w1"]
    w1a_t = w1[:, :hidden].T.astype(bf16)
    w1b_t = w1[:, hidden:].T.astype(bf16)
    b1 = params["b1"].reshape(1, -1).astype(f32)
    # fc2: pad classes up to a full 128-lane group (unmasked stores)
    w2_t = jnp.pad(params["w2"].T, ((0, 0), (0, nc_p - num_classes))).astype(bf16)
    b2 = jnp.pad(params["b2"], (0, nc_p - num_classes)).reshape(1, -1).astype(f32)

    return {"wbb_t": wbb_t, "bbb": bbb, "wfc_t": wfc_t, "bfc": bfc,
            "w1a_t": w1a_t, "w1b_t": w1b_t, "b1": b1, "w2_t": w2_t, "b2": b2,
            "num_classes": num_classes, "nc_pad": nc_p}


def _pick_hw_tile(hw, requested=None):
    if requested is not None:
        return requested
    for t in (2048, 1024, 512, 256, 128):      # >=512 hits ~85% of HBM roofline
        if hw % t == 0:
            return t
    return hw                                  # small/odd spatial: single tile


# --------------------------------------------------------------------------- #
# Forward wrapper
# --------------------------------------------------------------------------- #
def multi_img_classifier(x, y, prepared, *, hw_tile=None, batch_tile=None):
    """x, y: [B, C, H, W] float32 (NCHW). Returns [B, num_classes] float32."""
    B, C, H, W = x.shape
    HW = H * W
    hwt = _pick_hw_tile(HW, hw_tile)
    bt = (B if B <= 128 else 128) if batch_tile is None else batch_tile
    assert B % bt == 0 and HW % hwt == 0

    # bf16 image storage (halves HBM->VMEM DMA); accumulation stays f32.
    x3 = x.reshape(B, C, HW).astype(jnp.bfloat16)
    y3 = y.reshape(B, C, HW).astype(jnp.bfloat16)

    p = prepared
    nc_pad = p["nc_pad"]
    grid = (B // bt, HW // hwt)

    img_spec = pl.BlockSpec((bt, C, hwt), lambda b, k: (b, 0, k))

    def const_spec(a):  # weights/biases: resident across the whole grid
        return pl.BlockSpec(a.shape, lambda b, k: (0, 0))

    out = pl.pallas_call(
        _classifier_kernel,
        out_shape=jax.ShapeDtypeStruct((B, nc_pad), jnp.float32),
        grid_spec=pltpu.PrefetchScalarGridSpec(
            num_scalar_prefetch=0,
            grid=grid,
            in_specs=[img_spec, img_spec,
                      const_spec(p["wbb_t"]), const_spec(p["bbb"]),
                      const_spec(p["wfc_t"]), const_spec(p["bfc"]),
                      const_spec(p["w1a_t"]), const_spec(p["w1b_t"]),
                      const_spec(p["b1"]),
                      const_spec(p["w2_t"]), const_spec(p["b2"])],
            out_specs=pl.BlockSpec((bt, nc_pad), lambda b, k: (b, 0)),
            scratch_shapes=[pltpu.VMEM((2 * bt, C), jnp.float32)]),
        compiler_params=pltpu.CompilerParams(
            dimension_semantics=("parallel", "arbitrary")),
    )(x3, y3, p["wbb_t"], p["bbb"], p["wfc_t"], p["bfc"],
      p["w1a_t"], p["w1b_t"], p["b1"], p["w2_t"], p["b2"])

    return out[:, :p["num_classes"]]


# --------------------------------------------------------------------------- #
# Init + references
# --------------------------------------------------------------------------- #
def init_params(key, in_channels, feat_dim=1000, hidden=512, num_classes=2):
    ks = jax.random.split(key, 8)

    def lin(kw, kb, out_f, in_f):
        scale = 1.0 / jnp.sqrt(jnp.float32(in_f))
        w = jax.random.uniform(kw, (out_f, in_f), jnp.float32, -scale, scale)
        b = jax.random.uniform(kb, (out_f,), jnp.float32, -scale, scale)
        return w, b

    wbb, bbb = lin(ks[0], ks[1], feat_dim, in_channels)   # backbone stand-in
    wfc, bfc = lin(ks[2], ks[3], hidden, feat_dim)        # fc : 1000 -> 512
    w1, b1 = lin(ks[4], ks[5], hidden, 2 * hidden)        # fc1: 1024 -> 512
    w2, b2 = lin(ks[6], ks[7], num_classes, hidden)       # fc2: 512 -> nc
    return {"wbb": wbb, "bbb": bbb, "wfc": wfc, "bfc": bfc,
            "w1": w1, "b1": b1, "w2": w2, "b2": b2}


def _reference_bf16(x3, y3, pp):
    """Mirror of the kernel math (same bf16 casts, f32 accumulation)."""
    f32, bf16 = jnp.float32, jnp.bfloat16

    def branch(img):
        s = img.astype(f32).sum(axis=-1)                           # (B, C)
        feat = jnp.dot(s.astype(bf16), pp["wbb_t"],
                       preferred_element_type=f32) + pp["bbb"]
        return jnp.dot(feat.astype(bf16), pp["wfc_t"],
                       preferred_element_type=f32) + pp["bfc"]

    xfc, yfc = branch(x3), branch(y3)
    res = (jnp.dot(xfc.astype(bf16), pp["w1a_t"], preferred_element_type=f32)
           + jnp.dot(yfc.astype(bf16), pp["w1b_t"], preferred_element_type=f32)
           + pp["b1"])
    out = jnp.dot(res.astype(bf16), pp["w2_t"],
                  preferred_element_type=f32) + pp["b2"]
    return out[:, :pp["num_classes"]]


def _reference_f32(x, y, params):
    """Original module math in plain f32 (loose check: bf16 quantization only)."""
    B, C = x.shape[0], x.shape[1]
    xg = x.reshape(B, C, -1).mean(-1)
    yg = y.reshape(B, C, -1).mean(-1)
    xf = xg @ params["wbb"].T + params["bbb"]
    yf = yg @ params["wbb"].T + params["bbb"]
    xfc = xf @ params["wfc"].T + params["bfc"]
    yfc = yf @ params["wfc"].T + params["bfc"]
    cat = jnp.concatenate([xfc, yfc], axis=1)
    r = cat @ params["w1"].T + params["b1"]
    return r @ params["w2"].T + params["b2"]


# --------------------------------------------------------------------------- #
if __name__ == "__main__":
    key = jax.random.PRNGKey(0)
    k_x, k_y, k_p = jax.random.split(key, 3)

    B, C, H, W = 2, 4, 16, 16                  # small synthetic shapes (NCHW)
    x = jax.random.normal(k_x, (B, C, H, W), jnp.float32)
    y = jax.random.normal(k_y, (B, C, H, W), jnp.float32)
    params = init_params(k_p, in_channels=C, num_classes=2)
    prepared = prepare_params(params, image_hw=H * W)      # hoisted, done once

    # hw_tile=128 -> two spatial tiles, exercising the pipelined GAP accumulator.
    out = multi_img_classifier(x, y, prepared, hw_tile=128)
    out = jax.block_until_ready(out)
    assert out.shape == (B, 2) and out.dtype == jnp.float32

    # tight check: exact mirror of the kernel math (same bf16 casts)
    x3 = x.reshape(B, C, -1).astype(jnp.bfloat16)
    y3 = y.reshape(B, C, -1).astype(jnp.bfloat16)
    expected = _reference_bf16(x3, y3, prepared)
    assert jnp.allclose(out, expected, atol=2e-3, rtol=2e-3)

    # loose check: original all-f32 module math (difference = bf16 quantization)
    expected_f32 = _reference_f32(x, y, params)
    assert jnp.allclose(out, expected_f32, atol=3e-2, rtol=3e-2)

    print("KERNEL_OK")
</pallas_src>

<mosaic_0001>
module attributes {stable_mosaic.version = 11 : i64} {
  func.func @_classifier_kernel(%arg0: i32, %arg1: i32, %arg2: memref<2x4x128xbf16, #tpu.memory_space<vmem>>, %arg3: memref<2x4x128xbf16, #tpu.memory_space<vmem>>, %arg4: memref<4x1024xbf16, #tpu.memory_space<vmem>>, %arg5: memref<1x1024xf32, #tpu.memory_space<vmem>>, %arg6: memref<1024x512xbf16, #tpu.memory_space<vmem>>, %arg7: memref<1x512xf32, #tpu.memory_space<vmem>>, %arg8: memref<512x512xbf16, #tpu.memory_space<vmem>>, %arg9: memref<512x512xbf16, #tpu.memory_space<vmem>>, %arg10: memref<1x512xf32, #tpu.memory_space<vmem>>, %arg11: memref<512x128xbf16, #tpu.memory_space<vmem>>, %arg12: memref<1x128xf32, #tpu.memory_space<vmem>>, %arg13: memref<2x128xf32, #tpu.memory_space<vmem>>, %arg14: memref<4x4xf32, #tpu.memory_space<vmem>>) attributes {dimension_semantics = [#tpu.dimension_semantics<parallel>, #tpu.dimension_semantics<arbitrary>], iteration_bounds = array<i64: 1, 2>, scalar_prefetch = 0 : i64, scratch_operands = 1 : i64, tpu.core_type = #tpu.core_type<tc>, window_params = [{transform_indices = @transform_0, window_bounds = array<i64: 2, 4, 128>}, {transform_indices = @transform_1, window_bounds = array<i64: 2, 4, 128>}, {pipeline_mode = #tpu.pipeline_mode<synchronous>, transform_indices = @transform_2, window_bounds = array<i64: 4, 1024>}, {pipeline_mode = #tpu.pipeline_mode<synchronous>, transform_indices = @transform_3, window_bounds = array<i64: 1, 1024>}, {pipeline_mode = #tpu.pipeline_mode<synchronous>, transform_indices = @transform_4, window_bounds = array<i64: 1024, 512>}, {pipeline_mode = #tpu.pipeline_mode<synchronous>, transform_indices = @transform_5, window_bounds = array<i64: 1, 512>}, {pipeline_mode = #tpu.pipeline_mode<synchronous>, transform_indices = @transform_6, window_bounds = array<i64: 512, 512>}, {pipeline_mode = #tpu.pipeline_mode<synchronous>, transform_indices = @transform_7, window_bounds = array<i64: 512, 512>}, {pipeline_mode = #tpu.pipeline_mode<synchronous>, transform_indices = @transform_8, window_bounds = array<i64: 1, 512>}, {pipeline_mode = #tpu.pipeline_mode<synchronous>, transform_indices = @transform_9, window_bounds = array<i64: 512, 128>}, {pipeline_mode = #tpu.pipeline_mode<synchronous>, transform_indices = @transform_10, window_bounds = array<i64: 1, 128>}, {transform_indices = @transform_11, window_bounds = array<i64: 2, 128>}]} {
    %c0_i32 = arith.constant 0 : i32
    %0 = arith.cmpi eq, %arg1, %c0_i32 : i32
    %1 = arith.extui %0 : i1 to i32
    %c0_i32_0 = arith.constant 0 : i32
    %2 = arith.cmpi ne, %1, %c0_i32_0 : i32
    scf.if %2 {
      %cst_15 = arith.constant 0.000000e+00 : f32
      %18 = vector.broadcast %cst_15 : f32 to vector<4x4xf32>
      %c0_16 = arith.constant 0 : index
      %c0_17 = arith.constant 0 : index
      %19 = vector.load %arg14[%c0_16, %c0_17] : memref<4x4xf32, #tpu.memory_space<vmem>>, vector<4x4xf32>
      tpu.vector_store %arg14[%c0_16, %c0_17], %18 {strides = array<i32>} : memref<4x4xf32, #tpu.memory_space<vmem>>, vector<4x4xf32>,
    } else {
    }
    %c0 = arith.constant 0 : index
    %c0_1 = arith.constant 0 : index
    %c0_2 = arith.constant 0 : index
    %3 = vector.load %arg2[%c0, %c0_1, %c0_2] : memref<2x4x128xbf16, #tpu.memory_space<vmem>>, vector<2x4x128xbf16>
    %4 = arith.extf %3 : vector<2x4x128xbf16> to vector<2x4x128xf32>
    %cst = arith.constant dense<0.000000e+00> : vector<2x4xf32>
    %5 = vector.multi_reduction <add>, %4, %cst [2] : vector<2x4x128xf32> to vector<2x4xf32>
    %c0_3 = arith.constant 0 : index
    %c0_4 = arith.constant 0 : index
    %c0_5 = arith.constant 0 : index
    %6 = vector.load %arg3[%c0_3, %c0_4, %c0_5] : memref<2x4x128xbf16, #tpu.memory_space<vmem>>, vector<2x4x128xbf16>
    %7 = arith.extf %6 : vector<2x4x128xbf16> to vector<2x4x128xf32>
    %cst_6 = arith.constant dense<0.000000e+00> : vector<2x4xf32>
    %8 = vector.multi_reduction <add>, %7, %cst_6 [2] : vector<2x4x128xf32> to vector<2x4xf32>
    %c0_7 = arith.constant 0 : index
    %c0_8 = arith.constant 0 : index
    %9 = vector.load %arg14[%c0_7, %c0_8] : memref<4x4xf32, #tpu.memory_space<vmem>>, vector<2x4xf32>
    %10 = arith.addf %9, %5 : vector<2x4xf32>
    %c0_9 = arith.constant 0 : index
    %c0_10 = arith.constant 0 : index
    %11 = vector.load %arg14[%c0_9, %c0_10] : memref<4x4xf32, #tpu.memory_space<vmem>>, vector<2x4xf32>
    tpu.vector_store %arg14[%c0_9, %c0_10], %10 {strides = array<i32>} : memref<4x4xf32, #tpu.memory_space<vmem>>, vector<2x4xf32>,
    %c2 = arith.constant 2 : index
    %c0_11 = arith.constant 0 : index
    %12 = vector.load %arg14[%c2, %c0_11] : memref<4x4xf32, #tpu.memory_space<vmem>>, vector<2x4xf32>
    %13 = arith.addf %12, %8 : vector<2x4xf32>
    %c2_12 = arith.constant 2 : index
    %c0_13 = arith.constant 0 : index
    %14 = vector.load %arg14[%c2_12, %c0_13] : memref<4x4xf32, #tpu.memory_space<vmem>>, vector<2x4xf32>
    tpu.vector_store %arg14[%c2_12, %c0_13], %13 {strides = array<i32>} : memref<4x4xf32, #tpu.memory_space<vmem>>, vector<2x4xf32>,
    %c1_i32 = arith.constant 1 : i32
    %15 = arith.cmpi eq, %arg1, %c1_i32 : i32
    %16 = arith.extui %15 : i1 to i32
    %c0_i32_14 = arith.constant 0 : i32
    %17 = arith.cmpi ne, %16, %c0_i32_14 : i32
    scf.if %17 {
      %c0_15 = arith.constant 0 : index
      %c0_16 = arith.constant 0 : index
      %18 = vector.load %arg14[%c0_15, %c0_16] : memref<4x4xf32, #tpu.memory_space<vmem>>, vector<4x4xf32>
      %19 = arith.truncf %18 : vector<4x4xf32> to vector<4x4xbf16>
      %c0_17 = arith.constant 0 : index
      %c0_18 = arith.constant 0 : index
      %20 = vector.load %arg4[%c0_17, %c0_18] : memref<4x1024xbf16, #tpu.memory_space<vmem>>, vector<4x1024xbf16>
      %cst_19 = arith.constant dense<0.000000e+00> : vector<4x1024xf32>
      %21 = tpu.matmul %19, %20, %cst_19 {dimension_numbers = #tpu.dot_dimension_numbers<[1], [0], [0], [1], [0, 0, 1, 1], [], []>} : vector<4x4xbf16>, vector<4x1024xbf16>, vector<4x1024xf32> -> vector<4x1024xf32>
      %c0_20 = arith.constant 0 : index
      %c0_21 = arith.constant 0 : index
      %22 = vector.load %arg5[%c0_20, %c0_21] : memref<1x1024xf32, #tpu.memory_space<vmem>>, vector<1x1024xf32>
      %23 = vector.broadcast %22 : vector<1x1024xf32> to vector<4x1024xf32>
      %24 = arith.addf %21, %23 : vector<4x1024xf32>
      %25 = arith.truncf %24 : vector<4x1024xf32> to vector<4x1024xbf16>
      %c0_22 = arith.constant 0 : index
      %c0_23 = arith.constant 0 : index
      %26 = vector.load %arg6[%c0_22, %c0_23] : memref<1024x512xbf16, #tpu.memory_space<vmem>>, vector<1024x512xbf16>
      %cst_24 = arith.constant dense<0.000000e+00> : vector<4x512xf32>
      %27 = tpu.matmul %25, %26, %cst_24 {dimension_numbers = #tpu.dot_dimension_numbers<[1], [0], [0], [1], [0, 0, 1, 1], [], []>} : vector<4x1024xbf16>, vector<1024x512xbf16>, vector<4x512xf32> -> vector<4x512xf32>
      %c0_25 = arith.constant 0 : index
      %c0_26 = arith.constant 0 : index
      %28 = vector.load %arg7[%c0_25, %c0_26] : memref<1x512xf32, #tpu.memory_space<vmem>>, vector<1x512xf32>
      %29 = vector.broadcast %28 : vector<1x512xf32> to vector<4x512xf32>
      %30 = arith.addf %27, %29 : vector<4x512xf32>
      %31 = vector.extract_strided_slice %30 {offsets = [0, 0], sizes = [2, 512], strides = [1, 1]} : vector<4x512xf32> to vector<2x512xf32>
      %32 = arith.truncf %31 : vector<2x512xf32> to vector<2x512xbf16>
      %33 = vector.extract_strided_slice %30 {offsets = [2, 0], sizes = [2, 512], strides = [1, 1]} : vector<4x512xf32> to vector<2x512xf32>
      %34 = arith.truncf %33 : vector<2x512xf32> to vector<2x512xbf16>
      %c0_27 = arith.constant 0 : index
      %c0_28 = arith.constant 0 : index
      %35 = vector.load %arg8[%c0_27, %c0_28] : memref<512x512xbf16, #tpu.memory_space<vmem>>, vector<512x512xbf16>
      %cst_29 = arith.constant dense<0.000000e+00> : vector<2x512xf32>
      %36 = tpu.matmul %32, %35, %cst_29 {dimension_numbers = #tpu.dot_dimension_numbers<[1], [0], [0], [1], [0, 0, 1, 1], [], []>} : vector<2x512xbf16>, vector<512x512xbf16>, vector<2x512xf32> -> vector<2x512xf32>
      %c0_30 = arith.constant 0 : index
      %c0_31 = arith.constant 0 : index
      %37 = vector.load %arg9[%c0_30, %c0_31] : memref<512x512xbf16, #tpu.memory_space<vmem>>, vector<512x512xbf16>
      %cst_32 = arith.constant dense<0.000000e+00> : vector<2x512xf32>
      %38 = tpu.matmul %34, %37, %cst_32 {dimension_numbers = #tpu.dot_dimension_numbers<[1], [0], [0], [1], [0, 0, 1, 1], [], []>} : vector<2x512xbf16>, vector<512x512xbf16>, vector<2x512xf32> -> vector<2x512xf32>
      %39 = arith.addf %36, %38 : vector<2x512xf32>
      %c0_33 = arith.constant 0 : index
      %c0_34 = arith.constant 0 : index
      %40 = vector.load %arg10[%c0_33, %c0_34] : memref<1x512xf32, #tpu.memory_space<vmem>>, vector<1x512xf32>
      %41 = vector.broadcast %40 : vector<1x512xf32> to vector<2x512xf32>
      %42 = arith.addf %39, %41 : vector<2x512xf32>
      %43 = arith.truncf %42 : vector<2x512xf32> to vector<2x512xbf16>
      %c0_35 = arith.constant 0 : index
      %c0_36 = arith.constant 0 : index
      %44 = vector.load %arg11[%c0_35, %c0_36] : memref<512x128xbf16, #tpu.memory_space<vmem>>, vector<512x128xbf16>
      %cst_37 = arith.constant dense<0.000000e+00> : vector<2x128xf32>
      %45 = tpu.matmul %43, %44, %cst_37 {dimension_numbers = #tpu.dot_dimension_numbers<[1], [0], [0], [1], [0, 0, 1, 1], [], []>} : vector<2x512xbf16>, vector<512x128xbf16>, vector<2x128xf32> -> vector<2x128xf32>
      %c0_38 = arith.constant 0 : index
      %c0_39 = arith.constant 0 : index
      %46 = vector.load %arg12[%c0_38, %c0_39] : memref<1x128xf32, #tpu.memory_space<vmem>>, vector<1x128xf32>
      %47 = vector.broadcast %46 : vector<1x128xf32> to vector<2x128xf32>
      %48 = arith.addf %45, %47 : vector<2x128xf32>
      %c0_40 = arith.constant 0 : index
      %c0_41 = arith.constant 0 : index
      %49 = vector.load %arg13[%c0_40, %c0_41] : memref<2x128xf32, #tpu.memory_space<vmem>>, vector<2x128xf32>
      tpu.vector_store %arg13[%c0_40, %c0_41], %48 {strides = array<i32>} : memref<2x128xf32, #tpu.memory_space<vmem>>, vector<2x128xf32>,
    } else {
    }
    return
  }
  func.func @transform_0(%arg0: i32, %arg1: i32) -> (i32, i32, i32) {
    %c0_i32 = arith.constant 0 : i32
    %c0_i32_0 = arith.constant 0 : i32
    return %arg0, %c0_i32, %arg1 : i32, i32, i32
  }
  func.func @transform_1(%arg0: i32, %arg1: i32) -> (i32, i32, i32) {
    %c0_i32 = arith.constant 0 : i32
    %c0_i32_0 = arith.constant 0 : i32
    return %arg0, %c0_i32, %arg1 : i32, i32, i32
  }
  func.func @transform_2(%arg0: i32, %arg1: i32) -> (i32, i32) {
    %c0_i32 = arith.constant 0 : i32
    %c0_i32_0 = arith.constant 0 : i32
    %c0_i32_1 = arith.constant 0 : i32
    return %c0_i32, %c0_i32_0 : i32, i32
  }
  func.func @transform_3(%arg0: i32, %arg1: i32) -> (i32, i32) {
    %c0_i32 = arith.constant 0 : i32
    %c0_i32_0 = arith.constant 0 : i32
    %c0_i32_1 = arith.constant 0 : i32
    return %c0_i32, %c0_i32_0 : i32, i32
  }
  func.func @transform_4(%arg0: i32, %arg1: i32) -> (i32, i32) {
    %c0_i32 = arith.constant 0 : i32
    %c0_i32_0 = arith.constant 0 : i32
    %c0_i32_1 = arith.constant 0 : i32
    return %c0_i32, %c0_i32_0 : i32, i32
  }
  func.func @transform_5(%arg0: i32, %arg1: i32) -> (i32, i32) {
    %c0_i32 = arith.constant 0 : i32
    %c0_i32_0 = arith.constant 0 : i32
    %c0_i32_1 = arith.constant 0 : i32
    return %c0_i32, %c0_i32_0 : i32, i32
  }
  func.func @transform_6(%arg0: i32, %arg1: i32) -> (i32, i32) {
    %c0_i32 = arith.constant 0 : i32
    %c0_i32_0 = arith.constant 0 : i32
    %c0_i32_1 = arith.constant 0 : i32
    return %c0_i32, %c0_i32_0 : i32, i32
  }
  func.func @transform_7(%arg0: i32, %arg1: i32) -> (i32, i32) {
    %c0_i32 = arith.constant 0 : i32
    %c0_i32_0 = arith.constant 0 : i32
    %c0_i32_1 = arith.constant 0 : i32
    return %c0_i32, %c0_i32_0 : i32, i32
  }
  func.func @transform_8(%arg0: i32, %arg1: i32) -> (i32, i32) {
    %c0_i32 = arith.constant 0 : i32
    %c0_i32_0 = arith.constant 0 : i32
    %c0_i32_1 = arith.constant 0 : i32
    return %c0_i32, %c0_i32_0 : i32, i32
  }
  func.func @transform_9(%arg0: i32, %arg1: i32) -> (i32, i32) {
    %c0_i32 = arith.constant 0 : i32
    %c0_i32_0 = arith.constant 0 : i32
    %c0_i32_1 = arith.constant 0 : i32
    return %c0_i32, %c0_i32_0 : i32, i32
  }
  func.func @transform_10(%arg0: i32, %arg1: i32) -> (i32, i32) {
    %c0_i32 = arith.constant 0 : i32
    %c0_i32_0 = arith.constant 0 : i32
    %c0_i32_1 = arith.constant 0 : i32
    return %c0_i32, %c0_i32_0 : i32, i32
  }
  func.func @transform_11(%arg0: i32, %arg1: i32) -> (i32, i32) {
    %c0_i32 = arith.constant 0 : i32
    %c0_i32_0 = arith.constant 0 : i32
    return %arg0, %c0_i32 : i32, i32
  }
}

</mosaic_0001>

<bundles_post_ra>
// kernel: tpu_custom_call.1
= control target key start
LH: loop header
LB: loop body
LE: loop exit
PB: predicated region body
PF: predicated region fallthrough
CT: control target
= control target key end

     0   :  { %s9008_s0 = inlined_call_operand.hbm [shape: bf16[2,4,256], index: 0, kind: input, shape index: {}]   ;;  %s9009_s1 = inlined_call_operand.hbm [shape: bf16[2,4,256], index: 1, kind: input, shape index: {}]   ;;  %s9010_s2 = inlined_call_operand.hbm [shape: bf16[4,1024], index: 2, kind: input, shape index: {}]   ;;  %s9011_s3 = inlined_call_operand.hbm [shape: f32[1,1024], index: 3, kind: input, shape index: {}]   ;;  %s9012_s4 = inlined_call_operand.hbm [shape: bf16[1024,512], index: 4, kind: input, shape index: {}]   ;;  %s9013_s5 = inlined_call_operand.vmem [shape: f32[1,512], index: 5, kind: input, shape index: {}]   ;;  %s9014_s6 = inlined_call_operand.hbm [shape: bf16[512,512], index: 6, kind: input, shape index: {}]   ;;  %s9015_s7 = inlined_call_operand.hbm [shape: bf16[512,512], index: 7, kind: input, shape index: {}]   ;;  %s9016_s8 = inlined_call_operand.hbm [shape: f32[1,512], index: 8, kind: input, shape index: {}]   ;;  %s9017_s9 = inlined_call_operand.hbm [shape: bf16[512,128], index: 9, kind: input, shape index: {}]   ;;  %s9018_s10 = inlined_call_operand.vmem [shape: f32[1,128], index: 10, kind: input, shape index: {}]   ;;  %s9019_s11 = inlined_call_operand.hbm [shape: f32[2,128], index: 11, kind: output, shape index: {}]  }
   0x1   :  { %9022 = sst [smem:[#allocation26_spill]] %s9008_s0 }
   0x2   :  { %9023 = sst [smem:[#allocation27_spill]] %s9010_s2 }
   0x3   :  { %9024 = sst [smem:[#allocation28_spill]] %s9011_s3 }
   0x4   :  { %9025 = sst [smem:[#allocation29_spill]] %s9012_s4 }
   0x5   :  { %9026 = sst [smem:[#allocation30_spill]] %s9014_s6 }
   0x6   :  { %9027 = sst [smem:[#allocation31_spill]] %s9015_s7 }
   0x7   :  { %9028 = sst [smem:[#allocation32_spill]] %s9016_s8 }
   0x8   :  { %9029 = sst [smem:[#allocation33_spill]] %s9018_s10 }
   0x9   :  { %9030 = sst [smem:[#allocation34_spill]] %s9019_s11 }
   0xa   :  { %16 = vsyncpa [#allocation4], 0 }
   0xb   :  { %18 = vsyncpa [#allocation4 + $0x1], 0 }
   0xc   :  { %19 = vsyncpa [#allocation7], 0 }
   0xd   :  { %21 = vsyncpa [#allocation7 + $0x1], 0 }
   0xe   :  { %22 = vsyncpa [#allocation10], 0 }
   0xf   :  { %23 = vsyncpa [#allocation13], 0 }
  0x10   :  { %24 = vsyncpa [#allocation16], 0 }
  0x11   :  { %25 = vsyncpa [#allocation5], 0  ;;  %s8575_s17 = smov 0   ;;  %s8577_s18 = smov 0  }
  0x12   :  { %s8579_s19 = smov 0   ;;  %s8581_s20 = smov 0  }
  0x13   :  { %s8583_s21 = smov 0   ;;  %s8585_s22 = smov 0  }
  0x14 LB: > { %s8606_s23 = sadd.s32 4294967295, %s8498_s22   ;;  %p5222_p0 = scmp.ge.s32.totalorder %s8498_s22, 1  ;;  %s8498_s22 = sphi %s8585_s22, %s31_s22   ;;  %s8494_s21 = sphi %s8583_s21, %s9049_s21   ;;  %s8490_s20 = sphi %s8581_s20, %s9048_s20   ;;  %s8486_s19 = sphi %s8579_s19, %s9047_s19   ;;  %s8482_s18 = sphi %s8577_s18, %s9046_s18   ;;  %s8478_s17 = sphi %s8575_s17, %s9045_s17  }
  0x15   : > { %p66_p1 = scmp.eq.s32.totalorder %s8606_s23, 0  ;;  %p319_p2 = scmp.lt.s32.totalorder %s8498_s22, 3 }
  0x16   : > { %s9031_s2 = sld [smem:[#allocation27_spill]]  ;;  %s8500_s28 = smov [#allocation8]  }
  0x17   : > { %p8614_p3 = pnand %p5222_p0, %p319_p2  ;;  %s333_s29 = sshll.u32 %s8500_s28, 4  ;;  %s334_s29 = int_to_ptr.vmem [resolvable:$true] %s333_s29 }
  0x18   : > { %s9033_s3 = sld [smem:[#allocation28_spill]]  ;;  %s8501_s15 = smov [#allocation9]  }
  0x19   : > { %p8015_p4 = pneg %p8614_p3  ;;  %s345_s16 = sshll.u32 %s8501_s15, 4  ;;  %s346_s16 = int_to_ptr.vmem [resolvable:$true] %s345_s16 }
  0x1a   : > { %s9035_s6 = sld [smem:[#allocation30_spill]]  ;;  %s8502_s30 = smov [#allocation12]  }
  0x1b   : > { %p8625_p5 = pnand %p8015_p4, %p66_p1  ;;  %s373_s12 = sshll.u32 %s8502_s30, 4  ;;  %s374_s12 = int_to_ptr.vmem [resolvable:$true] %s373_s12 }
  0x1c   : > { %s331_s26 = sshll.u32 %s9031_s2, 4  ;;  %s9036_s8 = sld [smem:[#allocation32_spill]]  ;;  %s332_s26 = int_to_ptr.hbm [resolvable:$true] %s331_s26 }
  0x1d   : > { %8018 = dma.hbm_to_vmem [thread:$0]  (!%p8625_p5), %s332_s26, 256, %s334_s29, [#allocation7]  }
  0x1e   : > { %s343_s13 = sshll.u32 %s9033_s3, 4  ;;  %s8503_s15 = smov 256   ;;  %s344_s13 = int_to_ptr.hbm [resolvable:$true] %s343_s13 }
  0x1f   : > { %8021 = dma.hbm_to_vmem [thread:$0]  (!%p8625_p5), %s344_s13, 128, %s346_s16, [#allocation10]  }
  0x20   : > { %s371_s28 = sshll.u32 %s9035_s6, 4  ;;  %s8504_s10 = smov 16   ;;  %s372_s28 = int_to_ptr.hbm [resolvable:$true] %s371_s28 }
  0x21   : > { %8027 = dma.hbm_to_vmem [thread:$0]  (!%p8625_p5), %s372_s28, 16384, %s374_s12, [#allocation13], %s8503_s15, %s8503_s15, %s8504_s10  }
  0x22   : > { %s400_s11 = sshll.u32 %s9036_s8, 4  ;;  %s8505_s26 = smov [#allocation15]   ;;  %s401_s11 = int_to_ptr.hbm [resolvable:$true] %s400_s11 }
  0x23   : > { %s402_s29 = sshll.u32 %s8505_s26, 4  ;;  %s9037_s4 = sld [smem:[#allocation29_spill]]  ;;  %s403_s29 = int_to_ptr.vmem [resolvable:$true] %s402_s29 }
  0x24   : > { %8033 = dma.hbm_to_vmem [thread:$0]  (!%p8625_p5), %s401_s11, 64, %s403_s29, [#allocation16]  }
  0x25   : > { %s9038_s7 = sld [smem:[#allocation31_spill]]  ;;  %s8506_s30 = smov [#allocation11]  }
  0x26   : > { %s356_s6 = sshll.u32 %s8506_s30, 4  ;;  %s8507_s28 = smov [#allocation14]   ;;  %s357_s6 = int_to_ptr.vmem [resolvable:$true] %s356_s6 }
  0x27   : > { %s387_s12 = sshll.u32 %s8507_s28, 4  ;;  %s411_s29 = sshll.u32 %s9017_s9, 4  ;;  %s388_s12 = int_to_ptr.vmem [resolvable:$true] %s387_s12  ;;  %s412_s29 = int_to_ptr.hbm [resolvable:$true] %s411_s29 }
  0x28   : > { %s8508_s13 = smov [#allocation17]   ;;  %s40_s25 = sadd.s32 1, %s8494_s21 }
  0x29   : > { %s354_s24 = sshll.u32 %s9037_s4, 4  ;;  %s413_s16 = sshll.u32 %s8508_s13, 4  ;;  %s355_s24 = int_to_ptr.hbm [resolvable:$true] %s354_s24  ;;  %s414_s16 = int_to_ptr.vmem [resolvable:$true] %s413_s16 }
  0x2a   : > { %8024 = dma.hbm_to_vmem [thread:$0]  (!%p8625_p5), %s355_s24, 32768, %s357_s6, [#allocation10], %s8503_s15, %s8503_s15, %s8504_s10  }
  0x2b   : > { %s385_s3 = sshll.u32 %s9038_s7, 4  ;;  %s9020_s6 = smov 64   ;;  %s386_s3 = int_to_ptr.hbm [resolvable:$true] %s385_s3 }
  0x2c   : > { %8030 = dma.hbm_to_vmem [thread:$0]  (!%p8625_p5), %s386_s3, 16384, %s388_s12, [#allocation13], %s8503_s15, %s8503_s15, %s8504_s10  }
  0x2d   : > { %s8510_s24 = smov 4   ;;  %p41_p6 = scmp.ge.s32.totalorder %s40_s25, 2 }
  0x2e   : > { %8036 = dma.hbm_to_vmem [thread:$0]  (!%p8625_p5), %s412_s29, 4096, %s414_s16, [#allocation16], %s9020_s6, %s9020_s6, %s8510_s24  }
  0x2f   : > { %s52_s2 = sadd.s32 1, %s8486_s19  ;;  %p59_p7 = scmp.ne.s32.totalorder %s8486_s19, %s8482_s18 }
  0x30   : > { %p60_p8 = scmp.eq.s32.totalorder %s8498_s22, 0  ;;  %s9051_s25 = smov (%p41_p6, %s40_s25), 0 }
  0x31   : > { %p65_p10 = scmp.ne.s32.totalorder %s8482_s18, %s8478_s17  ;;  %s48_s14 = ssub.s32 %s8494_s21, %s9051_s25 }
  0x32   : > { %p8667_p9 = por %p60_p8, %p59_p7  ;;  %p8051_p11 = scmp.lt.s32.totalorder %s8498_s22, 2 }
  0x33   : > { %p50_p12 = scmp.eq.s32.totalorder %s48_s14, 0  ;;  %p8678_p13 = por %p66_p1, %p65_p10 }
  0x34   : > { %s430_s3 = sand.u32 1, %s8486_s19   ;;  %s5232_s30 = sshll.u32 %s8494_s21, 1 }
  0x35   : > { %s8685_s28 = scalar_select %p50_p12, %s8486_s19, %s52_s2  }
  0x36   : > { %s5231_s12 = sshll.u32 %s430_s3, 2  ;;  %s9041_s0 = sld [smem:[#allocation26_spill]] }
  0x37   : > { %s434_s17 = scalar_lea.vmem [#allocation3], %s5231_s12  ;;  %p8038_p0 = pnand %p8051_p11, %p8667_p9 }
  0x38   : > { %s444_s16 = sshll.u32 %s434_s17, 4  ;;  %s465_s6 = scalar_lea.hbm %s9009_s1, %s5232_s30  ;;  %s445_s16 = int_to_ptr.vmem [resolvable:$true] %s444_s16 }
  0x39   : > { %s431_s2 = scalar_lea.sflag [#allocation4], %s430_s3  ;;  %s8511_s4 = smov 32  }
  0x3a   : > { %s8512_s7 = smov 2   ;;  %s9042_s8 = smov 64  }
  0x3b   : > { %s466_s26 = sshll.u32 %s465_s6, 4  ;;  %s458_s11 = scalar_lea.vmem [#allocation6], %s5231_s12  ;;  %s467_s26 = int_to_ptr.hbm [resolvable:$true] %s466_s26 }
  0x3c   : > { %s441_s29 = scalar_lea.hbm %s9041_s0, %s5232_s30  ;;  %s454_s17 = sand.u32 1, %s8498_s22  }
  0x3d   : > { %s442_s13 = sshll.u32 %s441_s29, 4  ;;  %s468_s29 = sshll.u32 %s458_s11, 4  ;;  %s443_s13 = int_to_ptr.hbm [resolvable:$true] %s442_s13  ;;  %s469_s29 = int_to_ptr.vmem [resolvable:$true] %s468_s29 }
  0x3e   : > { %8040 = dma.hbm_to_vmem [thread:$0]  (!%p8038_p0), %s443_s13, 64, %s445_s16, %s431_s2, %s9042_s8, %s8511_s4, %s8512_s7  }
  0x3f   : > { %s455_s0 = scalar_lea.sflag [#allocation7], %s454_s17  ;;  %480 = sbr.rel (%p8614_p3) target bundleno = 1189 (0x4a5), region = 64 }
  0x40   : > { %8043 = dma.hbm_to_vmem [thread:$0]  (!%p8038_p0), %s467_s26, 64, %s469_s29, %s455_s0, %s9042_s8, %s8511_s4, %s8512_s7  }
  0x41   : > { %s482_s10 = sand.u32 (!%p8614_p3), 1, %s8482_s18  }
  0x42   : > { %s8703_s3 = sshll.u32 (!%p8614_p3), %s482_s10, 2  ;;  %s483_s30 = scalar_lea.sflag (!%p8614_p3), [#allocation4], %s482_s10 }
  0x43   : > { %s486_s13 = scalar_lea.vmem (!%p8614_p3), [#allocation3], %s8703_s3 }
  0x44   : > { %8449 = dma.done.wait (%p8678_p13), %s483_s30, 64  }
  0x45   : > { %8451 = vsyncadd (%p8678_p13), %s483_s30, 4294967232  ;;  %s492_s0 = sand.u32 1, %s8606_s23   ;;  %s496_s7 = scalar_lea.vmem [#allocation6], %s8703_s3 }
  0x46   : > { %s493_s4 = scalar_lea.sflag [#allocation7], %s492_s0 }
  0x47   : > { %8453 = dma.done.wait (%p8678_p13), %s493_s4, 64  }
  0x48   : > { %8455 = vsyncadd (%p8678_p13), %s493_s4, 4294967232 }
  0x49   : > { %8457 = dma.done.wait (%p66_p1), [#allocation7], 256  }
  0x4a   : > { %8459 = vsyncadd (%p66_p1), [#allocation7], 4294967040 }
  0x4b   : > { %8461 = dma.done.wait (%p66_p1), [#allocation10], 32896  }
  0x4c   : > { %8463 = vsyncadd (%p66_p1), [#allocation10], 4294934400 }
  0x4d   : > { %8465 = dma.done.wait (%p66_p1), [#allocation13], 32768  }
  0x4e   : > { %8467 = vsyncadd (%p66_p1), [#allocation13], 4294934528 }
  0x4f   : > { %8469 = dma.done.wait (%p66_p1), [#allocation16], 4160  }
  0x50   : > { %8471 = vsyncadd (%p66_p1), [#allocation16], 4294963136  ;;  %p5245_p2 = scmp.ne.s32.totalorder %s8490_s20, 0 }
  0x52   : > { %577 = sbr.rel (%p5245_p2) target bundleno = 89 (0x59), region = 104 }
  0x57   : > { %vm578_vm0 = vcmask 27648   ;;  %v8513_v0 = vmov 0.0  }
  0x58   : > { %579 = vst.msk [vmem:[#allocation2] sm:$0xf] %vm578_vm0, %v8513_v0 }
  0x59 PF: > { %vm584_vm1 = vcmask 1043456   ;;  %v591_v1 = vld [vmem:[%s496_s7] sm:$0x3]  ;;  %v580_v2 = vld [vmem:[%s486_s13] sm:$0x3]  ;;  %v604_v15 = vlaneseq  ;;  %vm608_vm2 = vcmask 1041409  }
  0x5a   : > { %v593_v3 = vunpack.c.l.bf16 %v591_v1  ;;  %v582_v4 = vunpack.c.l.bf16 %v580_v2  ;;  %v592_v5 = vld [vmem:[%s496_s7 + $0x2] sm:$0x3]  ;;  %v581_v6 = vld [vmem:[%s486_s13 + $0x2] sm:$0x3]  ;;  %vm612_vm3 = vcmask 25600   ;;  %p5246_p1 = scmp.ne.s32.totalorder %s8490_s20, 1 }
  0x5b   : > { %v594_v9 = vunpack.c.l.bf16 %v592_v5  ;;  %v583_v10 = vunpack.c.l.bf16 %v581_v6  ;;  %v605_v16 = vand.u32 127, %v604_v15  ;;  %s9043_s16 = sld [smem:[#allocation33_spill]] (!%p5246_p1) }
  0x5c   : > { %v595_v7 = vsel %vm584_vm1, %v593_v3, 0.0  ;;  %v585_v8 = vsel %vm584_vm1, %v582_v4, 0.0 }
  0x5d   : > { %596 = vadd.xlane.f32.xlu1 %v595_v7  ;;  %586 = vadd.xlane.f32.xlu0 %v585_v8  ;;  %v598_v11 = vsel %vm584_vm1, %v594_v9, 0.0  ;;  %v588_v12 = vsel %vm584_vm1, %v583_v10, 0.0 }
  0x5f   : > { %v614_v21 = vld [vmem:[#allocation2 + $0x2] sm:$0x3]  ;;  %v601_v23 = vld [vmem:[#allocation2] sm:$0x3] }
  0x65   : > { %599 = vadd.xlane.f32.xlu1 %v598_v11  ;;  %589 = vadd.xlane.f32.xlu0 %v588_v12 }
  0xd0   : > { %v597_v13 = vpop.xlane.xlu1 %596  ;;  %v587_v14 = vpop.xlane.xlu0 %586 }
  0xd1   : > { %v617_v19 = vperm.slane %v597_v13, %v605_v16  ;;  %v606_v20 = vperm.slane %v587_v14, %v605_v16 }
  0xd8   : > { %v600_v17 = vpop.xlane.xlu1 %599  ;;  %v590_v18 = vpop.xlane.xlu0 %589 }
  0xd9   : > { %v618_v22 = vperm.slane %v600_v17, %v605_v16  ;;  %v607_v24 = vperm.slane %v590_v18, %v605_v16 }
  0xdb   : > { %v619_v25 = vsel %vm608_vm2, %v618_v22, %v617_v19  ;;  %v609_v26 = vsel %vm608_vm2, %v607_v24, %v606_v20  ;;  %626 = sbr.rel (%p5246_p1) target bundleno = 1179 (0x49b), region = 108 }
  0xdc   : > { %v621_v27 = vadd.f32 %v619_v25, %v614_v21  ;;  %v611_v28 = vadd.f32 %v609_v26, %v601_v23 }
  0xde   : > { %622 = vst.msk [vmem:[#allocation2 + $0x2] sm:$0x3] %vm612_vm3, %v621_v27 }
  0xdf   : > { %613 = vst.msk [vmem:[#allocation2] sm:$0x3] %vm612_vm3, %v611_v28 }
  0xe0   : > { %v629_v29 = vld [vmem:[#allocation8] sm:$0xff]  ;;  %v630_v30 = vld [vmem:[#allocation8 + $0x8] sm:$0xff]  ;;  %vm666_vm4 = vcmask 1041408   ;;  %v5369_v34 = vld [vmem:[#allocation11 + $0xe0] sm:$0xf]  ;;  %vm662_vm5 = vcmask 31744  }
  0xe1   : > { %650 = vst [vmem:[#allocation1] ss:$4 sm:$0xff] %v629_v29  ;;  %v7465_v35 = vld [vmem:[#allocation11 + $0xec] sm:$0xf0]  ;;  %v5497_v36 = vld [vmem:[#allocation11 + $0x1e0] sm:$0xf] }
  0xe2   : > { %653 = vst [vmem:[#allocation1 + $0x20] ss:$4 sm:$0xff] %v630_v30  ;;  %v7497_v37 = vld [vmem:[#allocation11 + $0x1ec] sm:$0xf0]  ;;  %v5625_v42 = vld [vmem:[#allocation11 + $0x2e0] sm:$0xf]  ;;  %v5370_v58 = vor.u32 %v7465_v35, %v5369_v34 }
  0xe3   : > { %v7529_v43 = vld [vmem:[#allocation11 + $0x2ec] sm:$0xf0]  ;;  %v5753_v46 = vld [vmem:[#allocation11 + $0x3e0] sm:$0xf]  ;;  %v5498_v59 = vor.u32 %v7497_v37, %v5497_v36 }
  0xe4   : > { %v7561_v49 = vld [vmem:[#allocation11 + $0x3ec] sm:$0xf0]  ;;  %v5353_v52 = vld [vmem:[#allocation11 + $0xc0] sm:$0xf]  ;;  %v5626_v63 = vor.u32 %v7529_v43, %v5625_v42 }
  0xe5   : > { %v7461_v53 = vld [vmem:[#allocation11 + $0xcc] sm:$0xf0]  ;;  %v5481_v54 = vld [vmem:[#allocation11 + $0x1c0] sm:$0xf]  ;;  %v5754_v0 = vor.u32 %v7561_v49, %v5753_v46 }
  0xe6   : > { %v627_v31 = vld [vmem:[#allocation2] sm:$0xf]  ;;  %v7493_v55 = vld [vmem:[#allocation11 + $0x1cc] sm:$0xf0]  ;;  %v5609_v60 = vld [vmem:[#allocation11 + $0x2c0] sm:$0xf]  ;;  %v5354_v5 = vor.u32 %v7461_v53, %v5353_v52 }
  0xe7   : > { %v8736_v41 = vpack.c.bf16 %v627_v31, %v627_v31  ;;  %v7525_v1 = vld [vmem:[#allocation11 + $0x2cc] sm:$0xf0]  ;;  %v5737_v3 = vld [vmem:[#allocation11 + $0x3c0] sm:$0xf]  ;;  %v5482_v6 = vor.u32 %v7493_v55, %v5481_v54 }
  0xe8   : > { %v654_v32 = vld.sshfl [vmem:[#allocation1] sm:$0xff pattern:$0x73625140]  ;;  %v655_v33 = vld.sshfl [vmem:[#allocation1 + $0x8] sm:$0xff pattern:$0x73625140]  ;;  %v5610_v11 = vor.u32 %v7525_v1, %v5609_v60 }
  0xe9   : > { %v667_v38 = vsel %vm666_vm4, %v654_v32, 0  ;;  %v669_v39 = vsel %vm666_vm4, %v655_v33, 0  ;;  %v656_v40 = vld.sshfl [vmem:[#allocation1 + $0x10] sm:$0xff pattern:$0x73625140] }
  0xea   : > { %690 = vmatpush.bf16.msra.mxu0 %v667_v38  ;;  %703 = vmatpush.bf16.msra.mxu1 %v669_v39  ;;  %v671_v44 = vsel %vm666_vm4, %v656_v40, 0  ;;  %v657_v45 = vld.sshfl [vmem:[#allocation1 + $0x18] sm:$0xff pattern:$0x73625140]  ;;  %v7557_v4 = vld [vmem:[#allocation11 + $0x3cc] sm:$0xf0] }
  0xeb   : > { %716 = vmatpush.bf16.msra.mxu2 %v671_v44  ;;  %v673_v47 = vsel %vm666_vm4, %v657_v45, 0  ;;  %v658_v48 = vld.sshfl [vmem:[#allocation1 + $0x20] sm:$0xff pattern:$0x73625140]  ;;  %v5337_v7 = vld [vmem:[#allocation11 + $0xa0] sm:$0xf]  ;;  %v5738_v12 = vor.u32 %v7557_v4, %v5737_v3 }
  0xec   : > { %729 = vmatpush.bf16.msra.mxu3 %v673_v47  ;;  %v675_v50 = vsel %vm666_vm4, %v658_v48, 0  ;;  %v659_v51 = vld.sshfl [vmem:[#allocation1 + $0x28] sm:$0xff pattern:$0x73625140]  ;;  %v7457_v8 = vld [vmem:[#allocation11 + $0xac] sm:$0xf0] }
  0xed   : > { %5247 = vmatmul.msk.bf16.vlgmr.msra.gmra.mxu0 %vm662_vm5, %v8736_v41  ;;  %5248 = vmatmul.msk.bf16.vlgmr.msra.gmra.mxu1 %vm662_vm5, %v8736_v41  ;;  %v677_v56 = vsel %vm666_vm4, %v659_v51, 0  ;;  %v660_v57 = vld.sshfl [vmem:[#allocation1 + $0x30] sm:$0xff pattern:$0x73625140]  ;;  %v7489_v10 = vld [vmem:[#allocation11 + $0x1ac] sm:$0xf0]  ;;  %v5338_v17 = vor.u32 %v7457_v8, %v5337_v7 }
  0xee   : > { %5249 = vmatmul.msk.bf16.vlgmr.msra.gmra.mxu2 %vm662_vm5, %v8736_v41  ;;  %742 = vmatpush.bf16.msrb.mxu0 %v675_v50  ;;  %v679_v61 = vsel %vm666_vm4, %v660_v57, 0  ;;  %v661_v62 = vld.sshfl [vmem:[#allocation1 + $0x38] sm:$0xff pattern:$0x73625140]  ;;  %v5465_v9 = vld [vmem:[#allocation11 + $0x1a0] sm:$0xf] }
  0xef   : > { %5250 = vmatmul.msk.bf16.vlgmr.msra.gmra.mxu3 %vm662_vm5, %v8736_v41  ;;  %755 = vmatpush.bf16.msrb.mxu1 %v677_v56  ;;  %v681_v2 = vsel %vm666_vm4, %v661_v62, 0  ;;  %v5593_v13 = vld [vmem:[#allocation11 + $0x2a0] sm:$0xf]  ;;  %v7521_v14 = vld [vmem:[#allocation11 + $0x2ac] sm:$0xf0]  ;;  %v5466_v18 = vor.u32 %v7489_v10, %v5465_v9 }
  0xf0   : > { %768 = vmatpush.bf16.msrb.mxu2 %v679_v61  ;;  %781 = vmatpush.bf16.msrb.mxu3 %v681_v2  ;;  %v5721_v15 = vld [vmem:[#allocation11 + $0x3a0] sm:$0xf]  ;;  %v7553_v16 = vld [vmem:[#allocation11 + $0x3ac] sm:$0xf0]  ;;  %v5594_v19 = vor.u32 %v7521_v14, %v5593_v13 }
  0xf1   : > { %v5722_v20 = vor.u32 %v7553_v16, %v5721_v15  ;;  %v5321_v21 = vld [vmem:[#allocation11 + $0x80] sm:$0xf]  ;;  %v7453_v22 = vld [vmem:[#allocation11 + $0x8c] sm:$0xf0] }
  0xf2   : > { %2341 = vmatpush.bf16.msra.mxu0 %v5370_v58  ;;  %v5449_v23 = vld [vmem:[#allocation11 + $0x180] sm:$0xf]  ;;  %v7485_v24 = vld [vmem:[#allocation11 + $0x18c] sm:$0xf0]  ;;  %v5322_v29 = vor.u32 %v7453_v22, %v5321_v21 }
  0xf3   : > { %2354 = vmatpush.bf16.msra.mxu1 %v5498_v59  ;;  %v5577_v25 = vld [vmem:[#allocation11 + $0x280] sm:$0xf]  ;;  %v7517_v26 = vld [vmem:[#allocation11 + $0x28c] sm:$0xf0]  ;;  %v5450_v30 = vor.u32 %v7485_v24, %v5449_v23 }
  0xf4   : > { %2367 = vmatpush.bf16.msra.mxu2 %v5626_v63  ;;  %2380 = vmatpush.bf16.msra.mxu3 %v5754_v0  ;;  %v5705_v27 = vld [vmem:[#allocation11 + $0x380] sm:$0xf]  ;;  %v7549_v28 = vld [vmem:[#allocation11 + $0x38c] sm:$0xf0]  ;;  %v5578_v35 = vor.u32 %v7517_v26, %v5577_v25 }
  0xf5   : > { %v5305_v31 = vld [vmem:[#allocation11 + $0x60] sm:$0xf]  ;;  %v7449_v32 = vld [vmem:[#allocation11 + $0x6c] sm:$0xf0]  ;;  %v5706_v36 = vor.u32 %v7549_v28, %v5705_v27 }
  0xf6   : > { %2342 = vmatpush.bf16.msra.mxu0 %v5354_v5  ;;  %v5433_v33 = vld [vmem:[#allocation11 + $0x160] sm:$0xf]  ;;  %v7481_v34 = vld [vmem:[#allocation11 + $0x16c] sm:$0xf0]  ;;  %v5306_v42 = vor.u32 %v7449_v32, %v5305_v31 }
  0xf7   : > { %2355 = vmatpush.bf16.msra.mxu1 %v5482_v6  ;;  %v5561_v37 = vld [vmem:[#allocation11 + $0x260] sm:$0xf]  ;;  %v7513_v38 = vld [vmem:[#allocation11 + $0x26c] sm:$0xf0]  ;;  %v5434_v43 = vor.u32 %v7481_v34, %v5433_v33 }
  0xf8   : > { %2368 = vmatpush.bf16.msra.mxu2 %v5610_v11  ;;  %2381 = vmatpush.bf16.msra.mxu3 %v5738_v12  ;;  %v5689_v39 = vld [vmem:[#allocation11 + $0x360] sm:$0xf]  ;;  %v7545_v40 = vld [vmem:[#allocation11 + $0x36c] sm:$0xf0]  ;;  %v5562_v48 = vor.u32 %v7513_v38, %v5561_v37 }
  0xf9   : > { %v5289_v44 = vld [vmem:[#allocation11 + $0x40] sm:$0xf]  ;;  %v7445_v45 = vld [vmem:[#allocation11 + $0x4c] sm:$0xf0]  ;;  %v5690_v49 = vor.u32 %v7545_v40, %v5689_v39 }
  0xfa   : > { %2343 = vmatpush.bf16.msra.mxu0 %v5338_v17  ;;  %v5417_v46 = vld [vmem:[#allocation11 + $0x140] sm:$0xf]  ;;  %v7477_v47 = vld [vmem:[#allocation11 + $0x14c] sm:$0xf0]  ;;  %v5290_v54 = vor.u32 %v7445_v45, %v5289_v44 }
  0xfb   : > { %2356 = vmatpush.bf16.msra.mxu1 %v5466_v18  ;;  %v5545_v50 = vld [vmem:[#allocation11 + $0x240] sm:$0xf]  ;;  %v7509_v51 = vld [vmem:[#allocation11 + $0x24c] sm:$0xf0]  ;;  %v5418_v55 = vor.u32 %v7477_v47, %v5417_v46 }
  0xfc   : > { %2369 = vmatpush.bf16.msra.mxu2 %v5594_v19  ;;  %2382 = vmatpush.bf16.msra.mxu3 %v5722_v20  ;;  %v5673_v52 = vld [vmem:[#allocation11 + $0x340] sm:$0xf]  ;;  %v7541_v53 = vld [vmem:[#allocation11 + $0x34c] sm:$0xf0]  ;;  %v5546_v59 = vor.u32 %v7509_v51, %v5545_v50 }
  0xfd   : > { %5251 = vmatmul.msk.bf16.vlgmr.msrb.gmra.mxu0 %vm662_vm5, %v8736_v41  ;;  %5252 = vmatmul.msk.bf16.vlgmr.msrb.gmra.mxu1 %vm662_vm5, %v8736_v41  ;;  %v5273_v56 = vld [vmem:[#allocation11 + $0x20] sm:$0xf]  ;;  %v7473_v58 = vld [vmem:[#allocation11 + $0x12c] sm:$0xf0]  ;;  %v5674_v60 = vor.u32 %v7541_v53, %v5673_v52 }
  0xfe   : > { %5253 = vmatmul.msk.bf16.vlgmr.msrb.gmra.mxu2 %vm662_vm5, %v8736_v41  ;;  %2344 = vmatpush.bf16.msra.mxu0 %v5322_v29  ;;  %v5401_v57 = vld [vmem:[#allocation11 + $0x120] sm:$0xf]  ;;  %v7505_v62 = vld [vmem:[#allocation11 + $0x22c] sm:$0xf0] }
  0xff   : > { %5254 = vmatmul.msk.bf16.vlgmr.msrb.gmra.mxu3 %vm662_vm5, %v8736_v41  ;;  %2357 = vmatpush.bf16.msra.mxu1 %v5450_v30  ;;  %v7441_v41 = vld [vmem:[#allocation11 + $0x2c] sm:$0xf0]  ;;  %v5529_v61 = vld [vmem:[#allocation11 + $0x220] sm:$0xf]  ;;  %v5402_v4 = vor.u32 %v7473_v58, %v5401_v57 }
 0x100   : > { %2370 = vmatpush.bf16.msra.mxu2 %v5578_v35  ;;  %2383 = vmatpush.bf16.msra.mxu3 %v5706_v36  ;;  %v5657_v63 = vld [vmem:[#allocation11 + $0x320] sm:$0xf]  ;;  %v7537_v0 = vld [vmem:[#allocation11 + $0x32c] sm:$0xf0]  ;;  %v5274_v1 = vor.u32 %v7441_v41, %v5273_v56  ;;  %v5530_v11 = vor.u32 %v7505_v62, %v5529_v61 }
 0x101   : > { %v5257_v2 = vld [vmem:[#allocation11] sm:$0xf]  ;;  %v7437_v3 = vld [vmem:[#allocation11 + $0xc] sm:$0xf0]  ;;  %v5658_v12 = vor.u32 %v7537_v0, %v5657_v63 }
 0x102   : > { %2345 = vmatpush.bf16.msra.mxu0 %v5306_v42  ;;  %v5385_v5 = vld [vmem:[#allocation11 + $0x100] sm:$0xf]  ;;  %v7469_v6 = vld [vmem:[#allocation11 + $0x10c] sm:$0xf0]  ;;  %v5258_v16 = vor.u32 %v7437_v3, %v5257_v2 }
 0x103   : > { %2358 = vmatpush.bf16.msra.mxu1 %v5434_v43  ;;  %v5881_v7 = vld [vmem:[#allocation11 + $0x4e0] sm:$0xf]  ;;  %v7593_v8 = vld [vmem:[#allocation11 + $0x4ec] sm:$0xf0]  ;;  %v5386_v20 = vor.u32 %v7469_v6, %v5385_v5 }
 0x104   : > { %2371 = vmatpush.bf16.msra.mxu2 %v5562_v48  ;;  %2384 = vmatpush.bf16.msra.mxu3 %v5690_v49  ;;  %v6009_v9 = vld [vmem:[#allocation11 + $0x5e0] sm:$0xf]  ;;  %v7625_v10 = vld [vmem:[#allocation11 + $0x5ec] sm:$0xf0]  ;;  %v5882_v21 = vor.u32 %v7593_v8, %v5881_v7 }
 0x105   : > { %v5513_v13 = vld [vmem:[#allocation11 + $0x200] sm:$0xf]  ;;  %v7501_v14 = vld [vmem:[#allocation11 + $0x20c] sm:$0xf0]  ;;  %v6010_v24 = vor.u32 %v7625_v10, %v6009_v9 }
 0x106   : > { %2346 = vmatpush.bf16.msra.mxu0 %v5290_v54  ;;  %v5641_v15 = vld [vmem:[#allocation11 + $0x300] sm:$0xf]  ;;  %v7533_v17 = vld [vmem:[#allocation11 + $0x30c] sm:$0xf0]  ;;  %v5514_v27 = vor.u32 %v7501_v14, %v5513_v13 }
 0x107   : > { %2359 = vmatpush.bf16.msra.mxu1 %v5418_v55  ;;  %v6137_v18 = vld [vmem:[#allocation11 + $0x6e0] sm:$0xf]  ;;  %v7657_v19 = vld [vmem:[#allocation11 + $0x6ec] sm:$0xf0]  ;;  %v5642_v30 = vor.u32 %v7533_v17, %v5641_v15 }
 0x108   : > { %2372 = vmatpush.bf16.msra.mxu2 %v5546_v59  ;;  %2385 = vmatpush.bf16.msra.mxu3 %v5674_v60  ;;  %v6265_v22 = vld [vmem:[#allocation11 + $0x7e0] sm:$0xf]  ;;  %v7689_v23 = vld [vmem:[#allocation11 + $0x7ec] sm:$0xf0]  ;;  %v6138_v31 = vor.u32 %v7657_v19, %v6137_v18 }
 0x109   : > { %v5865_v25 = vld [vmem:[#allocation11 + $0x4c0] sm:$0xf]  ;;  %v7589_v26 = vld [vmem:[#allocation11 + $0x4cc] sm:$0xf0]  ;;  %v6266_v32 = vor.u32 %v7689_v23, %v6265_v22 }
 0x10a   : > { %2347 = vmatpush.bf16.msra.mxu0 %v5274_v1  ;;  %v5993_v28 = vld [vmem:[#allocation11 + $0x5c0] sm:$0xf]  ;;  %v7621_v29 = vld [vmem:[#allocation11 + $0x5cc] sm:$0xf0]  ;;  %v5866_v35 = vor.u32 %v7589_v26, %v5865_v25 }
 0x10b   : > { %2360 = vmatpush.bf16.msra.mxu1 %v5402_v4  ;;  %v6121_v33 = vld [vmem:[#allocation11 + $0x6c0] sm:$0xf]  ;;  %v7653_v34 = vld [vmem:[#allocation11 + $0x6cc] sm:$0xf0]  ;;  %v5994_v38 = vor.u32 %v7621_v29, %v5993_v28 }
 0x10c   : > { %2373 = vmatpush.bf16.msra.mxu2 %v5530_v11  ;;  %2386 = vmatpush.bf16.msra.mxu3 %v5658_v12  ;;  %v6249_v36 = vld [vmem:[#allocation11 + $0x7c0] sm:$0xf]  ;;  %v7685_v37 = vld [vmem:[#allocation11 + $0x7cc] sm:$0xf0]  ;;  %v6122_v44 = vor.u32 %v7653_v34, %v6121_v33 }
 0x10d   : > { %v5849_v39 = vld [vmem:[#allocation11 + $0x4a0] sm:$0xf]  ;;  %v7585_v40 = vld [vmem:[#allocation11 + $0x4ac] sm:$0xf0]  ;;  %v6250_v45 = vor.u32 %v7685_v37, %v6249_v36 }
 0x10e   : > { %2348 = vmatpush.bf16.msra.mxu0 %v5258_v16  ;;  %v5977_v42 = vld [vmem:[#allocation11 + $0x5a0] sm:$0xf]  ;;  %v7617_v43 = vld [vmem:[#allocation11 + $0x5ac] sm:$0xf0]  ;;  %v5850_v48 = vor.u32 %v7585_v40, %v5849_v39 }
 0x10f   : > { %2361 = vmatpush.bf16.msra.mxu1 %v5386_v20  ;;  %v6105_v46 = vld [vmem:[#allocation11 + $0x6a0] sm:$0xf]  ;;  %v7649_v47 = vld [vmem:[#allocation11 + $0x6ac] sm:$0xf0]  ;;  %v5978_v51 = vor.u32 %v7617_v43, %v5977_v42 }
 0x110   : > { %2374 = vmatpush.bf16.msra.mxu2 %v5514_v27  ;;  %2387 = vmatpush.bf16.msra.mxu3 %v5642_v30  ;;  %v6233_v49 = vld [vmem:[#allocation11 + $0x7a0] sm:$0xf]  ;;  %v7681_v50 = vld [vmem:[#allocation11 + $0x7ac] sm:$0xf0]  ;;  %v6106_v56 = vor.u32 %v7649_v47, %v6105_v46 }
 0x111   : > { %v5833_v52 = vld [vmem:[#allocation11 + $0x480] sm:$0xf]  ;;  %v7581_v53 = vld [vmem:[#allocation11 + $0x48c] sm:$0xf0]  ;;  %v6234_v41 = vor.u32 %v7681_v50, %v6233_v49  ;;  %v8760_v50 = vld [vmem:[#allocation9] sm:$0xff] }
 0x112   : > { %2393 = vmatpush.bf16.msrb.mxu0 %v5882_v21  ;;  %v5961_v54 = vld [vmem:[#allocation11 + $0x580] sm:$0xf]  ;;  %v7613_v55 = vld [vmem:[#allocation11 + $0x58c] sm:$0xf0]  ;;  %v5834_v59 = vor.u32 %v7581_v53, %v5833_v52  ;;  %v634_v52 = vperm.slane %v8760_v50, 1 }
 0x113   : > { %2406 = vmatpush.bf16.msrb.mxu1 %v6010_v24  ;;  %v6089_v57 = vld [vmem:[#allocation11 + $0x680] sm:$0xf]  ;;  %v7645_v58 = vld [vmem:[#allocation11 + $0x68c] sm:$0xf0]  ;;  %v5962_v62 = vor.u32 %v7613_v55, %v5961_v54  ;;  %v7463_v53 = vld [vmem:[#allocation11 + $0xe4] sm:$0xf] }
 0x114   : > { %2419 = vmatpush.bf16.msrb.mxu2 %v6138_v31  ;;  %2432 = vmatpush.bf16.msrb.mxu3 %v6266_v32  ;;  %v6217_v60 = vld [vmem:[#allocation11 + $0x780] sm:$0xf]  ;;  %v7677_v61 = vld [vmem:[#allocation11 + $0x78c] sm:$0xf0]  ;;  %v6090_v3 = vor.u32 %v7645_v58, %v6089_v57  ;;  %v5371_v54 = vld [vmem:[#allocation11 + $0xf0] sm:$0xf0] }
 0x115   : > { %v5817_v63 = vld [vmem:[#allocation11 + $0x460] sm:$0xf]  ;;  %v7577_v0 = vld [vmem:[#allocation11 + $0x46c] sm:$0xf0]  ;;  %v6218_v4 = vor.u32 %v7677_v61, %v6217_v60  ;;  %v7495_v55 = vld [vmem:[#allocation11 + $0x1e4] sm:$0xf]  ;;  %v5374_v60 = vor.u32 %v7463_v53, %v5371_v54 }
 0x116   : > { %2394 = vmatpush.bf16.msrb.mxu0 %v5866_v35  ;;  %v5945_v1 = vld [vmem:[#allocation11 + $0x560] sm:$0xf]  ;;  %v7609_v2 = vld [vmem:[#allocation11 + $0x56c] sm:$0xf0]  ;;  %v5818_v7 = vor.u32 %v7577_v0, %v5817_v63  ;;  %v7479_v53 = vld [vmem:[#allocation11 + $0x164] sm:$0xf] }
 0x117   : > { %2407 = vmatpush.bf16.msrb.mxu1 %v5994_v38  ;;  %v6073_v5 = vld [vmem:[#allocation11 + $0x660] sm:$0xf]  ;;  %v7641_v6 = vld [vmem:[#allocation11 + $0x66c] sm:$0xf0]  ;;  %v5946_v10 = vor.u32 %v7609_v2, %v5945_v1  ;;  %v5355_v1 = vld [vmem:[#allocation11 + $0xd0] sm:$0xf0] }
 0x118   : > { %2420 = vmatpush.bf16.msrb.mxu2 %v6122_v44  ;;  %2433 = vmatpush.bf16.msrb.mxu3 %v6250_v45  ;;  %v6201_v8 = vld [vmem:[#allocation11 + $0x760] sm:$0xf]  ;;  %v7673_v9 = vld [vmem:[#allocation11 + $0x76c] sm:$0xf0]  ;;  %v6074_v15 = vor.u32 %v7641_v6, %v6073_v5  ;;  %v7491_v2 = vld [vmem:[#allocation11 + $0x1c4] sm:$0xf] }
 0x119   : > { %v5801_v11 = vld [vmem:[#allocation11 + $0x440] sm:$0xf]  ;;  %v7573_v12 = vld [vmem:[#allocation11 + $0x44c] sm:$0xf0]  ;;  %v6202_v16 = vor.u32 %v7673_v9, %v6201_v8  ;;  %v636_v5 = vperm.slane %v8760_v50, 3 }
 0x11a   : > { %2395 = vmatpush.bf16.msrb.mxu0 %v5850_v48  ;;  %v5929_v13 = vld [vmem:[#allocation11 + $0x540] sm:$0xf]  ;;  %v7605_v14 = vld [vmem:[#allocation11 + $0x54c] sm:$0xf0]  ;;  %v5802_v17 = vor.u32 %v7573_v12, %v5801_v11  ;;  %v7527_v8 = vld [vmem:[#allocation11 + $0x2e4] sm:$0xf] }
 0x11b   : > { %2408 = vmatpush.bf16.msrb.mxu1 %v5978_v51  ;;  %v5930_v18 = vor.u32 %v7605_v14, %v5929_v13  ;;  %v5785_v19 = vld [vmem:[#allocation11 + $0x420] sm:$0xf]  ;;  %v7569_v20 = vld [vmem:[#allocation11 + $0x42c] sm:$0xf0]  ;;  %v633_v51 = vperm.slane %v8760_v50, 0 }
 0x11c   : > { %2421 = vmatpush.bf16.msrb.mxu2 %v6106_v56  ;;  %2434 = vmatpush.bf16.msrb.mxu3 %v6234_v41  ;;  %v5913_v21 = vld [vmem:[#allocation11 + $0x520] sm:$0xf]  ;;  %v5786_v22 = vor.u32 %v7569_v20, %v5785_v19  ;;  %v7601_v23 = vld [vmem:[#allocation11 + $0x52c] sm:$0xf0]  ;;  %v5499_v56 = vld [vmem:[#allocation11 + $0x1f0] sm:$0xf0] }
 0x11d   : > { %v5914_v24 = vor.u32 %v7601_v23, %v5913_v21  ;;  %v6057_v25 = vld [vmem:[#allocation11 + $0x640] sm:$0xf]  ;;  %v7637_v26 = vld [vmem:[#allocation11 + $0x64c] sm:$0xf0]  ;;  %v5502_v61 = vor.u32 %v7495_v55, %v5499_v56  ;;  %v5627_v9 = vld [vmem:[#allocation11 + $0x2f0] sm:$0xf0] }
 0x11e   : > { %2396 = vmatpush.bf16.msrb.mxu0 %v5834_v59  ;;  %v6058_v27 = vor.u32 %v7637_v26, %v6057_v25  ;;  %v6185_v28 = vld [vmem:[#allocation11 + $0x740] sm:$0xf]  ;;  %v7669_v29 = vld [vmem:[#allocation11 + $0x74c] sm:$0xf0]  ;;  %v5755_v12 = vld [vmem:[#allocation11 + $0x3f0] sm:$0xf0] }
 0x11f   : > { %2409 = vmatpush.bf16.msrb.mxu1 %v5962_v62  ;;  %v6186_v30 = vor.u32 %v7669_v29, %v6185_v28  ;;  %v5769_v31 = vld [vmem:[#allocation11 + $0x400] sm:$0xf]  ;;  %v7565_v32 = vld [vmem:[#allocation11 + $0x40c] sm:$0xf0]  ;;  %v7459_v62 = vld [vmem:[#allocation11 + $0xc4] sm:$0xf] }
 0x120   : > { %2422 = vmatpush.bf16.msrb.mxu2 %v6090_v3  ;;  %2435 = vmatpush.bf16.msrb.mxu3 %v6218_v4  ;;  %v5897_v33 = vld [vmem:[#allocation11 + $0x500] sm:$0xf]  ;;  %v5770_v34 = vor.u32 %v7565_v32, %v5769_v31  ;;  %v7597_v35 = vld [vmem:[#allocation11 + $0x50c] sm:$0xf0]  ;;  %v5483_v3 = vld [vmem:[#allocation11 + $0x1d0] sm:$0xf0]  ;;  %v5358_v6 = vor.u32 %v7459_v62, %v5355_v1 }
 0x121   : > { %v5898_v36 = vor.u32 %v7597_v35, %v5897_v33  ;;  %v6041_v37 = vld [vmem:[#allocation11 + $0x620] sm:$0xf]  ;;  %v7633_v38 = vld [vmem:[#allocation11 + $0x62c] sm:$0xf0]  ;;  %v635_v4 = vperm.slane %v8760_v50, 2 }
 0x122   : > { %2397 = vmatpush.bf16.msrb.mxu0 %v5818_v7  ;;  %v6169_v39 = vld [vmem:[#allocation11 + $0x720] sm:$0xf]  ;;  %v6042_v40 = vor.u32 %v7633_v38, %v6041_v37  ;;  %v7665_v42 = vld [vmem:[#allocation11 + $0x72c] sm:$0xf0]  ;;  %v5486_v7 = vor.u32 %v7491_v2, %v5483_v3  ;;  %v7455_v13 = vld [vmem:[#allocation11 + $0xa4] sm:$0xf] }
 0x123   : > { %2410 = vmatpush.bf16.msrb.mxu1 %v5946_v10  ;;  %v6170_v43 = vor.u32 %v7665_v42, %v6169_v39  ;;  %v6025_v44 = vld [vmem:[#allocation11 + $0x600] sm:$0xf]  ;;  %v7629_v45 = vld [vmem:[#allocation11 + $0x60c] sm:$0xf0]  ;;  %v7559_v10 = vld [vmem:[#allocation11 + $0x3e4] sm:$0xf] }
 0x124   : > { %2423 = vmatpush.bf16.msrb.mxu2 %v6074_v15  ;;  %2436 = vmatpush.bf16.msrb.mxu3 %v6202_v16  ;;  %v6026_v46 = vor.u32 %v7629_v45, %v6025_v44  ;;  %v6153_v47 = vld [vmem:[#allocation11 + $0x700] sm:$0xf]  ;;  %v7661_v48 = vld [vmem:[#allocation11 + $0x70c] sm:$0xf0]  ;;  %v5339_v14 = vld [vmem:[#allocation11 + $0xb0] sm:$0xf0] }
 0x125   : > { %v6154_v49 = vor.u32 %v7661_v48, %v6153_v47  ;;  %v5467_v19 = vld [vmem:[#allocation11 + $0x1b0] sm:$0xf0]  ;;  %v5342_v25 = vor.u32 %v7455_v13, %v5339_v14  ;;  %v7523_v26 = vld [vmem:[#allocation11 + $0x2c4] sm:$0xf]  ;;  %v637_v37 = vperm.slane %v8760_v50, 4  ;;  %v638_v39 = vperm.slane %v8760_v50, 5 }
 0x126   : > { %2398 = vmatpush.bf16.msrb.mxu0 %v5802_v17  ;;  %v7555_v28 = vld [vmem:[#allocation11 + $0x3c4] sm:$0xf]  ;;  %v5739_v31 = vld [vmem:[#allocation11 + $0x3d0] sm:$0xf0] }
 0x127   : > { %2411 = vmatpush.bf16.msrb.mxu1 %v5930_v18  ;;  %v7487_v18 = vld [vmem:[#allocation11 + $0x1a4] sm:$0xf]  ;;  %v5323_v33 = vld [vmem:[#allocation11 + $0x90] sm:$0xf0]  ;;  %v5742_v38 = vor.u32 %v7555_v28, %v5739_v31 }
 0x128   : > { %2424 = vmatpush.bf16.msrb.mxu2 %v6058_v27  ;;  %2437 = vmatpush.bf16.msrb.mxu3 %v6186_v30  ;;  %v5611_v27 = vld [vmem:[#allocation11 + $0x2d0] sm:$0xf0]  ;;  %v5470_v30 = vor.u32 %v7487_v18, %v5467_v19  ;;  %v7451_v32 = vld [vmem:[#allocation11 + $0x84] sm:$0xf] }
 0x129   : > { %v5451_v35 = vld [vmem:[#allocation11 + $0x190] sm:$0xf0]  ;;  %v7519_v42 = vld [vmem:[#allocation11 + $0x2a4] sm:$0xf] }
 0x12a   : > { %2399 = vmatpush.bf16.msrb.mxu0 %v5786_v22  ;;  %v5630_v22 = vor.u32 %v7527_v8, %v5627_v9  ;;  %v5723_v47 = vld [vmem:[#allocation11 + $0x3b0] sm:$0xf0]  ;;  %v7447_v48 = vld [vmem:[#allocation11 + $0x64] sm:$0xf] }
 0x12b   : > { %2412 = vmatpush.bf16.msrb.mxu1 %v5914_v24  ;;  %v5758_v24 = vor.u32 %v7559_v10, %v5755_v12  ;;  %v5435_v54 = vld [vmem:[#allocation11 + $0x170] sm:$0xf0]  ;;  %v7547_v3 = vld [vmem:[#allocation11 + $0x384] sm:$0xf]  ;;  %v640_v10 = vperm.slane %v8760_v50, 7 }
 0x12c   : > { %2425 = vmatpush.bf16.msrb.mxu2 %v6042_v40  ;;  %2438 = vmatpush.bf16.msrb.mxu3 %v6170_v43  ;;  %v5326_v40 = vor.u32 %v7451_v32, %v5323_v33  ;;  %v5595_v43 = vld [vmem:[#allocation11 + $0x2b0] sm:$0xf0]  ;;  %v5438_v2 = vor.u32 %v7479_v53, %v5435_v54  ;;  %v7475_v8 = vld [vmem:[#allocation11 + $0x144] sm:$0xf] }
 0x12d   : > { %v5419_v9 = vld [vmem:[#allocation11 + $0x150] sm:$0xf0]  ;;  %v7511_v13 = vld [vmem:[#allocation11 + $0x264] sm:$0xf] }
 0x12e   : > { %2400 = vmatpush.bf16.msrb.mxu0 %v5770_v34  ;;  %v7483_v34 = vld [vmem:[#allocation11 + $0x184] sm:$0xf]  ;;  %v5563_v14 = vld [vmem:[#allocation11 + $0x270] sm:$0xf0] }
 0x12f   : > { %2413 = vmatpush.bf16.msrb.mxu1 %v5898_v36  ;;  %v5614_v36 = vor.u32 %v7523_v26, %v5611_v27  ;;  %v5454_v45 = vor.u32 %v7483_v34, %v5451_v35  ;;  %v7543_v18 = vld [vmem:[#allocation11 + $0x364] sm:$0xf]  ;;  %v5691_v19 = vld [vmem:[#allocation11 + $0x370] sm:$0xf0]  ;;  %v5566_v28 = vor.u32 %v7511_v13, %v5563_v14 }
 0x130   : > { %2426 = vmatpush.bf16.msrb.mxu2 %v6026_v46  ;;  %2439 = vmatpush.bf16.msrb.mxu3 %v6154_v49  ;;  %v7551_v46 = vld [vmem:[#allocation11 + $0x3a4] sm:$0xf]  ;;  %v5694_v32 = vor.u32 %v7543_v18, %v5691_v19  ;;  %v5547_v34 = vld [vmem:[#allocation11 + $0x250] sm:$0xf0] }
 0x131   : > { %v7507_v33 = vld [vmem:[#allocation11 + $0x244] sm:$0xf]  ;;  %v5531_v53 = vld [vmem:[#allocation11 + $0x230] sm:$0xf0] }
 0x132   : > { %v7539_v35 = vld [vmem:[#allocation11 + $0x344] sm:$0xf]  ;;  %v5851_v19 = vld [vmem:[#allocation11 + $0x4b0] sm:$0xf0] }
 0x16a   : > { %v692_v41 = vpop.f32.mrf.mxu0  ;;  %v705_v57 = vpop.f32.mrf.mxu1 }
 0x16b   : > { %v693_v58 = vadd.f32 %v692_v41, %v633_v51  ;;  %v706_v59 = vadd.f32 %v705_v57, %v634_v52  ;;  %v5307_v52 = vld [vmem:[#allocation11 + $0x70] sm:$0xf0]  ;;  %v5598_v41 = vor.u32 %v7519_v42, %v5595_v43  ;;  %v7467_v43 = vld [vmem:[#allocation11 + $0x104] sm:$0xf] }
 0x16c   : > { %v5310_v1 = vor.u32 %v7447_v48, %v5307_v52  ;;  %v5259_v42 = vld [vmem:[#allocation11 + $0x10] sm:$0xf0]  ;;  %v7623_v48 = vld [vmem:[#allocation11 + $0x5e4] sm:$0xf] }
 0x16d   : > { %v8764_v63 = vpack.c.bf16 %v693_v58, %v693_v58  ;;  %v8766_v0 = vpack.c.bf16 %v706_v59, %v706_v59  ;;  %v5726_v58 = vor.u32 %v7551_v46, %v5723_v47  ;;  %v639_v59 = vperm.slane %v8760_v50, 6  ;;  %v5403_v50 = vld [vmem:[#allocation11 + $0x130] sm:$0xf0]  ;;  %v7503_v52 = vld [vmem:[#allocation11 + $0x224] sm:$0xf] }
 0x16e   : > { %v5550_v46 = vor.u32 %v7507_v33, %v5547_v34  ;;  %v5883_v47 = vld [vmem:[#allocation11 + $0x4f0] sm:$0xf0]  ;;  %v7579_v33 = vld [vmem:[#allocation11 + $0x484] sm:$0xf] }
 0x16f   : > { %2349 = vmatmul.bf16.vlgmr.msra.gmra.mxu0 %v8764_v63  ;;  %2362 = vmatmul.bf16.vlgmr.msra.gmra.mxu1 %v8766_v0  ;;  %v5835_v34 = vld [vmem:[#allocation11 + $0x490] sm:$0xf0] }
 0x170   : > { %2445 = vmatpush.bf16.msra.mxu0 %v5374_v60  ;;  %2458 = vmatpush.bf16.msra.mxu1 %v5502_v61  ;;  %v7515_v60 = vld [vmem:[#allocation11 + $0x284] sm:$0xf]  ;;  %v5579_v61 = vld [vmem:[#allocation11 + $0x290] sm:$0xf0] }
 0x171   : > { %v718_v11 = vpop.f32.mrf.mxu2 }
 0x172   : > { %v719_v15 = vadd.f32 %v718_v11, %v635_v4  ;;  %v731_v16 = vpop.f32.mrf.mxu3  ;;  %v694_v17 = vpop.f32.mrf.mxu0  ;;  %v5707_v4 = vld [vmem:[#allocation11 + $0x390] sm:$0xf0]  ;;  %v5582_v11 = vor.u32 %v7515_v60, %v5579_v61  ;;  %v7587_v61 = vld [vmem:[#allocation11 + $0x4c4] sm:$0xf] }
 0x173   : > { %v732_v20 = vadd.f32 %v731_v16, %v636_v5  ;;  %v707_v21 = vpop.f32.mrf.mxu1  ;;  %v7443_v5 = vld [vmem:[#allocation11 + $0x44] sm:$0xf]  ;;  %v5710_v12 = vor.u32 %v7547_v3, %v5707_v4  ;;  %v5422_v17 = vor.u32 %v7475_v8, %v5419_v9  ;;  %v5995_v4 = vld [vmem:[#allocation11 + $0x5d0] sm:$0xf0] }
 0x174   : > { %v8772_v23 = vpack.c.bf16 %v719_v15, %v719_v15  ;;  %2446 = vmatpush.bf16.msra.mxu0 %v5358_v6  ;;  %2459 = vmatpush.bf16.msra.mxu1 %v5486_v7  ;;  %v5291_v7 = vld [vmem:[#allocation11 + $0x50] sm:$0xf0]  ;;  %v7619_v3 = vld [vmem:[#allocation11 + $0x5c4] sm:$0xf] }
 0x175   : > { %v8774_v29 = vpack.c.bf16 %v732_v20, %v732_v20  ;;  %v5294_v16 = vor.u32 %v7443_v5, %v5291_v7  ;;  %v7439_v20 = vld [vmem:[#allocation11 + $0x24] sm:$0xf]  ;;  %v5515_v8 = vld [vmem:[#allocation11 + $0x210] sm:$0xf0]  ;;  %v5998_v14 = vor.u32 %v7619_v3, %v5995_v4 }
 0x176   : > { %2375 = vmatmul.bf16.vlgmr.msra.gmra.mxu2 %v8772_v23  ;;  %v7499_v7 = vld [vmem:[#allocation11 + $0x204] sm:$0xf] }
 0x177   : > { %2388 = vmatmul.bf16.vlgmr.msra.gmra.mxu3 %v8774_v29  ;;  %2471 = vmatpush.bf16.msra.mxu2 %v5630_v22  ;;  %v7531_v9 = vld [vmem:[#allocation11 + $0x304] sm:$0xf]  ;;  %v5518_v18 = vor.u32 %v7499_v7, %v5515_v8 }
 0x178   : > { %2484 = vmatpush.bf16.msra.mxu3 %v5758_v24  ;;  %2447 = vmatpush.bf16.msra.mxu0 %v5342_v25  ;;  %v5275_v24 = vld [vmem:[#allocation11 + $0x30] sm:$0xf0]  ;;  %v7471_v25 = vld [vmem:[#allocation11 + $0x124] sm:$0xf] }
 0x179   : > { %2460 = vmatpush.bf16.msra.mxu1 %v5470_v30  ;;  %v720_v44 = vpop.f32.mrf.mxu2  ;;  %v7639_v4 = vld [vmem:[#allocation11 + $0x664] sm:$0xf] }
 0x17a   : > { %v733_v49 = vpop.f32.mrf.mxu3  ;;  %v744_v51 = vpop.f32.mrf.mxu0  ;;  %v5387_v44 = vld [vmem:[#allocation11 + $0x110] sm:$0xf0] }
 0x17b   : > { %2472 = vmatpush.bf16.msra.mxu2 %v5614_v36  ;;  %v745_v55 = vadd.f32 %v744_v51, %v637_v37  ;;  %v757_v56 = vpop.f32.mrf.mxu1  ;;  %v5278_v37 = vor.u32 %v7439_v20, %v5275_v24  ;;  %v6011_v49 = vld [vmem:[#allocation11 + $0x5f0] sm:$0xf0]  ;;  %v7615_v20 = vld [vmem:[#allocation11 + $0x5a4] sm:$0xf] }
 0x17c   : > { %2485 = vmatpush.bf16.msra.mxu3 %v5742_v38  ;;  %v758_v57 = vadd.f32 %v757_v56, %v638_v39  ;;  %2448 = vmatpush.bf16.msra.mxu0 %v5326_v40  ;;  %v5406_v38 = vor.u32 %v7471_v25, %v5403_v50  ;;  %v5675_v39 = vld [vmem:[#allocation11 + $0x350] sm:$0xf0]  ;;  %v7435_v40 = vld [vmem:[#allocation11 + $0x4] sm:$0xf] }
 0x17d   : > { %v8781_v62 = vpack.c.bf16 %v745_v55, %v745_v55  ;;  %2461 = vmatpush.bf16.msra.mxu1 %v5454_v45  ;;  %v7591_v45 = vld [vmem:[#allocation11 + $0x4e4] sm:$0xf]  ;;  %v5678_v51 = vor.u32 %v7539_v35, %v5675_v39  ;;  %v5262_v54 = vor.u32 %v7435_v40, %v5259_v42  ;;  %v5390_v55 = vor.u32 %v7467_v43, %v5387_v44  ;;  %v6107_v42 = vld [vmem:[#allocation11 + $0x6b0] sm:$0xf0] }
 0x17e   : > { %v8783_v6 = vpack.c.bf16 %v758_v57, %v758_v57  ;;  %v5659_v57 = vld [vmem:[#allocation11 + $0x330] sm:$0xf0]  ;;  %v7651_v50 = vld [vmem:[#allocation11 + $0x6c4] sm:$0xf]  ;;  %v5838_v43 = vor.u32 %v7579_v33, %v5835_v34  ;;  %v7498_v33 = vld [vmem:[#allocation11 + $0x1f4] sm:$0xf0] }
 0x17f   : > { %2473 = vmatpush.bf16.msra.mxu2 %v5598_v41  ;;  %2401 = vmatmul.bf16.vlgmr.msrb.gmra.mxu0 %v8781_v62  ;;  %v7535_v41 = vld [vmem:[#allocation11 + $0x324] sm:$0xf] }
 0x180   : > { %2486 = vmatpush.bf16.msra.mxu3 %v5726_v58  ;;  %2414 = vmatmul.bf16.vlgmr.msrb.gmra.mxu1 %v8783_v6  ;;  %v5886_v58 = vor.u32 %v7591_v45, %v5883_v47  ;;  %v5662_v5 = vor.u32 %v7535_v41, %v5659_v57  ;;  %v7611_v35 = vld [vmem:[#allocation11 + $0x584] sm:$0xf] }
 0x181   : > { %2449 = vmatpush.bf16.msra.mxu0 %v5310_v1  ;;  %2462 = vmatpush.bf16.msra.mxu1 %v5438_v2  ;;  %v770_v15 = vpop.f32.mrf.mxu2  ;;  %v5534_v1 = vor.u32 %v7503_v52, %v5531_v53  ;;  %v5867_v2 = vld [vmem:[#allocation11 + $0x4d0] sm:$0xf0]  ;;  %v7647_v40 = vld [vmem:[#allocation11 + $0x6a4] sm:$0xf] }
 0x182   : > { %v771_v21 = vadd.f32 %v770_v15, %v639_v59  ;;  %v783_v22 = vpop.f32.mrf.mxu3  ;;  %v746_v26 = vpop.f32.mrf.mxu0  ;;  %v6014_v59 = vor.u32 %v7623_v48, %v6011_v49  ;;  %v5870_v13 = vor.u32 %v7587_v61, %v5867_v2  ;;  %v7687_v15 = vld [vmem:[#allocation11 + $0x7e4] sm:$0xf]  ;;  %v5819_v48 = vld [vmem:[#allocation11 + $0x470] sm:$0xf0]  ;;  %v6110_v52 = vor.u32 %v7647_v40, %v6107_v42 }
 0x183   : > { %v784_v27 = vadd.f32 %v783_v22, %v640_v10  ;;  %2474 = vmatpush.bf16.msra.mxu2 %v5582_v11  ;;  %v759_v30 = vpop.f32.mrf.mxu1  ;;  %v5643_v10 = vld [vmem:[#allocation11 + $0x310] sm:$0xf0]  ;;  %v7655_v11 = vld [vmem:[#allocation11 + $0x6e4] sm:$0xf] }
 0x184   : > { %v8788_v31 = vpack.c.bf16 %v771_v21, %v771_v21  ;;  %2487 = vmatpush.bf16.msra.mxu3 %v5710_v12  ;;  %v6139_v12 = vld [vmem:[#allocation11 + $0x6f0] sm:$0xf0]  ;;  %v5646_v22 = vor.u32 %v7531_v9, %v5643_v10  ;;  %v7683_v30 = vld [vmem:[#allocation11 + $0x7c4] sm:$0xf] }
 0x185   : > { %v8790_v36 = vpack.c.bf16 %v784_v27, %v784_v27  ;;  %2450 = vmatpush.bf16.msra.mxu0 %v5294_v16  ;;  %2463 = vmatpush.bf16.msra.mxu1 %v5422_v17  ;;  %v6267_v16 = vld [vmem:[#allocation11 + $0x7f0] sm:$0xf0]  ;;  %v7583_v17 = vld [vmem:[#allocation11 + $0x4a4] sm:$0xf]  ;;  %v6142_v24 = vor.u32 %v7655_v11, %v6139_v12 }
 0x186   : > { %2427 = vmatmul.bf16.vlgmr.msrb.gmra.mxu2 %v8788_v31  ;;  %v5979_v21 = vld [vmem:[#allocation11 + $0x5b0] sm:$0xf0]  ;;  %v6270_v25 = vor.u32 %v7687_v15, %v6267_v16  ;;  %v5854_v27 = vor.u32 %v7583_v17, %v5851_v19  ;;  %v7679_v45 = vld [vmem:[#allocation11 + $0x7a4] sm:$0xf] }
 0x187   : > { %2440 = vmatmul.bf16.vlgmr.msrb.gmra.mxu3 %v8790_v36  ;;  %2475 = vmatpush.bf16.msra.mxu2 %v5566_v28  ;;  %v6123_v26 = vld [vmem:[#allocation11 + $0x6d0] sm:$0xf0]  ;;  %v5982_v28 = vor.u32 %v7615_v20, %v5979_v21  ;;  %v7575_v47 = vld [vmem:[#allocation11 + $0x464] sm:$0xf] }
 0x188   : > { %2488 = vmatpush.bf16.msra.mxu3 %v5694_v32  ;;  %v6251_v32 = vld [vmem:[#allocation11 + $0x7d0] sm:$0xf0]  ;;  %v7607_v49 = vld [vmem:[#allocation11 + $0x564] sm:$0xf] }
 0x189   : > { %2451 = vmatpush.bf16.msra.mxu0 %v5278_v37  ;;  %2464 = vmatpush.bf16.msra.mxu1 %v5406_v38  ;;  %v772_v56 = vpop.f32.mrf.mxu2  ;;  %v5963_v37 = vld [vmem:[#allocation11 + $0x590] sm:$0xf0]  ;;  %v6126_v38 = vor.u32 %v7651_v50, %v6123_v26  ;;  %v6254_v39 = vor.u32 %v7683_v30, %v6251_v32  ;;  %v7675_v57 = vld [vmem:[#allocation11 + $0x784] sm:$0xf]  ;;  %v7466_v30 = vld [vmem:[#allocation11 + $0xf4] sm:$0xf0] }
 0x18a   : > { %v785_v60 = vpop.f32.mrf.mxu3  ;;  %v5966_v44 = vor.u32 %v7611_v35, %v5963_v37  ;;  %v5822_v56 = vor.u32 %v7575_v47, %v5819_v48  ;;  %v7603_v61 = vld [vmem:[#allocation11 + $0x544] sm:$0xf]  ;;  %v6203_v10 = vld [vmem:[#allocation11 + $0x770] sm:$0xf0]  ;;  %v5505_v32 = vld [vmem:[#allocation11 + $0x1e8] sm:$0xf] }
 0x18b   : > { %2476 = vmatpush.bf16.msra.mxu2 %v5550_v46  ;;  %v6235_v46 = vld [vmem:[#allocation11 + $0x7b0] sm:$0xf0]  ;;  %v7671_v9 = vld [vmem:[#allocation11 + $0x764] sm:$0xf]  ;;  %v7462_v47 = vld [vmem:[#allocation11 + $0xd4] sm:$0xf0] }
 0x18c   : > { %2489 = vmatpush.bf16.msra.mxu3 %v5678_v51  ;;  %v5947_v51 = vld [vmem:[#allocation11 + $0x570] sm:$0xf0]  ;;  %v6238_v53 = vor.u32 %v7679_v45, %v6235_v46  ;;  %v7567_v11 = vld [vmem:[#allocation11 + $0x424] sm:$0xf]  ;;  %v6206_v16 = vor.u32 %v7671_v9, %v6203_v10  ;;  %v5361_v45 = vld [vmem:[#allocation11 + $0xc8] sm:$0xf] }
 0x18d   : > { %2452 = vmatpush.bf16.msra.mxu0 %v5262_v54  ;;  %2465 = vmatpush.bf16.msra.mxu1 %v5390_v55  ;;  %v7643_v54 = vld [vmem:[#allocation11 + $0x684] sm:$0xf]  ;;  %v6091_v55 = vld [vmem:[#allocation11 + $0x690] sm:$0xf0]  ;;  %v5950_v41 = vor.u32 %v7607_v49, %v5947_v51  ;;  %v5489_v48 = vld [vmem:[#allocation11 + $0x1c8] sm:$0xf] }
 0x18e   : > { %v5803_v60 = vld [vmem:[#allocation11 + $0x450] sm:$0xf0]  ;;  %v6094_v2 = vor.u32 %v7643_v54, %v6091_v55  ;;  %v7635_v17 = vld [vmem:[#allocation11 + $0x644] sm:$0xf]  ;;  %v7494_v49 = vld [vmem:[#allocation11 + $0x1d4] sm:$0xf0] }
 0x18f   : > { %2477 = vmatpush.bf16.msra.mxu2 %v5534_v1  ;;  %v5931_v1 = vld [vmem:[#allocation11 + $0x550] sm:$0xf0]  ;;  %v7667_v19 = vld [vmem:[#allocation11 + $0x744] sm:$0xf]  ;;  %v5617_v9 = vld [vmem:[#allocation11 + $0x2c8] sm:$0xf] }
 0x190   : > { %2490 = vmatpush.bf16.msra.mxu3 %v5662_v5  ;;  %2453 = vmatmul.bf16.vlgmr.msra.gmra.mxu0 %v8764_v63  ;;  %v6075_v5 = vld [vmem:[#allocation11 + $0x670] sm:$0xf0]  ;;  %v5934_v8 = vor.u32 %v7603_v61, %v5931_v1  ;;  %v7595_v50 = vld [vmem:[#allocation11 + $0x504] sm:$0xf]  ;;  %v5345_v1 = vld [vmem:[#allocation11 + $0xa8] sm:$0xf] }
 0x191   : > { %2497 = vmatpush.bf16.msrb.mxu0 %v5886_v58  ;;  %2510 = vmatpush.bf16.msrb.mxu1 %v6014_v59  ;;  %v6219_v58 = vld [vmem:[#allocation11 + $0x790] sm:$0xf0]  ;;  %v7571_v59 = vld [vmem:[#allocation11 + $0x444] sm:$0xf]  ;;  %v6078_v15 = vor.u32 %v7639_v4, %v6075_v5  ;;  %v5473_v5 = vld [vmem:[#allocation11 + $0x1a8] sm:$0xf] }
 0x192   : > { %2466 = vmatmul.bf16.vlgmr.msra.gmra.mxu1 %v8766_v0  ;;  %v6222_v3 = vor.u32 %v7675_v57, %v6219_v58  ;;  %v5806_v7 = vor.u32 %v7571_v59, %v5803_v60  ;;  %v5787_v12 = vld [vmem:[#allocation11 + $0x430] sm:$0xf0]  ;;  %v7631_v35 = vld [vmem:[#allocation11 + $0x624] sm:$0xf]  ;;  %v5362_v57 = vor.u32 %v7462_v47, %v5361_v45  ;;  %v5490_v58 = vor.u32 %v7494_v49, %v5489_v48  ;;  %v5761_v59 = vld [vmem:[#allocation11 + $0x3e8] sm:$0xf] }
 0x193   : > { %2478 = vmatpush.bf16.msra.mxu2 %v5518_v18  ;;  %v6059_v18 = vld [vmem:[#allocation11 + $0x650] sm:$0xf0]  ;;  %v5790_v20 = vor.u32 %v7567_v11, %v5787_v12  ;;  %v7663_v40 = vld [vmem:[#allocation11 + $0x724] sm:$0xf]  ;;  %v7562_v60 = vld [vmem:[#allocation11 + $0x3f4] sm:$0xf0] }
 0x194   : > { %2491 = vmatpush.bf16.msra.mxu3 %v5646_v22  ;;  %v6187_v22 = vld [vmem:[#allocation11 + $0x750] sm:$0xf0]  ;;  %v7659_v54 = vld [vmem:[#allocation11 + $0x704] sm:$0xf]  ;;  %v7526_v10 = vld [vmem:[#allocation11 + $0x2d4] sm:$0xf0] }
 0x195   : > { %2498 = vmatpush.bf16.msrb.mxu0 %v5870_v13  ;;  %2511 = vmatpush.bf16.msrb.mxu1 %v5998_v14  ;;  %v7599_v13 = vld [vmem:[#allocation11 + $0x524] sm:$0xf]  ;;  %v5915_v14 = vld [vmem:[#allocation11 + $0x530] sm:$0xf0]  ;;  %v6190_v34 = vor.u32 %v7667_v19, %v6187_v22  ;;  %v5745_v12 = vld [vmem:[#allocation11 + $0x3c8] sm:$0xf] }
 0x196   : > { %2479 = vmatmul.bf16.vlgmr.msra.gmra.mxu2 %v8772_v23  ;;  %v5918_v21 = vor.u32 %v7599_v13, %v5915_v14  ;;  %v5899_v26 = vld [vmem:[#allocation11 + $0x510] sm:$0xf0]  ;;  %v7558_v13 = vld [vmem:[#allocation11 + $0x3d4] sm:$0xf0]  ;;  %v5569_v49 = vld [vmem:[#allocation11 + $0x268] sm:$0xf] }
 0x197   : > { %2523 = vmatpush.bf16.msrb.mxu2 %v6142_v24  ;;  %2492 = vmatmul.bf16.vlgmr.msra.gmra.mxu3 %v8774_v29  ;;  %v7563_v24 = vld [vmem:[#allocation11 + $0x404] sm:$0xf]  ;;  %v6043_v37 = vld [vmem:[#allocation11 + $0x630] sm:$0xf0]  ;;  %v7486_v19 = vld [vmem:[#allocation11 + $0x194] sm:$0xf0] }
 0x198   : > { %2536 = vmatpush.bf16.msrb.mxu3 %v6270_v25  ;;  %v5771_v25 = vld [vmem:[#allocation11 + $0x410] sm:$0xf0]  ;;  %v6046_v46 = vor.u32 %v7631_v35, %v6043_v37  ;;  %v7522_v22 = vld [vmem:[#allocation11 + $0x2b4] sm:$0xf0]  ;;  %v5585_v35 = vld [vmem:[#allocation11 + $0x288] sm:$0xf] }
 0x199   : > { %2499 = vmatpush.bf16.msrb.mxu0 %v5854_v27  ;;  %2512 = vmatpush.bf16.msrb.mxu1 %v5982_v28  ;;  %v5377_v27 = vld [vmem:[#allocation11 + $0xe8] sm:$0xf]  ;;  %v6062_v28 = vor.u32 %v7635_v17, %v6059_v18  ;;  %v6171_v42 = vld [vmem:[#allocation11 + $0x730] sm:$0xf0]  ;;  %v5618_v17 = vor.u32 %v7526_v10, %v5617_v9  ;;  %v7518_v37 = vld [vmem:[#allocation11 + $0x294] sm:$0xf0] }
 0x19a   : > { %v6174_v51 = vor.u32 %v7663_v40, %v6171_v42  ;;  %v6155_v55 = vld [vmem:[#allocation11 + $0x710] sm:$0xf0]  ;;  %v5457_v18 = vld [vmem:[#allocation11 + $0x188] sm:$0xf]  ;;  %v7550_v40 = vld [vmem:[#allocation11 + $0x394] sm:$0xf0]  ;;  %v5586_v45 = vor.u32 %v7518_v37, %v5585_v35 }
 0x19b   : > { %2524 = vmatpush.bf16.msrb.mxu2 %v6126_v38  ;;  %v5774_v38 = vor.u32 %v7563_v24, %v5771_v25  ;;  %v5729_v25 = vld [vmem:[#allocation11 + $0x3a8] sm:$0xf]  ;;  %v7478_v47 = vld [vmem:[#allocation11 + $0x154] sm:$0xf0] }
 0x19c   : > { %2537 = vmatpush.bf16.msrb.mxu3 %v6254_v39  ;;  %v5902_v39 = vor.u32 %v7595_v50, %v5899_v26  ;;  %v7554_v50 = vld [vmem:[#allocation11 + $0x3b4] sm:$0xf0]  ;;  %v5458_v26 = vor.u32 %v7486_v19, %v5457_v18  ;;  %v5393_v9 = vld [vmem:[#allocation11 + $0x108] sm:$0xf] }
 0x19d   : > { %2500 = vmatpush.bf16.msrb.mxu0 %v5838_v43  ;;  %2513 = vmatpush.bf16.msrb.mxu1 %v5966_v44  ;;  %v5378_v43 = vor.u32 %v7466_v30, %v5377_v27  ;;  %v5506_v44 = vor.u32 %v7498_v33, %v5505_v32  ;;  %v5313_v27 = vld [vmem:[#allocation11 + $0x68] sm:$0xf]  ;;  %v7482_v33 = vld [vmem:[#allocation11 + $0x174] sm:$0xf0] }
 0x19e   : > { %v5441_v32 = vld [vmem:[#allocation11 + $0x168] sm:$0xf]  ;;  %v7470_v10 = vld [vmem:[#allocation11 + $0x114] sm:$0xf0] }
 0x19f   : > { %2525 = vmatpush.bf16.msrb.mxu2 %v6110_v52  ;;  %v7627_v52 = vld [vmem:[#allocation11 + $0x604] sm:$0xf]  ;;  %v5442_v42 = vor.u32 %v7482_v33, %v5441_v32  ;;  %v7506_v18 = vld [vmem:[#allocation11 + $0x234] sm:$0xf0]  ;;  %v5521_v33 = vld [vmem:[#allocation11 + $0x208] sm:$0xf] }
 0x1a0   : > { %2538 = vmatpush.bf16.msrb.mxu3 %v6238_v53  ;;  %v6027_v53 = vld [vmem:[#allocation11 + $0x610] sm:$0xf0]  ;;  %v5649_v35 = vld [vmem:[#allocation11 + $0x308] sm:$0xf]  ;;  %v7534_v37 = vld [vmem:[#allocation11 + $0x314] sm:$0xf0] }
 0x1a1   : > { %2501 = vmatpush.bf16.msrb.mxu0 %v5822_v56  ;;  %2514 = vmatpush.bf16.msrb.mxu1 %v5950_v41  ;;  %v5633_v56 = vld [vmem:[#allocation11 + $0x2e8] sm:$0xf]  ;;  %v7530_v41 = vld [vmem:[#allocation11 + $0x2f4] sm:$0xf0]  ;;  %v6030_v61 = vor.u32 %v7627_v52, %v6027_v53 }
 0x1a2   : > { %v5634_v4 = vor.u32 %v7530_v41, %v5633_v56  ;;  %v5697_v53 = vld [vmem:[#allocation11 + $0x368] sm:$0xf]  ;;  %v7442_v41 = vld [vmem:[#allocation11 + $0x34] sm:$0xf0] }
 0x1a3   : > { %2526 = vmatpush.bf16.msrb.mxu2 %v6094_v2  ;;  %v7458_v2 = vld [vmem:[#allocation11 + $0xb4] sm:$0xf0]  ;;  %v5281_v56 = vld [vmem:[#allocation11 + $0x28] sm:$0xf] }
 0x1a4   : > { %2539 = vmatpush.bf16.msrb.mxu3 %v6222_v3  ;;  %v6158_v3 = vor.u32 %v7659_v54, %v6155_v55  ;;  %v5346_v11 = vor.u32 %v7458_v2, %v5345_v1  ;;  %v7546_v54 = vld [vmem:[#allocation11 + $0x374] sm:$0xf0]  ;;  %v5282_v2 = vor.u32 %v7442_v41, %v5281_v56  ;;  %v6257_v41 = vld [vmem:[#allocation11 + $0x7c8] sm:$0xf] }
 0x1a5   : > { %2502 = vmatpush.bf16.msrb.mxu0 %v5806_v7  ;;  %2515 = vmatpush.bf16.msrb.mxu1 %v5934_v8  ;;  %v7490_v7 = vld [vmem:[#allocation11 + $0x1b4] sm:$0xf0]  ;;  %v5762_v8 = vor.u32 %v7562_v60, %v5761_v59  ;;  %v5698_v60 = vor.u32 %v7546_v54, %v5697_v53  ;;  %v6129_v54 = vld [vmem:[#allocation11 + $0x6c8] sm:$0xf] }
 0x1a6   : > { %v5474_v14 = vor.u32 %v7490_v7, %v5473_v5  ;;  %v7474_v59 = vld [vmem:[#allocation11 + $0x134] sm:$0xf0]  ;;  %v5265_v5 = vld [vmem:[#allocation11 + $0x8] sm:$0xf] }
 0x1a7   : > { %2527 = vmatpush.bf16.msrb.mxu2 %v6078_v15  ;;  %v5329_v15 = vld [vmem:[#allocation11 + $0x88] sm:$0xf]  ;;  %v7510_v1 = vld [vmem:[#allocation11 + $0x254] sm:$0xf0] }
 0x1a8   : > { %2540 = vmatpush.bf16.msrb.mxu3 %v6206_v16  ;;  %v7454_v16 = vld [vmem:[#allocation11 + $0x94] sm:$0xf0] }
 0x1a9   : > { %2503 = vmatpush.bf16.msrb.mxu0 %v5790_v20  ;;  %2516 = vmatpush.bf16.msrb.mxu1 %v5918_v21  ;;  %v5746_v20 = vor.u32 %v7558_v13, %v5745_v12  ;;  %v5601_v21 = vld [vmem:[#allocation11 + $0x2a8] sm:$0xf]  ;;  %v5330_v24 = vor.u32 %v7454_v16, %v5329_v15  ;;  %v7594_v13 = vld [vmem:[#allocation11 + $0x4f4] sm:$0xf0] }
 0x1aa   : > { %v5602_v30 = vor.u32 %v7522_v22, %v5601_v21  ;;  %v5889_v12 = vld [vmem:[#allocation11 + $0x4e8] sm:$0xf]  ;;  %v7626_v16 = vld [vmem:[#allocation11 + $0x5f4] sm:$0xf0]  ;;  %v5394_v22 = vor.u32 %v7470_v10, %v5393_v9 }
 0x1ab   : > { %2528 = vmatpush.bf16.msrb.mxu2 %v6062_v28  ;;  %v7450_v28 = vld [vmem:[#allocation11 + $0x74] sm:$0xf0] }
 0x1ac   : > { %2541 = vmatpush.bf16.msrb.mxu3 %v6190_v34  ;;  %v5730_v34 = vor.u32 %v7554_v50, %v5729_v25  ;;  %v7538_v21 = vld [vmem:[#allocation11 + $0x334] sm:$0xf0]  ;;  %v5873_v25 = vld [vmem:[#allocation11 + $0x4c8] sm:$0xf] }
 0x1ad   : > { %2504 = vmatpush.bf16.msrb.mxu0 %v5774_v38  ;;  %2517 = vmatpush.bf16.msrb.mxu1 %v5902_v39  ;;  %v5314_v38 = vor.u32 %v7450_v28, %v5313_v27  ;;  %v5713_v39 = vld [vmem:[#allocation11 + $0x388] sm:$0xf]  ;;  %v7590_v27 = vld [vmem:[#allocation11 + $0x4d4] sm:$0xf0] }
 0x1ae   : > { %v5714_v48 = vor.u32 %v7550_v40, %v5713_v39  ;;  %v6001_v28 = vld [vmem:[#allocation11 + $0x5c8] sm:$0xf]  ;;  %v7658_v39 = vld [vmem:[#allocation11 + $0x6f4] sm:$0xf0]  ;;  %v5874_v40 = vor.u32 %v7590_v27, %v5873_v25 }
 0x1af   : > { %2529 = vmatpush.bf16.msrb.mxu2 %v6046_v46  ;;  %v5425_v46 = vld [vmem:[#allocation11 + $0x148] sm:$0xf]  ;;  %v7682_v9 = vld [vmem:[#allocation11 + $0x7b4] sm:$0xf0] }
 0x1b0   : > { %2542 = vmatpush.bf16.msrb.mxu3 %v6174_v51  ;;  %2505 = vmatmul.bf16.vlgmr.msrb.gmra.mxu0 %v8781_v62  ;;  %v7514_v51 = vld [vmem:[#allocation11 + $0x274] sm:$0xf0]  ;;  %v5426_v55 = vor.u32 %v7478_v47, %v5425_v46  ;;  %v5857_v46 = vld [vmem:[#allocation11 + $0x4a8] sm:$0xf] }
 0x1b1   : > { %2549 = vmatpush.bf16.msra.mxu0 %v5378_v43  ;;  %2562 = vmatpush.bf16.msra.mxu1 %v5506_v44  ;;  %v5297_v43 = vld [vmem:[#allocation11 + $0x48] sm:$0xf]  ;;  %v7446_v44 = vld [vmem:[#allocation11 + $0x54] sm:$0xf0] }
 0x1b2   : > { %2518 = vmatmul.bf16.vlgmr.msrb.gmra.mxu1 %v8783_v6  ;;  %v5298_v52 = vor.u32 %v7446_v44, %v5297_v43  ;;  %v7690_v43 = vld [vmem:[#allocation11 + $0x7f4] sm:$0xf0] }
 0x1b3   : > { %2530 = vmatpush.bf16.msrb.mxu2 %v6030_v61  ;;  %v5553_v61 = vld [vmem:[#allocation11 + $0x248] sm:$0xf]  ;;  %v7586_v47 = vld [vmem:[#allocation11 + $0x4b4] sm:$0xf0] }
 0x1b4   : > { %2543 = vmatpush.bf16.msrb.mxu3 %v6158_v3  ;;  %v5681_v3 = vld [vmem:[#allocation11 + $0x348] sm:$0xf]  ;;  %v5858_v56 = vor.u32 %v7586_v47, %v5857_v46  ;;  %v7574_v25 = vld [vmem:[#allocation11 + $0x454] sm:$0xf0] }
 0x1b5   : > { %2550 = vmatpush.bf16.msra.mxu0 %v5362_v57  ;;  %2563 = vmatpush.bf16.msra.mxu1 %v5490_v58  ;;  %v5570_v57 = vor.u32 %v7514_v51, %v5569_v49  ;;  %v5409_v58 = vld [vmem:[#allocation11 + $0x128] sm:$0xf]  ;;  %v7606_v27 = vld [vmem:[#allocation11 + $0x554] sm:$0xf0] }
 0x1b6   : > { %2531 = vmatmul.bf16.vlgmr.msrb.gmra.mxu2 %v8788_v31  ;;  %v5410_v7 = vor.u32 %v7474_v59, %v5409_v58  ;;  %v5985_v51 = vld [vmem:[#allocation11 + $0x5a8] sm:$0xf]  ;;  %v7638_v46 = vld [vmem:[#allocation11 + $0x654] sm:$0xf0] }
 0x1b7   : > { %2575 = vmatpush.bf16.msra.mxu2 %v5634_v4  ;;  %2544 = vmatmul.bf16.vlgmr.msrb.gmra.mxu3 %v8790_v36  ;;  %v7542_v4 = vld [vmem:[#allocation11 + $0x354] sm:$0xf0]  ;;  %v5841_v59 = vld [vmem:[#allocation11 + $0x488] sm:$0xf] }
 0x1b8   : > { %2588 = vmatpush.bf16.msra.mxu3 %v5762_v8  ;;  %v7438_v8 = vld [vmem:[#allocation11 + $0x14] sm:$0xf0]  ;;  %v5682_v15 = vor.u32 %v7542_v4, %v5681_v3  ;;  %v6113_v4 = vld [vmem:[#allocation11 + $0x6a8] sm:$0xf] }
 0x1b9   : > { %2551 = vmatpush.bf16.msra.mxu0 %v5346_v11  ;;  %2564 = vmatpush.bf16.msra.mxu1 %v5474_v14  ;;  %v5554_v11 = vor.u32 %v7510_v1, %v5553_v61  ;;  %v6017_v14 = vld [vmem:[#allocation11 + $0x5e8] sm:$0xf]  ;;  %v5266_v19 = vor.u32 %v7438_v8, %v5265_v5  ;;  %v7650_v5 = vld [vmem:[#allocation11 + $0x6b4] sm:$0xf0] }
 0x1ba   : > { %v6018_v50 = vor.u32 %v7626_v16, %v6017_v14  ;;  %v5969_v1 = vld [vmem:[#allocation11 + $0x588] sm:$0xf] }
 0x1bb   : > { %2576 = vmatpush.bf16.msra.mxu2 %v5618_v17  ;;  %v5537_v17 = vld [vmem:[#allocation11 + $0x228] sm:$0xf] }
 0x1bc   : > { %2589 = vmatpush.bf16.msra.mxu3 %v5746_v20  ;;  %v5665_v20 = vld [vmem:[#allocation11 + $0x328] sm:$0xf] }
 0x1bd   : > { %2552 = vmatpush.bf16.msra.mxu0 %v5330_v24  ;;  %2565 = vmatpush.bf16.msra.mxu1 %v5458_v26  ;;  %v5890_v24 = vor.u32 %v7594_v13, %v5889_v12  ;;  %v5538_v26 = vor.u32 %v7506_v18, %v5537_v17  ;;  %v5666_v32 = vor.u32 %v7538_v21, %v5665_v20  ;;  %v6241_v8 = vld [vmem:[#allocation11 + $0x7a8] sm:$0xf]  ;;  %v7578_v12 = vld [vmem:[#allocation11 + $0x474] sm:$0xf0] }
 0x1be   : > { %v6114_v13 = vor.u32 %v7650_v5, %v6113_v4  ;;  %v5953_v14 = vld [vmem:[#allocation11 + $0x568] sm:$0xf]  ;;  %v6242_v16 = vor.u32 %v7682_v9, %v6241_v8  ;;  %v7646_v18 = vld [vmem:[#allocation11 + $0x694] sm:$0xf0]  ;;  %v7460_v8 = vld [vmem:[#allocation11 + $0xcc] sm:$0xf] }
 0x1bf   : > { %2577 = vmatpush.bf16.msra.mxu2 %v5602_v30  ;;  %v7622_v30 = vld [vmem:[#allocation11 + $0x5d4] sm:$0xf0]  ;;  %v6097_v17 = vld [vmem:[#allocation11 + $0x688] sm:$0xf] }
 0x1c0   : > { %2590 = vmatpush.bf16.msra.mxu3 %v5730_v34  ;;  %v7502_v34 = vld [vmem:[#allocation11 + $0x214] sm:$0xf0]  ;;  %v6002_v44 = vor.u32 %v7622_v30, %v6001_v28  ;;  %v6225_v20 = vld [vmem:[#allocation11 + $0x788] sm:$0xf] }
 0x1c1   : > { %2553 = vmatpush.bf16.msra.mxu0 %v5314_v38  ;;  %2566 = vmatpush.bf16.msra.mxu1 %v5442_v42  ;;  %v6145_v38 = vld [vmem:[#allocation11 + $0x6e8] sm:$0xf]  ;;  %v7678_v21 = vld [vmem:[#allocation11 + $0x794] sm:$0xf0] }
 0x1c2   : > { %v6273_v42 = vld [vmem:[#allocation11 + $0x7e8] sm:$0xf]  ;;  %v6146_v49 = vor.u32 %v7658_v39, %v6145_v38  ;;  %v6226_v28 = vor.u32 %v7678_v21, %v6225_v20  ;;  %v7570_v39 = vld [vmem:[#allocation11 + $0x434] sm:$0xf0]  ;;  %v5635_v20 = vld [vmem:[#allocation11 + $0x2f8] sm:$0xf0] }
 0x1c3   : > { %2578 = vmatpush.bf16.msra.mxu2 %v5586_v45  ;;  %v5522_v45 = vor.u32 %v7502_v34, %v5521_v33  ;;  %v6274_v53 = vor.u32 %v7690_v43, %v6273_v42  ;;  %v6081_v30 = vld [vmem:[#allocation11 + $0x668] sm:$0xf]  ;;  %v7602_v43 = vld [vmem:[#allocation11 + $0x534] sm:$0xf0] }
 0x1c4   : > { %2591 = vmatpush.bf16.msra.mxu3 %v5714_v48  ;;  %v5650_v48 = vor.u32 %v7534_v37, %v5649_v35  ;;  %v6209_v34 = vld [vmem:[#allocation11 + $0x768] sm:$0xf]  ;;  %v7674_v35 = vld [vmem:[#allocation11 + $0x774] sm:$0xf0] }
 0x1c5   : > { %2554 = vmatpush.bf16.msra.mxu0 %v5298_v52  ;;  %2567 = vmatpush.bf16.msra.mxu1 %v5426_v55  ;;  %v7618_v52 = vld [vmem:[#allocation11 + $0x5b4] sm:$0xf0]  ;;  %v5793_v38 = vld [vmem:[#allocation11 + $0x428] sm:$0xf] }
 0x1c6   : > { %v7654_v55 = vld [vmem:[#allocation11 + $0x6d4] sm:$0xf0]  ;;  %v5986_v58 = vor.u32 %v7618_v52, %v5985_v51  ;;  %v5921_v42 = vld [vmem:[#allocation11 + $0x528] sm:$0xf]  ;;  %v5794_v47 = vor.u32 %v7570_v39, %v5793_v38  ;;  %v7556_v39 = vld [vmem:[#allocation11 + $0x3cc] sm:$0xf] }
 0x1c7   : > { %2579 = vmatpush.bf16.msra.mxu2 %v5570_v57  ;;  %v7686_v57 = vld [vmem:[#allocation11 + $0x7d4] sm:$0xf0]  ;;  %v6130_v61 = vor.u32 %v7654_v55, %v6129_v54  ;;  %v5777_v51 = vld [vmem:[#allocation11 + $0x408] sm:$0xf]  ;;  %v5922_v52 = vor.u32 %v7602_v43, %v5921_v42  ;;  %v7452_v43 = vld [vmem:[#allocation11 + $0x8c] sm:$0xf] }
 0x1c8   : > { %2592 = vmatpush.bf16.msra.mxu3 %v5698_v60  ;;  %v7582_v60 = vld [vmem:[#allocation11 + $0x494] sm:$0xf0]  ;;  %v6258_v3 = vor.u32 %v7686_v57, %v6257_v41  ;;  %v5905_v54 = vld [vmem:[#allocation11 + $0x508] sm:$0xf]  ;;  %v7464_v41 = vld [vmem:[#allocation11 + $0xec] sm:$0xf] }
 0x1c9   : > { %2555 = vmatpush.bf16.msra.mxu0 %v5282_v2  ;;  %2568 = vmatpush.bf16.msra.mxu1 %v5410_v7  ;;  %v7614_v2 = vld [vmem:[#allocation11 + $0x594] sm:$0xf0]  ;;  %v5842_v7 = vor.u32 %v7582_v60, %v5841_v59  ;;  %v5379_v57 = vld [vmem:[#allocation11 + $0xf8] sm:$0xf0] }
 0x1ca   : > { %v5970_v10 = vor.u32 %v7614_v2, %v5969_v1  ;;  %v7598_v55 = vld [vmem:[#allocation11 + $0x514] sm:$0xf0]  ;;  %v5507_v60 = vld [vmem:[#allocation11 + $0x1f8] sm:$0xf0] }
 0x1cb   : > { %2580 = vmatpush.bf16.msra.mxu2 %v5554_v11  ;;  %v5825_v11 = vld [vmem:[#allocation11 + $0x468] sm:$0xf]  ;;  %v7634_v1 = vld [vmem:[#allocation11 + $0x634] sm:$0xf0]  ;;  %v5906_v5 = vor.u32 %v7598_v55, %v5905_v54  ;;  %v7552_v55 = vld [vmem:[#allocation11 + $0x3ac] sm:$0xf] }
 0x1cc   : > { %2593 = vmatpush.bf16.msra.mxu3 %v5682_v15  ;;  %v7610_v15 = vld [vmem:[#allocation11 + $0x574] sm:$0xf0] }
 0x1cd   : > { %2556 = vmatpush.bf16.msra.mxu0 %v5266_v19  ;;  %2569 = vmatpush.bf16.msra.mxu1 %v5394_v22  ;;  %v5826_v19 = vor.u32 %v7578_v12, %v5825_v11  ;;  %v5954_v22 = vor.u32 %v7610_v15, %v5953_v14  ;;  %v7666_v4 = vld [vmem:[#allocation11 + $0x734] sm:$0xf0]  ;;  %v5363_v11 = vld [vmem:[#allocation11 + $0xd8] sm:$0xf0]  ;;  %v7492_v12 = vld [vmem:[#allocation11 + $0x1cc] sm:$0xf] }
 0x1ce   : > { %v6033_v15 = vld [vmem:[#allocation11 + $0x608] sm:$0xf]  ;;  %v5366_v21 = vor.u32 %v7460_v8, %v5363_v11 }
 0x1cf   : > { %2581 = vmatpush.bf16.msra.mxu2 %v5538_v26  ;;  %v5937_v26 = vld [vmem:[#allocation11 + $0x548] sm:$0xf] }
 0x1d0   : > { %2594 = vmatpush.bf16.msra.mxu3 %v5666_v32  ;;  %2557 = vmatmul.bf16.vlgmr.msra.gmra.mxu0 %v8764_v63  ;;  %v7642_v32 = vld [vmem:[#allocation11 + $0x674] sm:$0xf0]  ;;  %v5938_v37 = vor.u32 %v7606_v27, %v5937_v26  ;;  %v7456_v26 = vld [vmem:[#allocation11 + $0xac] sm:$0xf]  ;;  %v5347_v27 = vld [vmem:[#allocation11 + $0xb8] sm:$0xf0] }
 0x1d1   : > { %2601 = vmatpush.bf16.msrb.mxu0 %v5890_v24  ;;  %2614 = vmatpush.bf16.msrb.mxu1 %v6018_v50  ;;  %v5809_v24 = vld [vmem:[#allocation11 + $0x448] sm:$0xf]  ;;  %v6098_v50 = vor.u32 %v7646_v18, %v6097_v17  ;;  %v7662_v18 = vld [vmem:[#allocation11 + $0x714] sm:$0xf0]  ;;  %v5350_v38 = vor.u32 %v7456_v26, %v5347_v27  ;;  %v7472_v26 = vld [vmem:[#allocation11 + $0x12c] sm:$0xf] }
 0x1d2   : > { %2570 = vmatmul.bf16.vlgmr.msra.gmra.mxu1 %v8766_v0  ;;  %v5810_v33 = vor.u32 %v7574_v25, %v5809_v24  ;;  %v6161_v17 = vld [vmem:[#allocation11 + $0x708] sm:$0xf]  ;;  %v5763_v24 = vld [vmem:[#allocation11 + $0x3f8] sm:$0xf0] }
 0x1d3   : > { %2582 = vmatpush.bf16.msra.mxu2 %v5522_v45  ;;  %v6065_v45 = vld [vmem:[#allocation11 + $0x648] sm:$0xf]  ;;  %v5411_v27 = vld [vmem:[#allocation11 + $0x138] sm:$0xf0] }
 0x1d4   : > { %2595 = vmatpush.bf16.msra.mxu3 %v5650_v48  ;;  %v6193_v48 = vld [vmem:[#allocation11 + $0x748] sm:$0xf] }
 0x1d5   : > { %2602 = vmatpush.bf16.msrb.mxu0 %v5874_v40  ;;  %2615 = vmatpush.bf16.msrb.mxu1 %v6002_v44  ;;  %v6082_v40 = vor.u32 %v7642_v32, %v6081_v30  ;;  %v6210_v44 = vor.u32 %v7674_v35, %v6209_v34  ;;  %v7488_v32 = vld [vmem:[#allocation11 + $0x1ac] sm:$0xf] }
 0x1d6   : > { %2583 = vmatmul.bf16.vlgmr.msra.gmra.mxu2 %v8772_v23  ;;  %v7524_v35 = vld [vmem:[#allocation11 + $0x2cc] sm:$0xf] }
 0x1d7   : > { %2627 = vmatpush.bf16.msrb.mxu2 %v6146_v49  ;;  %2596 = vmatmul.bf16.vlgmr.msra.gmra.mxu3 %v8774_v29  ;;  %v7670_v49 = vld [vmem:[#allocation11 + $0x754] sm:$0xf0] }
 0x1d8   : > { %2640 = vmatpush.bf16.msrb.mxu3 %v6274_v53  ;;  %v7566_v53 = vld [vmem:[#allocation11 + $0x414] sm:$0xf0]  ;;  %v6194_v59 = vor.u32 %v7670_v49, %v6193_v48 }
 0x1d9   : > { %2603 = vmatpush.bf16.msrb.mxu0 %v5858_v56  ;;  %2616 = vmatpush.bf16.msrb.mxu1 %v5986_v58  ;;  %v6066_v56 = vor.u32 %v7638_v46, %v6065_v45  ;;  %v7496_v58 = vld [vmem:[#allocation11 + $0x1ec] sm:$0xf]  ;;  %v5778_v2 = vor.u32 %v7566_v53, %v5777_v51  ;;  %v5603_v53 = vld [vmem:[#allocation11 + $0x2b8] sm:$0xf0] }
 0x1da   : > { %v5510_v9 = vor.u32 %v7496_v58, %v5507_v60  ;;  %v7484_v46 = vld [vmem:[#allocation11 + $0x18c] sm:$0xf]  ;;  %v5315_v58 = vld [vmem:[#allocation11 + $0x78] sm:$0xf0] }
 0x1db   : > { %2628 = vmatpush.bf16.msrb.mxu2 %v6130_v61  ;;  %v6049_v61 = vld [vmem:[#allocation11 + $0x628] sm:$0xf]  ;;  %v7480_v60 = vld [vmem:[#allocation11 + $0x16c] sm:$0xf] }
 0x1dc   : > { %2641 = vmatpush.bf16.msrb.mxu3 %v6258_v3  ;;  %v6177_v3 = vld [vmem:[#allocation11 + $0x728] sm:$0xf] }
 0x1dd   : > { %2604 = vmatpush.bf16.msrb.mxu0 %v5842_v7  ;;  %2617 = vmatpush.bf16.msrb.mxu1 %v5970_v10  ;;  %v5382_v7 = vor.u32 %v7464_v41, %v5379_v57  ;;  %v6050_v10 = vor.u32 %v7634_v1, %v6049_v61  ;;  %v6178_v14 = vor.u32 %v7666_v4, %v6177_v3  ;;  %v7448_v57 = vld [vmem:[#allocation11 + $0x6c] sm:$0xf]  ;;  %v5443_v61 = vld [vmem:[#allocation11 + $0x178] sm:$0xf0] }
 0x1de   : > { %v5587_v3 = vld [vmem:[#allocation11 + $0x298] sm:$0xf0]  ;;  %v5318_v4 = vor.u32 %v7448_v57, %v5315_v58  ;;  %v5446_v8 = vor.u32 %v7480_v60, %v5443_v61  ;;  %v7536_v58 = vld [vmem:[#allocation11 + $0x32c] sm:$0xf] }
 0x1df   : > { %2629 = vmatpush.bf16.msrb.mxu2 %v6114_v13  ;;  %v5491_v13 = vld [vmem:[#allocation11 + $0x1d8] sm:$0xf0] }
 0x1e0   : > { %2642 = vmatpush.bf16.msrb.mxu3 %v6242_v16  ;;  %v7630_v16 = vld [vmem:[#allocation11 + $0x614] sm:$0xf0]  ;;  %v5494_v25 = vor.u32 %v7492_v12, %v5491_v13  ;;  %v7476_v12 = vld [vmem:[#allocation11 + $0x14c] sm:$0xf]  ;;  %v5427_v13 = vld [vmem:[#allocation11 + $0x158] sm:$0xf0] }
 0x1e1   : > { %2605 = vmatpush.bf16.msrb.mxu0 %v5826_v19  ;;  %2618 = vmatpush.bf16.msrb.mxu1 %v5954_v22  ;;  %v7528_v19 = vld [vmem:[#allocation11 + $0x2ec] sm:$0xf] }
 0x1e2   : > { %v7560_v22 = vld [vmem:[#allocation11 + $0x3ec] sm:$0xf]  ;;  %v5638_v30 = vor.u32 %v7528_v19, %v5635_v20 }
 0x1e3   : > { %2630 = vmatpush.bf16.msrb.mxu2 %v6098_v50  ;;  %v6034_v50 = vor.u32 %v7630_v16, %v6033_v15  ;;  %v5766_v34 = vor.u32 %v7560_v22, %v5763_v24  ;;  %v7544_v20 = vld [vmem:[#allocation11 + $0x36c] sm:$0xf]  ;;  %v5430_v22 = vor.u32 %v7476_v12, %v5427_v13  ;;  %v5651_v13 = vld [vmem:[#allocation11 + $0x318] sm:$0xf0] }
 0x1e4   : > { %2643 = vmatpush.bf16.msrb.mxu3 %v6226_v28  ;;  %v6162_v28 = vor.u32 %v7662_v18, %v6161_v17  ;;  %v7512_v17 = vld [vmem:[#allocation11 + $0x26c] sm:$0xf]  ;;  %v5571_v18 = vld [vmem:[#allocation11 + $0x278] sm:$0xf0] }
 0x1e5   : > { %2606 = vmatpush.bf16.msrb.mxu0 %v5810_v33  ;;  %2619 = vmatpush.bf16.msrb.mxu1 %v5938_v37  ;;  %v5475_v33 = vld [vmem:[#allocation11 + $0x1b8] sm:$0xf0]  ;;  %v7440_v24 = vld [vmem:[#allocation11 + $0x2c] sm:$0xf] }
 0x1e6   : > { %v5619_v37 = vld [vmem:[#allocation11 + $0x2d8] sm:$0xf0]  ;;  %v5478_v42 = vor.u32 %v7488_v32, %v5475_v33 }
 0x1e7   : > { %2631 = vmatpush.bf16.msrb.mxu2 %v6082_v40  ;;  %v5747_v40 = vld [vmem:[#allocation11 + $0x3d8] sm:$0xf0]  ;;  %v5622_v45 = vor.u32 %v7524_v35, %v5619_v37  ;;  %v7540_v35 = vld [vmem:[#allocation11 + $0x34c] sm:$0xf] }
 0x1e8   : > { %2644 = vmatpush.bf16.msrb.mxu3 %v6210_v44  ;;  %v5331_v44 = vld [vmem:[#allocation11 + $0x98] sm:$0xf0]  ;;  %v5750_v51 = vor.u32 %v7556_v39, %v5747_v40  ;;  %v5414_v40 = vor.u32 %v7472_v26, %v5411_v27  ;;  %v7616_v27 = vld [vmem:[#allocation11 + $0x5ac] sm:$0xf] }
 0x1e9   : > { %2607 = vmatpush.bf16.msrb.mxu0 %v5794_v47  ;;  %2620 = vmatpush.bf16.msrb.mxu1 %v5922_v52  ;;  %v5459_v47 = vld [vmem:[#allocation11 + $0x198] sm:$0xf0]  ;;  %v7520_v52 = vld [vmem:[#allocation11 + $0x2ac] sm:$0xf]  ;;  %v5334_v54 = vor.u32 %v7452_v43, %v5331_v44 }
 0x1ea   : > { %v5462_v41 = vor.u32 %v7484_v46, %v5459_v47  ;;  %v5555_v32 = vld [vmem:[#allocation11 + $0x258] sm:$0xf0]  ;;  %v7468_v43 = vld [vmem:[#allocation11 + $0x10c] sm:$0xf] }
 0x1eb   : > { %2632 = vmatpush.bf16.msrb.mxu2 %v6066_v56  ;;  %v5731_v56 = vld [vmem:[#allocation11 + $0x3b8] sm:$0xf0]  ;;  %v7592_v46 = vld [vmem:[#allocation11 + $0x4ec] sm:$0xf] }
 0x1ec   : > { %2645 = vmatpush.bf16.msrb.mxu3 %v6194_v59  ;;  %v8808_v48 = vpop.f32.mrf.mxu0  ;;  %v8810_v49 = vpop.f32.mrf.mxu1  ;;  %v5606_v59 = vor.u32 %v7520_v52, %v5603_v53  ;;  %v5734_v1 = vor.u32 %v7552_v55, %v5731_v56  ;;  %v5683_v37 = vld [vmem:[#allocation11 + $0x358] sm:$0xf0]  ;;  %v7504_v55 = vld [vmem:[#allocation11 + $0x22c] sm:$0xf] }
 0x1ed   : > { %2608 = vmatpush.bf16.msrb.mxu0 %v5778_v2  ;;  %2621 = vmatpush.bf16.msrb.mxu1 %v5906_v5  ;;  %v7516_v2 = vld [vmem:[#allocation11 + $0x28c] sm:$0xf]  ;;  %v5395_v44 = vld [vmem:[#allocation11 + $0x118] sm:$0xf0]  ;;  %v5686_v53 = vor.u32 %v7540_v35, %v5683_v37 }
 0x1ee   : > { %v7548_v5 = vld [vmem:[#allocation11 + $0x38c] sm:$0xf]  ;;  %v5590_v11 = vor.u32 %v7516_v2, %v5587_v3  ;;  %v5891_v47 = vld [vmem:[#allocation11 + $0x4f8] sm:$0xf0]  ;;  %v5398_v60 = vor.u32 %v7468_v43, %v5395_v44 }
 0x1ef   : > { %2633 = vmatpush.bf16.msrb.mxu2 %v6050_v10  ;;  %v5299_v10 = vld [vmem:[#allocation11 + $0x58] sm:$0xf0]  ;;  %v5894_v61 = vor.u32 %v7592_v46, %v5891_v47  ;;  %v7580_v43 = vld [vmem:[#allocation11 + $0x48c] sm:$0xf] }
 0x1f0   : > { %2646 = vmatpush.bf16.msrb.mxu3 %v6178_v14  ;;  %2609 = vmatmul.bf16.vlgmr.msrb.gmra.mxu0 %v8781_v62  ;;  %v5539_v56 = vld [vmem:[#allocation11 + $0x238] sm:$0xf0] }
 0x1f1   : > { %2653 = vmatpush.bf16.msra.mxu0 %v5382_v7  ;;  %2666 = vmatpush.bf16.msra.mxu1 %v5510_v9  ;;  %v5715_v7 = vld [vmem:[#allocation11 + $0x398] sm:$0xf0]  ;;  %v7444_v9 = vld [vmem:[#allocation11 + $0x4c] sm:$0xf]  ;;  %v5542_v3 = vor.u32 %v7504_v55, %v5539_v56 }
 0x1f2   : > { %2622 = vmatmul.bf16.vlgmr.msrb.gmra.mxu1 %v8783_v6  ;;  %v5718_v16 = vor.u32 %v7548_v5, %v5715_v7  ;;  %v5302_v19 = vor.u32 %v7444_v9, %v5299_v10  ;;  %v7620_v5 = vld [vmem:[#allocation11 + $0x5cc] sm:$0xf]  ;;  %v6003_v7 = vld [vmem:[#allocation11 + $0x5d8] sm:$0xf0] }
 0x1f3   : > { %2634 = vmatpush.bf16.msrb.mxu2 %v6034_v50  ;;  %v5574_v50 = vor.u32 %v7512_v17, %v5571_v18  ;;  %v7500_v9 = vld [vmem:[#allocation11 + $0x20c] sm:$0xf]  ;;  %v5523_v10 = vld [vmem:[#allocation11 + $0x218] sm:$0xf0] }
 0x1f4   : > { %2647 = vmatpush.bf16.msrb.mxu3 %v6162_v28  ;;  %v2352_v14 = vpop.f32.mrf.mxu0  ;;  %v2365_v15 = vpop.f32.mrf.mxu1  ;;  %v7688_v18 = vld [vmem:[#allocation11 + $0x7ec] sm:$0xf]  ;;  %v6131_v35 = vld [vmem:[#allocation11 + $0x6d8] sm:$0xf0] }
 0x1f5   : > { %2654 = vmatpush.bf16.msra.mxu0 %v5366_v21  ;;  %2667 = vmatpush.bf16.msra.mxu1 %v5494_v25  ;;  %v5699_v21 = vld [vmem:[#allocation11 + $0x378] sm:$0xf0]  ;;  %v7656_v14 = vld [vmem:[#allocation11 + $0x6ec] sm:$0xf] }
 0x1f6   : > { %2635 = vmatmul.bf16.vlgmr.msrb.gmra.mxu2 %v8788_v31  ;;  %v5283_v25 = vld [vmem:[#allocation11 + $0x38] sm:$0xf0]  ;;  %v5702_v28 = vor.u32 %v7544_v20, %v5699_v21  ;;  %v6006_v20 = vor.u32 %v7620_v5, %v6003_v7  ;;  %v5526_v21 = vor.u32 %v7500_v9, %v5523_v10  ;;  %v7680_v56 = vld [vmem:[#allocation11 + $0x7ac] sm:$0xf] }
 0x1f7   : > { %2679 = vmatpush.bf16.msra.mxu2 %v5638_v30  ;;  %2648 = vmatmul.bf16.vlgmr.msrb.gmra.mxu3 %v8790_v36  ;;  %v7508_v30 = vld [vmem:[#allocation11 + $0x24c] sm:$0xf]  ;;  %v6147_v15 = vld [vmem:[#allocation11 + $0x6f8] sm:$0xf0] }
 0x1f8   : > { %2692 = vmatpush.bf16.msra.mxu3 %v5766_v34  ;;  %v5286_v34 = vor.u32 %v7440_v24, %v5283_v25  ;;  %v5859_v24 = vld [vmem:[#allocation11 + $0x4b8] sm:$0xf0]  ;;  %v6150_v26 = vor.u32 %v7656_v14, %v6147_v15  ;;  %v7644_v5 = vld [vmem:[#allocation11 + $0x68c] sm:$0xf] }
 0x1f9   : > { %2655 = vmatpush.bf16.msra.mxu0 %v5350_v38  ;;  %2668 = vmatpush.bf16.msra.mxu1 %v5478_v42  ;;  %v8814_v33 = vpop.f32.mrf.mxu2  ;;  %v7436_v38 = vld [vmem:[#allocation11 + $0xc] sm:$0xf]  ;;  %v5267_v42 = vld [vmem:[#allocation11 + $0x18] sm:$0xf0] }
 0x1fa   : > { %v8816_v39 = vpop.f32.mrf.mxu3  ;;  %v5270_v57 = vor.u32 %v7436_v38, %v5267_v42  ;;  %v7684_v38 = vld [vmem:[#allocation11 + $0x7cc] sm:$0xf]  ;;  %v5971_v46 = vld [vmem:[#allocation11 + $0x598] sm:$0xf0] }
 0x1fb   : > { %2680 = vmatpush.bf16.msra.mxu2 %v5622_v45  ;;  %v5558_v45 = vor.u32 %v7508_v30, %v5555_v32  ;;  %v7676_v9 = vld [vmem:[#allocation11 + $0x78c] sm:$0xf]  ;;  %v5939_v15 = vld [vmem:[#allocation11 + $0x558] sm:$0xf0] }
 0x1fc   : > { %2693 = vmatpush.bf16.msra.mxu3 %v5750_v51  ;;  %v7624_v51 = vld [vmem:[#allocation11 + $0x5ec] sm:$0xf]  ;;  %v8818_v52 = vpop.f32.mrf.mxu0 }
 0x1fd   : > { %2656 = vmatpush.bf16.msra.mxu0 %v5334_v54  ;;  %2669 = vmatpush.bf16.msra.mxu1 %v5462_v41  ;;  %v6019_v54 = vld [vmem:[#allocation11 + $0x5f8] sm:$0xf0]  ;;  %v8820_v41 = vpop.f32.mrf.mxu1  ;;  %v7604_v14 = vld [vmem:[#allocation11 + $0x54c] sm:$0xf] }
 0x1fe   : > { %v6022_v2 = vor.u32 %v7624_v51, %v6019_v54  ;;  %v7648_v51 = vld [vmem:[#allocation11 + $0x6ac] sm:$0xf] }
 0x1ff   : > { %2681 = vmatpush.bf16.msra.mxu2 %v5606_v59  ;;  %v5667_v59 = vld [vmem:[#allocation11 + $0x338] sm:$0xf0] }
 0x200   : > { %2694 = vmatpush.bf16.msra.mxu3 %v5734_v1  ;;  %v7588_v1 = vld [vmem:[#allocation11 + $0x4cc] sm:$0xf] }
 0x201   : > { %2657 = vmatpush.bf16.msra.mxu0 %v5318_v4  ;;  %2670 = vmatpush.bf16.msra.mxu1 %v5446_v8  ;;  %v5875_v4 = vld [vmem:[#allocation11 + $0x4d8] sm:$0xf0]  ;;  %v5670_v8 = vor.u32 %v7536_v58, %v5667_v59  ;;  %v2378_v12 = vpop.f32.mrf.mxu2  ;;  %v7576_v59 = vld [vmem:[#allocation11 + $0x46c] sm:$0xf] }
 0x202   : > { %v5878_v17 = vor.u32 %v7588_v1, %v5875_v4  ;;  %v7608_v1 = vld [vmem:[#allocation11 + $0x56c] sm:$0xf]  ;;  %v5811_v12 = vld [vmem:[#allocation11 + $0x458] sm:$0xf0] }
 0x203   : > { %2682 = vmatpush.bf16.msra.mxu2 %v5590_v11  ;;  %v7532_v11 = vld [vmem:[#allocation11 + $0x30c] sm:$0xf] }
 0x204   : > { %2695 = vmatpush.bf16.msra.mxu3 %v5718_v16  ;;  %v2391_v16 = vpop.f32.mrf.mxu3  ;;  %v2404_v25 = vpop.f32.mrf.mxu0 }
 0x205   : > { %2658 = vmatpush.bf16.msra.mxu0 %v5302_v19  ;;  %2671 = vmatpush.bf16.msra.mxu1 %v5430_v22  ;;  %v6275_v19 = vld [vmem:[#allocation11 + $0x7f8] sm:$0xf0]  ;;  %v7584_v22 = vld [vmem:[#allocation11 + $0x4ac] sm:$0xf]  ;;  %v2417_v30 = vpop.f32.mrf.mxu1 }
 0x206   : > { %v6278_v32 = vor.u32 %v7688_v18, %v6275_v19  ;;  %v5862_v37 = vor.u32 %v7584_v22, %v5859_v24  ;;  %v7640_v18 = vld [vmem:[#allocation11 + $0x66c] sm:$0xf]  ;;  %v6083_v19 = vld [vmem:[#allocation11 + $0x678] sm:$0xf0] }
 0x207   : > { %2683 = vmatpush.bf16.msra.mxu2 %v5574_v50  ;;  %v5654_v50 = vor.u32 %v7532_v11, %v5651_v13  ;;  %v7572_v11 = vld [vmem:[#allocation11 + $0x44c] sm:$0xf]  ;;  %v6211_v25 = vld [vmem:[#allocation11 + $0x778] sm:$0xf0] }
 0x208   : > { %2696 = vmatpush.bf16.msra.mxu3 %v5702_v28  ;;  %v5987_v28 = vld [vmem:[#allocation11 + $0x5b8] sm:$0xf0]  ;;  %v5814_v22 = vor.u32 %v7572_v11, %v5811_v12  ;;  %v7672_v24 = vld [vmem:[#allocation11 + $0x76c] sm:$0xf]  ;;  %v6377_v11 = vld [vmem:[#allocation14 + $0xc0] sm:$0xf] }
 0x209   : > { %2659 = vmatpush.bf16.msra.mxu0 %v5286_v34  ;;  %2672 = vmatpush.bf16.msra.mxu1 %v5414_v40  ;;  %v7652_v34 = vld [vmem:[#allocation11 + $0x6cc] sm:$0xf]  ;;  %v6259_v40 = vld [vmem:[#allocation11 + $0x7d8] sm:$0xf0]  ;;  %v5990_v42 = vor.u32 %v7616_v27, %v5987_v28  ;;  %v6086_v28 = vor.u32 %v7640_v18, %v6083_v19 }
 0x20a   : > { %v6134_v44 = vor.u32 %v7652_v34, %v6131_v35  ;;  %v6262_v47 = vor.u32 %v7684_v38, %v6259_v40  ;;  %v5795_v27 = vld [vmem:[#allocation11 + $0x438] sm:$0xf0]  ;;  %v7600_v30 = vld [vmem:[#allocation11 + $0x52c] sm:$0xf] }
 0x20b   : > { %2684 = vmatpush.bf16.msra.mxu2 %v5558_v45  ;;  %v7612_v45 = vld [vmem:[#allocation11 + $0x58c] sm:$0xf]  ;;  %v6067_v40 = vld [vmem:[#allocation11 + $0x658] sm:$0xf0] }
 0x20c   : > { %2697 = vmatpush.bf16.msra.mxu3 %v5686_v53  ;;  %v6115_v53 = vld [vmem:[#allocation11 + $0x6b8] sm:$0xf0]  ;;  %v8826_v54 = vpop.f32.mrf.mxu3  ;;  %v5974_v58 = vor.u32 %v7612_v45, %v5971_v46  ;;  %v7636_v38 = vld [vmem:[#allocation11 + $0x64c] sm:$0xf] }
 0x20d   : > { %2660 = vmatpush.bf16.msra.mxu0 %v5270_v57  ;;  %2673 = vmatpush.bf16.msra.mxu1 %v5398_v60  ;;  %v6243_v57 = vld [vmem:[#allocation11 + $0x7b8] sm:$0xf0]  ;;  %v7564_v45 = vld [vmem:[#allocation11 + $0x40c] sm:$0xf] }
 0x20e   : > { %v5827_v60 = vld [vmem:[#allocation11 + $0x478] sm:$0xf0]  ;;  %v6246_v4 = vor.u32 %v7680_v56, %v6243_v57  ;;  %v6393_v56 = vld [vmem:[#allocation14 + $0xe0] sm:$0xf]  ;;  %v7849_v57 = vld [vmem:[#allocation14 + $0xec] sm:$0xf0] }
 0x20f   : > { %2685 = vmatpush.bf16.msra.mxu2 %v5542_v3  ;;  %v8830_v3 = vpop.f32.mrf.mxu0  ;;  %v8832_v7 = vpop.f32.mrf.mxu1  ;;  %v6035_v18 = vld [vmem:[#allocation11 + $0x618] sm:$0xf0]  ;;  %v7660_v19 = vld [vmem:[#allocation11 + $0x70c] sm:$0xf] }
 0x210   : > { %2698 = vmatpush.bf16.msra.mxu3 %v5670_v8  ;;  %2661 = vmatmul.bf16.vlgmr.msra.gmra.mxu0 %v8764_v63  ;;  %v5843_v63 = vld [vmem:[#allocation11 + $0x498] sm:$0xf0]  ;;  %v5830_v8 = vor.u32 %v7576_v59, %v5827_v60  ;;  %v7881_v60 = vld [vmem:[#allocation14 + $0x1ec] sm:$0xf0] }
 0x211   : > { %2705 = vmatpush.bf16.msrb.mxu0 %v5894_v61  ;;  %2718 = vmatpush.bf16.msrb.mxu1 %v6022_v2  ;;  %v5846_v55 = vor.u32 %v7580_v43, %v5843_v63  ;;  %v6118_v61 = vor.u32 %v7648_v51, %v6115_v53  ;;  %v5955_v2 = vld [vmem:[#allocation11 + $0x578] sm:$0xf0]  ;;  %v7668_v63 = vld [vmem:[#allocation11 + $0x74c] sm:$0xf] }
 0x212   : > { %2674 = vmatmul.bf16.vlgmr.msra.gmra.mxu1 %v8766_v0  ;;  %v8824_v0 = vpop.f32.mrf.mxu2  ;;  %v5958_v10 = vor.u32 %v7608_v1, %v5955_v2  ;;  %v7596_v51 = vld [vmem:[#allocation11 + $0x50c] sm:$0xf]  ;;  %v5907_v53 = vld [vmem:[#allocation11 + $0x518] sm:$0xf0] }
 0x213   : > { %2686 = vmatpush.bf16.msra.mxu2 %v5526_v21  ;;  %v6051_v1 = vld [vmem:[#allocation11 + $0x638] sm:$0xf0] }
 0x214   : > { %2699 = vmatpush.bf16.msra.mxu3 %v5654_v50  ;;  %v2443_v21 = vpop.f32.mrf.mxu3  ;;  %v5942_v50 = vor.u32 %v7604_v14, %v5939_v15  ;;  %v7845_v14 = vld [vmem:[#allocation14 + $0xcc] sm:$0xf0]  ;;  %v6505_v15 = vld [vmem:[#allocation14 + $0x1c0] sm:$0xf] }
 0x215   : > { %2706 = vmatpush.bf16.msrb.mxu0 %v5878_v17  ;;  %2719 = vmatpush.bf16.msrb.mxu1 %v6006_v20  ;;  %v8837_v20 = vld [vmem:[%s9013_s5] sm:$0xf] }
 0x216   : > { %2687 = vmatmul.bf16.vlgmr.msra.gmra.mxu2 %v8772_v23  ;;  %v6099_v23 = vld [vmem:[#allocation11 + $0x698] sm:$0xf0]  ;;  %v1053_v34 = vperm.slane %v8837_v20, 0 }
 0x217   : > { %2731 = vmatpush.bf16.msrb.mxu2 %v6150_v26  ;;  %2700 = vmatmul.bf16.vlgmr.msra.gmra.mxu3 %v8774_v29  ;;  %v6227_v29 = vld [vmem:[#allocation11 + $0x798] sm:$0xf0]  ;;  %v6102_v13 = vor.u32 %v7644_v5, %v6099_v23  ;;  %v7568_v26 = vld [vmem:[#allocation11 + $0x42c] sm:$0xf]  ;;  %v2456_v35 = vpop.f32.mrf.mxu0 }
 0x218   : > { %2744 = vmatpush.bf16.msrb.mxu3 %v6278_v32  ;;  %v6230_v17 = vor.u32 %v7676_v9, %v6227_v29  ;;  %v5923_v32 = vld [vmem:[#allocation11 + $0x538] sm:$0xf0]  ;;  %v5798_v43 = vor.u32 %v7568_v26, %v5795_v27  ;;  %v2351_v2 = vadd.f32 %v8808_v48, %v1053_v34  ;;  %v5910_v29 = vor.u32 %v7596_v51, %v5907_v53  ;;  %v7873_v35 = vld [vmem:[#allocation14 + $0x1ac] sm:$0xf0]  ;;  %v6473_v51 = vld [vmem:[#allocation14 + $0x180] sm:$0xf] }
 0x219   : > { %2707 = vmatpush.bf16.msrb.mxu0 %v5862_v37  ;;  %2720 = vmatpush.bf16.msrb.mxu1 %v5990_v42  ;;  %v6214_v37 = vor.u32 %v7672_v24, %v6211_v25  ;;  %v2469_v42 = vpop.f32.mrf.mxu1  ;;  %v5926_v46 = vor.u32 %v7600_v30, %v5923_v32  ;;  %v6179_v9 = vld [vmem:[#allocation11 + $0x738] sm:$0xf0]  ;;  %v6649_v24 = vld [vmem:[#allocation14 + $0x2e0] sm:$0xf]  ;;  %v7913_v25 = vld [vmem:[#allocation14 + $0x2ec] sm:$0xf0] }
 0x21a   : > { %v2430_v16 = vpop.f32.mrf.mxu2  ;;  %v2364_v21 = vadd.f32 %v8810_v49, %v2351_v2  ;;  %v7841_v30 = vld [vmem:[#allocation14 + $0xac] sm:$0xf0]  ;;  %v1054_v32 = vperm.slane %v8837_v20, 1  ;;  %v6489_v49 = vld [vmem:[#allocation14 + $0x1a0] sm:$0xf] }
 0x21b   : > { %2732 = vmatpush.bf16.msrb.mxu2 %v6134_v44  ;;  %v6195_v44 = vld [vmem:[#allocation11 + $0x758] sm:$0xf0]  ;;  %v7877_v16 = vld [vmem:[#allocation14 + $0x1cc] sm:$0xf0] }
 0x21c   : > { %2745 = vmatpush.bf16.msrb.mxu3 %v6262_v47  ;;  %v5779_v47 = vld [vmem:[#allocation11 + $0x418] sm:$0xf0]  ;;  %v6198_v59 = vor.u32 %v7668_v63, %v6195_v44  ;;  %v8843_v5 = vpop.f32.mrf.mxu3  ;;  %v6506_v26 = vor.u32 %v7877_v16, %v6505_v15  ;;  %v7909_v63 = vld [vmem:[#allocation14 + $0x2cc] sm:$0xf0]  ;;  %v6585_v16 = vld [vmem:[#allocation14 + $0x260] sm:$0xf] }
 0x21d   : > { %2708 = vmatpush.bf16.msrb.mxu0 %v5846_v55  ;;  %2721 = vmatpush.bf16.msrb.mxu1 %v5974_v58  ;;  %v6070_v55 = vor.u32 %v7636_v38, %v6067_v40  ;;  %v6521_v58 = vld [vmem:[#allocation14 + $0x1e0] sm:$0xf]  ;;  %v5782_v23 = vor.u32 %v7564_v45, %v5779_v47  ;;  %v2377_v38 = vadd.f32 %v8814_v33, %v2364_v21  ;;  %v7837_v47 = vld [vmem:[#allocation14 + $0x8c] sm:$0xf0] }
 0x21e   : > { %v6522_v12 = vor.u32 %v7881_v60, %v6521_v58  ;;  %v6490_v45 = vor.u32 %v7873_v35, %v6489_v49  ;;  %v7869_v53 = vld [vmem:[#allocation14 + $0x18c] sm:$0xf0]  ;;  %v6409_v49 = vld [vmem:[#allocation14 + $0x100] sm:$0xf] }
 0x21f   : > { %2733 = vmatpush.bf16.msrb.mxu2 %v6118_v61  ;;  %v7632_v61 = vld [vmem:[#allocation11 + $0x62c] sm:$0xf]  ;;  %v6474_v58 = vor.u32 %v7869_v53, %v6473_v51  ;;  %v7833_v60 = vld [vmem:[#allocation14 + $0x6c] sm:$0xf0] }
 0x220   : > { %2746 = vmatpush.bf16.msrb.mxu3 %v6246_v4  ;;  %v7825_v21 = vld [vmem:[#allocation14 + $0x2c] sm:$0xf0] }
 0x221   : > { %2709 = vmatpush.bf16.msrb.mxu0 %v5830_v8  ;;  %2722 = vmatpush.bf16.msrb.mxu1 %v5958_v10  ;;  %v7664_v8 = vld [vmem:[#allocation11 + $0x72c] sm:$0xf]  ;;  %v6394_v10 = vor.u32 %v7849_v57, %v6393_v56  ;;  %v7905_v56 = vld [vmem:[#allocation14 + $0x2ac] sm:$0xf0] }
 0x222   : > { %v8841_v4 = vpop.f32.mrf.mxu2  ;;  %v6182_v48 = vor.u32 %v7664_v8, %v6179_v9  ;;  %v6601_v8 = vld [vmem:[#allocation14 + $0x280] sm:$0xf]  ;;  %v7901_v9 = vld [vmem:[#allocation14 + $0x28c] sm:$0xf0] }
 0x223   : > { %2734 = vmatpush.bf16.msrb.mxu2 %v6102_v13  ;;  %v6054_v13 = vor.u32 %v7632_v61, %v6051_v1  ;;  %v6457_v61 = vld [vmem:[#allocation14 + $0x160] sm:$0xf]  ;;  %v7865_v1 = vld [vmem:[#allocation14 + $0x16c] sm:$0xf0] }
 0x224   : > { %2747 = vmatpush.bf16.msrb.mxu3 %v6230_v17  ;;  %v7628_v17 = vld [vmem:[#allocation11 + $0x60c] sm:$0xf]  ;;  %v2495_v42 = vpop.f32.mrf.mxu3  ;;  %v7853_v35 = vld [vmem:[#allocation14 + $0x10c] sm:$0xf0] }
 0x225   : > { %2710 = vmatpush.bf16.msrb.mxu0 %v5814_v22  ;;  %2723 = vmatpush.bf16.msrb.mxu1 %v5942_v50  ;;  %v6163_v22 = vld [vmem:[#allocation11 + $0x718] sm:$0xf0]  ;;  %v6378_v50 = vor.u32 %v7845_v14, %v6377_v11  ;;  %v6038_v27 = vor.u32 %v7628_v17, %v6035_v18  ;;  %v6313_v11 = vld [vmem:[#allocation14 + $0x40] sm:$0xf]  ;;  %v6602_v14 = vor.u32 %v7901_v9, %v6601_v8  ;;  %v7879_v42 = vld [vmem:[#allocation14 + $0x1e4] sm:$0xf] }
 0x226   : > { %v6166_v34 = vor.u32 %v7660_v19, %v6163_v22  ;;  %v6297_v19 = vld [vmem:[#allocation14 + $0x20] sm:$0xf]  ;;  %v6410_v53 = vor.u32 %v7853_v35, %v6409_v49 }
 0x227   : > { %2735 = vmatpush.bf16.msrb.mxu2 %v6086_v28  ;;  %v6361_v28 = vld [vmem:[#allocation14 + $0xa0] sm:$0xf] }
 0x228   : > { %2748 = vmatpush.bf16.msrb.mxu3 %v6214_v37  ;;  %v6650_v37 = vor.u32 %v7913_v25, %v6649_v24  ;;  %v6362_v44 = vor.u32 %v7841_v30, %v6361_v28  ;;  %v6425_v24 = vld [vmem:[#allocation14 + $0x120] sm:$0xf]  ;;  %v7857_v25 = vld [vmem:[#allocation14 + $0x12c] sm:$0xf0]  ;;  %v6298_v30 = vor.u32 %v7825_v21, %v6297_v19  ;;  %v6475_v19 = vld [vmem:[#allocation14 + $0x190] sm:$0xf0] }
 0x229   : > { %2711 = vmatpush.bf16.msrb.mxu0 %v5798_v43  ;;  %2724 = vmatpush.bf16.msrb.mxu1 %v5926_v46  ;;  %v6633_v43 = vld [vmem:[#allocation14 + $0x2c0] sm:$0xf] }
 0x22a   : > { %v2482_v40 = vpop.f32.mrf.mxu2  ;;  %v6345_v46 = vld [vmem:[#allocation14 + $0x80] sm:$0xf]  ;;  %v6634_v33 = vor.u32 %v7909_v63, %v6633_v43 }
 0x22b   : > { %2736 = vmatpush.bf16.msrb.mxu2 %v6070_v55  ;;  %v6617_v55 = vld [vmem:[#allocation14 + $0x2a0] sm:$0xf]  ;;  %v6346_v57 = vor.u32 %v7837_v47, %v6345_v46  ;;  %v6395_v40 = vld [vmem:[#allocation14 + $0xf0] sm:$0xf0]  ;;  %v7889_v46 = vld [vmem:[#allocation14 + $0x22c] sm:$0xf0] }
 0x22c   : > { %2749 = vmatpush.bf16.msrb.mxu3 %v6198_v59  ;;  %v6329_v59 = vld [vmem:[#allocation14 + $0x60] sm:$0xf]  ;;  %v6618_v2 = vor.u32 %v7905_v56, %v6617_v55  ;;  %v7843_v56 = vld [vmem:[#allocation14 + $0xc4] sm:$0xf] }
 0x22d   : > { %2712 = vmatpush.bf16.msrb.mxu0 %v5782_v23  ;;  %2725 = vmatpush.bf16.msrb.mxu1 %v5910_v29  ;;  %v2506_v23 = vpop.f32.mrf.mxu0 }
 0x22f   : > { %2737 = vmatpush.bf16.msrb.mxu2 %v6054_v13  ;;  %v2519_v29 = vpop.f32.mrf.mxu1  ;;  %v6441_v13 = vld [vmem:[#allocation14 + $0x140] sm:$0xf] }
 0x230   : > { %2750 = vmatpush.bf16.msrb.mxu3 %v6182_v48  ;;  %2713 = vmatmul.bf16.vlgmr.msrb.gmra.mxu0 %v8781_v62  ;;  %v2455_v62 = vadd.f32 %v8830_v3, %v1054_v32 }
 0x231   : > { %3669 = vmatpush.bf16.msra.mxu0 %v6394_v10  ;;  %3682 = vmatpush.bf16.msra.mxu1 %v6522_v12  ;;  %v6458_v10 = vor.u32 %v7865_v1, %v6457_v61  ;;  %v7829_v12 = vld [vmem:[#allocation14 + $0x4c] sm:$0xf0] }
 0x232   : > { %2726 = vmatmul.bf16.vlgmr.msrb.gmra.mxu1 %v8783_v6  ;;  %v2390_v6 = vadd.f32 %v8816_v39, %v2377_v38  ;;  %v2468_v3 = vadd.f32 %v8832_v7, %v2455_v62  ;;  %v7861_v7 = vld [vmem:[#allocation14 + $0x14c] sm:$0xf0]  ;;  %v6314_v17 = vor.u32 %v7829_v12, %v6313_v11  ;;  %v7847_v38 = vld [vmem:[#allocation14 + $0xe4] sm:$0xf] }
 0x233   : > { %2738 = vmatpush.bf16.msrb.mxu2 %v6038_v27  ;;  %v6442_v18 = vor.u32 %v7861_v7, %v6441_v13  ;;  %v6569_v27 = vld [vmem:[#allocation14 + $0x240] sm:$0xf]  ;;  %v7885_v61 = vld [vmem:[#allocation14 + $0x20c] sm:$0xf0]  ;;  %v7871_v12 = vld [vmem:[#allocation14 + $0x1a4] sm:$0xf] }
 0x234   : > { %2751 = vmatpush.bf16.msrb.mxu3 %v6166_v34  ;;  %v2403_v39 = vadd.f32 %v8818_v52, %v2390_v6  ;;  %v7897_v52 = vld [vmem:[#allocation14 + $0x26c] sm:$0xf0]  ;;  %v6491_v13 = vld [vmem:[#allocation14 + $0x1b0] sm:$0xf0] }
 0x235   : > { %3670 = vmatpush.bf16.msra.mxu0 %v6378_v50  ;;  %3683 = vmatpush.bf16.msra.mxu1 %v6506_v26  ;;  %v6586_v50 = vor.u32 %v7897_v52, %v6585_v16  ;;  %v2508_v26 = vpop.f32.mrf.mxu0  ;;  %v7821_v34 = vld [vmem:[#allocation14 + $0xc] sm:$0xf0]  ;;  %v6635_v16 = vld [vmem:[#allocation14 + $0x2d0] sm:$0xf0] }
 0x236   : > { %2739 = vmatmul.bf16.vlgmr.msrb.gmra.mxu2 %v8788_v31  ;;  %v2481_v31 = vadd.f32 %v8841_v4, %v2468_v3  ;;  %v2416_v15 = vadd.f32 %v8820_v41, %v2403_v39  ;;  %v7893_v41 = vld [vmem:[#allocation14 + $0x24c] sm:$0xf0]  ;;  %v6537_v3 = vld [vmem:[#allocation14 + $0x200] sm:$0xf]  ;;  %v6651_v39 = vld [vmem:[#allocation14 + $0x2f0] sm:$0xf0] }
 0x237   : > { %3695 = vmatpush.bf16.msra.mxu2 %v6650_v37  ;;  %2752 = vmatmul.bf16.vlgmr.msrb.gmra.mxu3 %v8790_v36  ;;  %v6330_v36 = vor.u32 %v7833_v60, %v6329_v59  ;;  %v2521_v28 = vpop.f32.mrf.mxu1  ;;  %v6570_v43 = vor.u32 %v7893_v41, %v6569_v27  ;;  %v6507_v60 = vld [vmem:[#allocation14 + $0x1d0] sm:$0xf0]  ;;  %v7831_v26 = vld [vmem:[#allocation14 + $0x64] sm:$0xf] }
 0x238   : > { %v2494_v48 = vadd.f32 %v8843_v5, %v2481_v31  ;;  %v2429_v4 = vadd.f32 %v8824_v0, %v2416_v15  ;;  %v6281_v5 = vld [vmem:[#allocation14] sm:$0xf]  ;;  %v6426_v0 = vor.u32 %v7857_v25, %v6425_v24  ;;  %v7907_v15 = vld [vmem:[#allocation14 + $0x2c4] sm:$0xf]  ;;  %v6619_v24 = vld [vmem:[#allocation14 + $0x2b0] sm:$0xf0] }
 0x239   : > { %3671 = vmatpush.bf16.msra.mxu0 %v6362_v44  ;;  %3684 = vmatpush.bf16.msra.mxu1 %v6490_v45  ;;  %v2532_v63 = vpop.f32.mrf.mxu2  ;;  %v6523_v44 = vld [vmem:[#allocation14 + $0x1f0] sm:$0xf0]  ;;  %v6553_v45 = vld [vmem:[#allocation14 + $0x220] sm:$0xf]  ;;  %v6282_v51 = vor.u32 %v7821_v34, %v6281_v5  ;;  %v6638_v21 = vor.u32 %v7907_v15, %v6635_v16  ;;  %v7863_v41 = vld [vmem:[#allocation14 + $0x164] sm:$0xf] }
 0x23a   : > { %v2507_v22 = vadd.f32 %v2506_v23, %v2494_v48  ;;  %v2442_v32 = vadd.f32 %v8826_v54, %v2429_v4  ;;  %v2545_v62 = vpop.f32.mrf.mxu3  ;;  %v6526_v55 = vor.u32 %v7879_v42, %v6523_v44  ;;  %v6554_v59 = vor.u32 %v7889_v46, %v6553_v45  ;;  %v6347_v4 = vld [vmem:[#allocation14 + $0x90] sm:$0xf0]  ;;  %v6385_v16 = vld [vmem:[#allocation14 + $0xc8] sm:$0xf] }
 0x23b   : > { %3696 = vmatpush.bf16.msra.mxu2 %v6634_v33  ;;  %v6398_v33 = vor.u32 %v7847_v38, %v6395_v40  ;;  %v6494_v48 = vor.u32 %v7871_v12, %v6491_v13  ;;  %v6331_v27 = vld [vmem:[#allocation14 + $0x70] sm:$0xf0]  ;;  %v7859_v40 = vld [vmem:[#allocation14 + $0x144] sm:$0xf] }
 0x23c   : > { %v2520_v37 = vadd.f32 %v2519_v29, %v2507_v22  ;;  %v8861_v54 = vpack.c.bf16 %v2442_v32, %v2442_v32  ;;  %v7839_v29 = vld [vmem:[#allocation14 + $0xa4] sm:$0xf]  ;;  %v6459_v28 = vld [vmem:[#allocation14 + $0x170] sm:$0xf0]  ;;  %v6334_v49 = vor.u32 %v7831_v26, %v6331_v27 }
 0x23d   : > { %3672 = vmatpush.bf16.msra.mxu0 %v6346_v57  ;;  %3685 = vmatpush.bf16.msra.mxu1 %v6474_v58  ;;  %v6379_v57 = vld [vmem:[#allocation14 + $0xd0] sm:$0xf0]  ;;  %v7875_v58 = vld [vmem:[#allocation14 + $0x1c4] sm:$0xf]  ;;  %v6462_v35 = vor.u32 %v7863_v41, %v6459_v28  ;;  %v6369_v41 = vld [vmem:[#allocation14 + $0xa8] sm:$0xf] }
 0x23e   : > { %v2533_v47 = vadd.f32 %v2532_v63, %v2520_v37  ;;  %v8866_v23 = vrot.slane %v8861_v54, 1  ;;  %v6382_v8 = vor.u32 %v7843_v56, %v6379_v57  ;;  %v6510_v31 = vor.u32 %v7875_v58, %v6507_v60  ;;  %v7903_v22 = vld [vmem:[#allocation14 + $0x2a4] sm:$0xf]  ;;  %v6315_v38 = vld [vmem:[#allocation14 + $0x50] sm:$0xf0] }
 0x23f   : > { %3697 = vmatpush.bf16.msra.mxu2 %v6618_v2  ;;  %v7911_v2 = vld [vmem:[#allocation14 + $0x2e4] sm:$0xf]  ;;  %v6443_v42 = vld [vmem:[#allocation14 + $0x150] sm:$0xf0]  ;;  %v7842_v28 = vld [vmem:[#allocation14 + $0xb4] sm:$0xf0] }
 0x240   : > { %v2546_v6 = vadd.f32 %v2545_v62, %v2533_v47  ;;  %v6654_v7 = vor.u32 %v7911_v2, %v6651_v39  ;;  %v7899_v32 = vld [vmem:[#allocation14 + $0x284] sm:$0xf]  ;;  %v6587_v44 = vld [vmem:[#allocation14 + $0x270] sm:$0xf0]  ;;  %v6446_v46 = vor.u32 %v7859_v40, %v6443_v42  ;;  %v6401_v39 = vld [vmem:[#allocation14 + $0xe8] sm:$0xf]  ;;  %v6370_v40 = vor.u32 %v7842_v28, %v6369_v41 }
 0x241   : > { %3673 = vmatpush.bf16.msra.mxu0 %v6330_v36  ;;  %3686 = vmatpush.bf16.msra.mxu1 %v6458_v10  ;;  %v6363_v36 = vld [vmem:[#allocation14 + $0xb0] sm:$0xf0]  ;;  %v6538_v10 = vor.u32 %v7885_v61, %v6537_v3  ;;  %v2534_v11 = vpop.f32.mrf.mxu2  ;;  %v7827_v37 = vld [vmem:[#allocation14 + $0x44] sm:$0xf]  ;;  %v7854_v41 = vld [vmem:[#allocation14 + $0x114] sm:$0xf0] }
 0x242   : > { %v8863_v1 = vpack.c.bf16 %v2546_v6, %v2546_v6  ;;  %v6366_v52 = vor.u32 %v7839_v29, %v6363_v36  ;;  %v7895_v63 = vld [vmem:[#allocation14 + $0x264] sm:$0xf]  ;;  %v6318_v45 = vor.u32 %v7827_v37, %v6315_v38  ;;  %v6299_v62 = vld [vmem:[#allocation14 + $0x30] sm:$0xf0]  ;;  %v7941_v37 = vld [vmem:[#allocation14 + $0x3cc] sm:$0xf0] }
 0x243   : > { %3698 = vmatpush.bf16.msra.mxu2 %v6602_v14  ;;  %v2547_v14 = vpop.f32.mrf.mxu3  ;;  %v7823_v47 = vld [vmem:[#allocation14 + $0x24] sm:$0xf]  ;;  %v6571_v56 = vld [vmem:[#allocation14 + $0x250] sm:$0xf0]  ;;  %v7848_v28 = vld [vmem:[#allocation14 + $0xec] sm:$0xf] }
 0x244   : > { %v8869_v9 = vrot.slane %v8863_v1, 1  ;;  %v6302_v58 = vor.u32 %v7823_v47, %v6299_v62  ;;  %v6283_v3 = vld [vmem:[#allocation14 + $0x10] sm:$0xf0]  ;;  %v7851_v61 = vld [vmem:[#allocation14 + $0x104] sm:$0xf] }
 0x245   : > { %3674 = vmatpush.bf16.msra.mxu0 %v6314_v17  ;;  %3687 = vmatpush.bf16.msra.mxu1 %v6442_v18  ;;  %v7835_v17 = vld [vmem:[#allocation14 + $0x84] sm:$0xf]  ;;  %v6411_v2 = vld [vmem:[#allocation14 + $0x110] sm:$0xf0]  ;;  %v6745_v47 = vld [vmem:[#allocation14 + $0x3a0] sm:$0xf] }
 0x246   : > { %v7867_v18 = vld [vmem:[#allocation14 + $0x184] sm:$0xf]  ;;  %v6350_v25 = vor.u32 %v7835_v17, %v6347_v4  ;;  %v6555_v12 = vld [vmem:[#allocation14 + $0x230] sm:$0xf0]  ;;  %v6414_v14 = vor.u32 %v7851_v61, %v6411_v2  ;;  %v6513_v17 = vld [vmem:[#allocation14 + $0x1c8] sm:$0xf] }
 0x247   : > { %3699 = vmatpush.bf16.msra.mxu2 %v6586_v50  ;;  %v6478_v50 = vor.u32 %v7867_v18, %v6475_v19  ;;  %v7887_v11 = vld [vmem:[#allocation14 + $0x224] sm:$0xf]  ;;  %v7878_v4 = vld [vmem:[#allocation14 + $0x1d4] sm:$0xf0]  ;;  %v7937_v62 = vld [vmem:[#allocation14 + $0x3ac] sm:$0xf0] }
 0x248   : > { %v6558_v18 = vor.u32 %v7887_v11, %v6555_v12  ;;  %v7883_v19 = vld [vmem:[#allocation14 + $0x204] sm:$0xf]  ;;  %v6514_v27 = vor.u32 %v7878_v4, %v6513_v17  ;;  %v7862_v11 = vld [vmem:[#allocation14 + $0x154] sm:$0xf0]  ;;  %v6713_v12 = vld [vmem:[#allocation14 + $0x360] sm:$0xf] }
 0x249   : > { %3675 = vmatpush.bf16.msra.mxu0 %v6298_v30  ;;  %3688 = vmatpush.bf16.msra.mxu1 %v6426_v0  ;;  %v6622_v30 = vor.u32 %v7903_v22, %v6619_v24  ;;  %v6603_v0 = vld [vmem:[#allocation14 + $0x290] sm:$0xf0]  ;;  %v6777_v22 = vld [vmem:[#allocation14 + $0x3e0] sm:$0xf]  ;;  %v7945_v24 = vld [vmem:[#allocation14 + $0x3ec] sm:$0xf0] }
 0x24a   : > { %v7858_v4 = vld [vmem:[#allocation14 + $0x134] sm:$0xf0] }
 0x24b   : > { %3700 = vmatpush.bf16.msra.mxu2 %v6570_v43  ;;  %v6606_v43 = vor.u32 %v7899_v32, %v6603_v0 }
 0x24d   : > { %3676 = vmatpush.bf16.msra.mxu0 %v6282_v51  ;;  %3689 = vmatpush.bf16.msra.mxu1 %v6410_v53  ;;  %v8873_v5 = vpop.f32.mrf.mxu0  ;;  %v7855_v51 = vld [vmem:[#allocation14 + $0x124] sm:$0xf]  ;;  %v6427_v53 = vld [vmem:[#allocation14 + $0x130] sm:$0xf0] }
 0x24e   : > { %v6430_v60 = vor.u32 %v7855_v51, %v6427_v53  ;;  %v6746_v51 = vor.u32 %v7937_v62, %v6745_v47  ;;  %v7844_v47 = vld [vmem:[#allocation14 + $0xcc] sm:$0xf]  ;;  %v6387_v62 = vld [vmem:[#allocation14 + $0xd8] sm:$0xf0] }
 0x24f   : > { %3701 = vmatpush.bf16.msra.mxu2 %v6554_v59  ;;  %v8875_v34 = vpop.f32.mrf.mxu1  ;;  %v7819_v59 = vld [vmem:[#allocation14 + $0x4] sm:$0xf] }
 0x250   : > { %3677 = vmatmul.bf16.vlgmr.msra.gmra.mxu0 %v8866_v23  ;;  %3690 = vmatmul.bf16.vlgmr.msra.gmra.mxu1 %v8869_v9 }
 0x251   : > { %3721 = vmatpush.bf16.msrb.mxu0 %v6398_v33  ;;  %3734 = vmatpush.bf16.msrb.mxu1 %v6526_v55  ;;  %v6590_v33 = vor.u32 %v7895_v63, %v6587_v44  ;;  %v7891_v55 = vld [vmem:[#allocation14 + $0x244] sm:$0xf]  ;;  %v7838_v63 = vld [vmem:[#allocation14 + $0x94] sm:$0xf0]  ;;  %v6481_v44 = vld [vmem:[#allocation14 + $0x188] sm:$0xf] }
 0x252   : > { %v6574_v29 = vor.u32 %v7891_v55, %v6571_v56  ;;  %v7834_v55 = vld [vmem:[#allocation14 + $0x74] sm:$0xf0]  ;;  %v6465_v56 = vld [vmem:[#allocation14 + $0x168] sm:$0xf] }
 0x253   : > { %3702 = vmatpush.bf16.msra.mxu2 %v6538_v10  ;;  %v7882_v10 = vld [vmem:[#allocation14 + $0x1f4] sm:$0xf0] }
 0x255   : > { %3722 = vmatpush.bf16.msrb.mxu0 %v6382_v8  ;;  %3735 = vmatpush.bf16.msrb.mxu1 %v6510_v31  ;;  %v2560_v6 = vpop.f32.mrf.mxu0  ;;  %v7850_v8 = vld [vmem:[#allocation14 + $0xf4] sm:$0xf0]  ;;  %v6529_v31 = vld [vmem:[#allocation14 + $0x1e8] sm:$0xf] }
 0x256   : > { %v6402_v15 = vor.u32 %v7850_v8, %v6401_v39  ;;  %v6337_v6 = vld [vmem:[#allocation14 + $0x68] sm:$0xf] }
 0x257   : > { %3747 = vmatpush.bf16.msrb.mxu2 %v6654_v7  ;;  %v2573_v57 = vpop.f32.mrf.mxu1  ;;  %v6286_v7 = vor.u32 %v7819_v59, %v6283_v3  ;;  %v6729_v59 = vld [vmem:[#allocation14 + $0x380] sm:$0xf]  ;;  %v6338_v39 = vor.u32 %v7834_v55, %v6337_v6  ;;  %v7917_v55 = vld [vmem:[#allocation14 + $0x30c] sm:$0xf0] }
 0x258   : > { %v6665_v6 = vld [vmem:[#allocation14 + $0x300] sm:$0xf] }
 0x259   : > { %3723 = vmatpush.bf16.msrb.mxu0 %v6366_v52  ;;  %3736 = vmatpush.bf16.msrb.mxu1 %v6494_v48  ;;  %v8877_v36 = vpop.f32.mrf.mxu2  ;;  %v7846_v52 = vld [vmem:[#allocation14 + $0xd4] sm:$0xf0]  ;;  %v6530_v48 = vor.u32 %v7882_v10, %v6529_v31  ;;  %v6321_v31 = vld [vmem:[#allocation14 + $0x48] sm:$0xf] }
 0x25a   : > { %v8879_v13 = vpop.f32.mrf.mxu3  ;;  %v6386_v26 = vor.u32 %v7846_v52, %v6385_v16  ;;  %v6449_v10 = vld [vmem:[#allocation14 + $0x148] sm:$0xf]  ;;  %v7826_v52 = vld [vmem:[#allocation14 + $0x34] sm:$0xf0] }
 0x25b   : > { %3748 = vmatpush.bf16.msrb.mxu2 %v6638_v21  ;;  %v6539_v21 = vld [vmem:[#allocation14 + $0x210] sm:$0xf0]  ;;  %v6450_v16 = vor.u32 %v7862_v11, %v6449_v10  ;;  %v6371_v10 = vld [vmem:[#allocation14 + $0xb8] sm:$0xf0]  ;;  %v7872_v11 = vld [vmem:[#allocation14 + $0x1ac] sm:$0xf] }
 0x25c   : > { %v6542_v32 = vor.u32 %v7883_v19, %v6539_v21  ;;  %v7925_v19 = vld [vmem:[#allocation14 + $0x34c] sm:$0xf0] }
 0x25d   : > { %3724 = vmatpush.bf16.msrb.mxu0 %v6350_v25  ;;  %3737 = vmatpush.bf16.msrb.mxu1 %v6478_v50  ;;  %v6778_v25 = vor.u32 %v7945_v24, %v6777_v22  ;;  %v1055_v50 = vperm.slane %v8837_v20, 2 }
 0x25f   : > { %3749 = vmatpush.bf16.msrb.mxu2 %v6622_v30  ;;  %v6497_v30 = vld [vmem:[#allocation14 + $0x1a8] sm:$0xf]  ;;  %3708 = vmatpush.bf16.msra.mxu3 %v6778_v25 }
 0x261   : > { %3725 = vmatpush.bf16.msrb.mxu0 %v6334_v49  ;;  %3738 = vmatpush.bf16.msrb.mxu1 %v6462_v35  ;;  %v2586_v0 = vpop.f32.mrf.mxu2  ;;  %v7874_v49 = vld [vmem:[#allocation14 + $0x1b4] sm:$0xf0]  ;;  %v6761_v35 = vld [vmem:[#allocation14 + $0x3c0] sm:$0xf] }
 0x262   : > { %v2599_v38 = vpop.f32.mrf.mxu3  ;;  %v6762_v20 = vor.u32 %v7941_v37, %v6761_v35  ;;  %v6498_v42 = vor.u32 %v7874_v49, %v6497_v30  ;;  %v6681_v0 = vld [vmem:[#allocation14 + $0x320] sm:$0xf]  ;;  %v7921_v49 = vld [vmem:[#allocation14 + $0x32c] sm:$0xf0]  ;;  %v7880_v37 = vld [vmem:[#allocation14 + $0x1ec] sm:$0xf] }
 0x263   : > { %3750 = vmatpush.bf16.msrb.mxu2 %v6606_v43  ;;  %v6353_v43 = vld [vmem:[#allocation14 + $0x88] sm:$0xf]  ;;  %v6531_v38 = vld [vmem:[#allocation14 + $0x1f8] sm:$0xf0] }
 0x264   : > { %3709 = vmatpush.bf16.msra.mxu3 %v6762_v20  ;;  %v6354_v53 = vor.u32 %v7838_v63, %v6353_v43  ;;  %v6682_v20 = vor.u32 %v7921_v49, %v6681_v0  ;;  %v6657_v63 = vld [vmem:[#allocation14 + $0x2e8] sm:$0xf]  ;;  %v7864_v0 = vld [vmem:[#allocation14 + $0x16c] sm:$0xf]  ;;  %v6467_v49 = vld [vmem:[#allocation14 + $0x178] sm:$0xf0] }
 0x265   : > { %3726 = vmatpush.bf16.msrb.mxu0 %v6318_v45  ;;  %3739 = vmatpush.bf16.msrb.mxu1 %v6446_v46  ;;  %v2559_v45 = vadd.f32 %v8873_v5, %v1055_v50  ;;  %v7870_v46 = vld [vmem:[#allocation14 + $0x194] sm:$0xf0]  ;;  %v6289_v50 = vld [vmem:[#allocation14 + $0x8] sm:$0xf] }
 0x267   : > { %3751 = vmatpush.bf16.msrb.mxu2 %v6590_v33  ;;  %v6482_v33 = vor.u32 %v7870_v46, %v6481_v44  ;;  %v2572_v57 = vadd.f32 %v8875_v34, %v2559_v45  ;;  %v7929_v34 = vld [vmem:[#allocation14 + $0x36c] sm:$0xf0]  ;;  %v7914_v46 = vld [vmem:[#allocation14 + $0x2f4] sm:$0xf0] }
 0x268   : > { %3710 = vmatpush.bf16.msra.mxu3 %v6746_v51 }
 0x269   : > { %3727 = vmatpush.bf16.msrb.mxu0 %v6302_v58  ;;  %3740 = vmatpush.bf16.msrb.mxu1 %v6430_v60  ;;  %v7866_v58 = vld [vmem:[#allocation14 + $0x174] sm:$0xf0]  ;;  %v7933_v60 = vld [vmem:[#allocation14 + $0x38c] sm:$0xf0]  ;;  %v2585_v61 = vadd.f32 %v8877_v36, %v2572_v57  ;;  %v6305_v36 = vld [vmem:[#allocation14 + $0x28] sm:$0xf]  ;;  %v6666_v57 = vor.u32 %v7917_v55, %v6665_v6 }
 0x26a   : > { %v6730_v5 = vor.u32 %v7933_v60, %v6729_v59  ;;  %v6466_v8 = vor.u32 %v7866_v58, %v6465_v56  ;;  %v6306_v25 = vor.u32 %v7826_v52, %v6305_v36  ;;  %v6515_v56 = vld [vmem:[#allocation14 + $0x1d8] sm:$0xf0]  ;;  %v7943_v58 = vld [vmem:[#allocation14 + $0x3e4] sm:$0xf]  ;;  %v6779_v59 = vld [vmem:[#allocation14 + $0x3f0] sm:$0xf0] }
 0x26b   : > { %3752 = vmatpush.bf16.msrb.mxu2 %v6574_v29  ;;  %v7830_v29 = vld [vmem:[#allocation14 + $0x54] sm:$0xf0] }
 0x26c   : > { %3711 = vmatpush.bf16.msra.mxu3 %v6730_v5  ;;  %v6658_v5 = vor.u32 %v7914_v46, %v6657_v63  ;;  %v6593_v63 = vld [vmem:[#allocation14 + $0x268] sm:$0xf]  ;;  %v7828_v46 = vld [vmem:[#allocation14 + $0x4c] sm:$0xf] }
 0x26d   : > { %3728 = vmatpush.bf16.msrb.mxu0 %v6286_v7  ;;  %3741 = vmatpush.bf16.msrb.mxu1 %v6414_v14  ;;  %v2610_v3 = vpop.f32.mrf.mxu0  ;;  %v6714_v7 = vor.u32 %v7929_v34, %v6713_v12  ;;  %v2598_v14 = vadd.f32 %v8879_v13, %v2585_v61  ;;  %v6390_v61 = vor.u32 %v7844_v47, %v6387_v62  ;;  %v6499_v34 = vld [vmem:[#allocation14 + $0x1b8] sm:$0xf0]  ;;  %v7860_v62 = vld [vmem:[#allocation14 + $0x14c] sm:$0xf] }
 0x26e   : > { %v6323_v47 = vld [vmem:[#allocation14 + $0x58] sm:$0xf0] }
 0x26f   : > { %3753 = vmatpush.bf16.msrb.mxu2 %v6558_v18  ;;  %v2623_v2 = vpop.f32.mrf.mxu1  ;;  %v2611_v17 = vadd.f32 %v2610_v3, %v2598_v14  ;;  %v6697_v18 = vld [vmem:[#allocation14 + $0x340] sm:$0xf]  ;;  %v6782_v3 = vor.u32 %v7943_v58, %v6779_v59  ;;  %v6763_v14 = vld [vmem:[#allocation14 + $0x3d0] sm:$0xf0]  ;;  %v7894_v58 = vld [vmem:[#allocation14 + $0x254] sm:$0xf0] }
 0x270   : > { %3729 = vmatmul.bf16.vlgmr.msrb.gmra.mxu0 %v8866_v23  ;;  %3742 = vmatmul.bf16.vlgmr.msrb.gmra.mxu1 %v8869_v9  ;;  %v6698_v22 = vor.u32 %v7925_v19, %v6697_v18  ;;  %v7836_v18 = vld [vmem:[#allocation14 + $0x8c] sm:$0xf]  ;;  %v6355_v19 = vld [vmem:[#allocation14 + $0x98] sm:$0xf0] }
 0x271   : > { %3773 = vmatpush.bf16.msra.mxu0 %v6402_v15  ;;  %3786 = vmatpush.bf16.msra.mxu1 %v6530_v48  ;;  %v6322_v15 = vor.u32 %v7830_v29, %v6321_v31  ;;  %v6433_v48 = vld [vmem:[#allocation14 + $0x128] sm:$0xf]  ;;  %v2624_v30 = vadd.f32 %v2623_v2, %v2611_v17  ;;  %v7906_v17 = vld [vmem:[#allocation14 + $0x2b4] sm:$0xf0] }
 0x272   : > { %3712 = vmatpush.bf16.msra.mxu3 %v6714_v7  ;;  %v6434_v13 = vor.u32 %v7858_v4, %v6433_v48  ;;  %v6641_v2 = vld [vmem:[#allocation14 + $0x2c8] sm:$0xf]  ;;  %v7939_v7 = vld [vmem:[#allocation14 + $0x3c4] sm:$0xf]  ;;  %v6502_v4 = vor.u32 %v7872_v11, %v6499_v34 }
 0x273   : > { %3754 = vmatpush.bf16.msrb.mxu2 %v6542_v32  ;;  %v6403_v32 = vld [vmem:[#allocation14 + $0xf8] sm:$0xf0]  ;;  %v6625_v48 = vld [vmem:[#allocation14 + $0x2a8] sm:$0xf] }
 0x274   : > { %v6406_v45 = vor.u32 %v7848_v28, %v6403_v32  ;;  %v6339_v32 = vld [vmem:[#allocation14 + $0x78] sm:$0xf0] }
 0x275   : > { %3774 = vmatpush.bf16.msra.mxu0 %v6386_v26  ;;  %3787 = vmatpush.bf16.msra.mxu1 %v6514_v27  ;;  %v2612_v21 = vpop.f32.mrf.mxu0  ;;  %v7822_v26 = vld [vmem:[#allocation14 + $0x14] sm:$0xf0]  ;;  %v6417_v27 = vld [vmem:[#allocation14 + $0x108] sm:$0xf] }
 0x276   : > { %3713 = vmatpush.bf16.msra.mxu3 %v6698_v22  ;;  %v6290_v43 = vor.u32 %v7822_v26, %v6289_v50  ;;  %v6418_v44 = vor.u32 %v7854_v41, %v6417_v27  ;;  %v7868_v21 = vld [vmem:[#allocation14 + $0x18c] sm:$0xf]  ;;  %v6483_v22 = vld [vmem:[#allocation14 + $0x198] sm:$0xf0]  ;;  %v6626_v26 = vor.u32 %v7906_v17, %v6625_v48  ;;  %v6609_v27 = vld [vmem:[#allocation14 + $0x288] sm:$0xf] }
 0x277   : > { %v2625_v24 = vpop.f32.mrf.mxu1  ;;  %v7902_v41 = vld [vmem:[#allocation14 + $0x294] sm:$0xf0]  ;;  %v6486_v28 = vor.u32 %v7868_v21, %v6483_v22  ;;  %v6419_v48 = vld [vmem:[#allocation14 + $0x118] sm:$0xf0]  ;;  %v6905_v17 = vld [vmem:[#allocation12 + $0xe0] sm:$0xf] }
 0x278   : > { %v7935_v24 = vld [vmem:[#allocation14 + $0x3a4] sm:$0xf]  ;;  %v7033_v22 = vld [vmem:[#allocation12 + $0x1e0] sm:$0xf] }
 0x279   : > { %3775 = vmatpush.bf16.msra.mxu0 %v6370_v40  ;;  %3788 = vmatpush.bf16.msra.mxu1 %v6498_v42  ;;  %v2636_v35 = vpop.f32.mrf.mxu2 }
 0x27a   : > { %v2637_v40 = vadd.f32 %v2636_v35, %v2624_v30  ;;  %v2649_v42 = vpop.f32.mrf.mxu3  ;;  %3714 = vmatpush.bf16.msra.mxu3 %v6682_v20  ;;  %v7832_v30 = vld [vmem:[#allocation14 + $0x6c] sm:$0xf]  ;;  %v7931_v35 = vld [vmem:[#allocation14 + $0x384] sm:$0xf] }
 0x27c   : > { %v2650_v51 = vadd.f32 %v2649_v42, %v2637_v40  ;;  %v6610_v42 = vor.u32 %v7902_v41, %v6609_v27  ;;  %v6545_v27 = vld [vmem:[#allocation14 + $0x208] sm:$0xf]  ;;  %v7886_v41 = vld [vmem:[#allocation14 + $0x214] sm:$0xf0] }
 0x27d   : > { %3776 = vmatpush.bf16.msra.mxu0 %v6354_v53  ;;  %3789 = vmatpush.bf16.msra.mxu1 %v6482_v33  ;;  %v6534_v53 = vor.u32 %v7880_v37, %v6531_v38  ;;  %v7876_v33 = vld [vmem:[#allocation14 + $0x1cc] sm:$0xf]  ;;  %v6731_v37 = vld [vmem:[#allocation14 + $0x390] sm:$0xf0] }
 0x27e   : > { %v8888_v60 = vpack.c.bf16 %v2650_v51, %v2650_v51  ;;  %v6518_v29 = vor.u32 %v7876_v33, %v6515_v56  ;;  %3715 = vmatpush.bf16.msra.mxu3 %v6666_v57  ;;  %v6734_v20 = vor.u32 %v7931_v35, %v6731_v37  ;;  %v6451_v51 = vld [vmem:[#allocation14 + $0x158] sm:$0xf0]  ;;  %v6715_v33 = vld [vmem:[#allocation14 + $0x370] sm:$0xf0]  ;;  %v6326_v56 = vor.u32 %v7828_v46, %v6323_v47  ;;  %v6577_v57 = vld [vmem:[#allocation14 + $0x248] sm:$0xf] }
 0x27f   : > { %v6454_v59 = vor.u32 %v7860_v62, %v6451_v51  ;;  %v6578_v34 = vor.u32 %v7894_v58, %v6577_v57  ;;  %v7717_v37 = vld [vmem:[#allocation12 + $0xcc] sm:$0xf0]  ;;  %v7908_v62 = vld [vmem:[#allocation14 + $0x2cc] sm:$0xf]  ;;  %v7001_v58 = vld [vmem:[#allocation12 + $0x1a0] sm:$0xf] }
 0x280   : > { %v8891_v31 = vrot.slane %v8888_v60, 1 }
 0x281   : > { %3777 = vmatpush.bf16.msra.mxu0 %v6338_v39  ;;  %3790 = vmatpush.bf16.msra.mxu1 %v6466_v8  ;;  %v7910_v39 = vld [vmem:[#allocation14 + $0x2d4] sm:$0xf0]  ;;  %v7840_v8 = vld [vmem:[#allocation14 + $0xac] sm:$0xf]  ;;  %v2638_v12 = vpop.f32.mrf.mxu2 }
 0x282   : > { %3760 = vmatpush.bf16.msrb.mxu3 %v6782_v3  ;;  %3703 = vmatmul.bf16.vlgmr.msra.gmra.mxu2 %v8891_v31  ;;  %v6642_v36 = vor.u32 %v7910_v39, %v6641_v2  ;;  %v6374_v52 = vor.u32 %v7840_v8, %v6371_v10  ;;  %v7824_v3 = vld [vmem:[#allocation14 + $0x2c] sm:$0xf]  ;;  %v6435_v2 = vld [vmem:[#allocation14 + $0x138] sm:$0xf0]  ;;  %v7923_v39 = vld [vmem:[#allocation14 + $0x344] sm:$0xf] }
 0x283   : > { %3799 = vmatpush.bf16.msra.mxu2 %v6658_v5  ;;  %v6307_v5 = vld [vmem:[#allocation14 + $0x38] sm:$0xf0]  ;;  %v6699_v8 = vld [vmem:[#allocation14 + $0x350] sm:$0xf0]  ;;  %v6561_v10 = vld [vmem:[#allocation14 + $0x228] sm:$0xf] }
 0x284   : > { %v6702_v11 = vor.u32 %v7923_v39, %v6699_v8  ;;  %v6627_v8 = vld [vmem:[#allocation14 + $0x2b8] sm:$0xf0] }
 0x285   : > { %3778 = vmatpush.bf16.msra.mxu0 %v6322_v15  ;;  %3791 = vmatpush.bf16.msra.mxu1 %v6450_v16  ;;  %v2651_v15 = vpop.f32.mrf.mxu3  ;;  %v6766_v16 = vor.u32 %v7939_v7, %v6763_v14  ;;  %v6310_v7 = vor.u32 %v7824_v3, %v6307_v5  ;;  %v7890_v14 = vld [vmem:[#allocation14 + $0x234] sm:$0xf0] }
 0x286   : > { %v7820_v15 = vld [vmem:[#allocation14 + $0xc] sm:$0xf] }
 0x287   : > { %3761 = vmatpush.bf16.msrb.mxu3 %v6766_v16  ;;  %3800 = vmatpush.bf16.msra.mxu2 %v6642_v36  ;;  %v6291_v16 = vld [vmem:[#allocation14 + $0x18] sm:$0xf0] }
 0x289   : > { %3779 = vmatpush.bf16.msra.mxu0 %v6306_v25  ;;  %3792 = vmatpush.bf16.msra.mxu1 %v6434_v13  ;;  %v6747_v25 = vld [vmem:[#allocation14 + $0x3b0] sm:$0xf0]  ;;  %v6358_v13 = vor.u32 %v7836_v18, %v6355_v19  ;;  %v7919_v18 = vld [vmem:[#allocation14 + $0x324] sm:$0xf] }
 0x28a   : > { %v6750_v50 = vor.u32 %v7935_v24, %v6747_v25  ;;  %v6683_v19 = vld [vmem:[#allocation14 + $0x330] sm:$0xf0]  ;;  %v7753_v24 = vld [vmem:[#allocation12 + $0x1ec] sm:$0xf0] }
 0x28b   : > { %3801 = vmatpush.bf16.msra.mxu2 %v6626_v26  ;;  %v6686_v25 = vor.u32 %v7919_v18, %v6683_v19  ;;  %v6562_v26 = vor.u32 %v7890_v14, %v6561_v10  ;;  %v7034_v35 = vor.u32 %v7753_v24, %v7033_v22  ;;  %v7709_v10 = vld [vmem:[#allocation12 + $0x8c] sm:$0xf0]  ;;  %v7896_v24 = vld [vmem:[#allocation14 + $0x26c] sm:$0xf] }
 0x28c   : > { %3762 = vmatpush.bf16.msrb.mxu3 %v6750_v50 }
 0x28d   : > { %3780 = vmatpush.bf16.msra.mxu0 %v6290_v43  ;;  %3793 = vmatpush.bf16.msra.mxu1 %v6418_v44  ;;  %v8896_v38 = vpop.f32.mrf.mxu0  ;;  %v6342_v43 = vor.u32 %v7832_v30, %v6339_v32  ;;  %v7898_v44 = vld [vmem:[#allocation14 + $0x274] sm:$0xf0]  ;;  %v7912_v32 = vld [vmem:[#allocation14 + $0x2ec] sm:$0xf] }
 0x28e   : > { %v6594_v55 = vor.u32 %v7898_v44, %v6593_v63  ;;  %v7749_v63 = vld [vmem:[#allocation12 + $0x1cc] sm:$0xf0] }
 0x28f   : > { %v8898_v40 = vpop.f32.mrf.mxu1  ;;  %3802 = vmatpush.bf16.msra.mxu2 %v6610_v42  ;;  %v6667_v42 = vld [vmem:[#allocation14 + $0x310] sm:$0xf0] }
 0x290   : > { %3781 = vmatmul.bf16.vlgmr.msra.gmra.mxu0 %v8866_v23  ;;  %3794 = vmatmul.bf16.vlgmr.msra.gmra.mxu1 %v8869_v9 }
 0x291   : > { %3825 = vmatpush.bf16.msrb.mxu0 %v6406_v45  ;;  %3838 = vmatpush.bf16.msrb.mxu1 %v6534_v53  ;;  %v6470_v45 = vor.u32 %v7864_v0, %v6467_v49  ;;  %v7927_v53 = vld [vmem:[#allocation14 + $0x364] sm:$0xf]  ;;  %v6659_v0 = vld [vmem:[#allocation14 + $0x2f8] sm:$0xf0]  ;;  %v6889_v49 = vld [vmem:[#allocation12 + $0xc0] sm:$0xf] }
 0x292   : > { %3763 = vmatpush.bf16.msrb.mxu3 %v6734_v20  ;;  %v6718_v6 = vor.u32 %v7927_v53, %v6715_v33  ;;  %3755 = vmatmul.bf16.vlgmr.msrb.gmra.mxu2 %v8891_v31  ;;  %v7915_v20 = vld [vmem:[#allocation14 + $0x304] sm:$0xf]  ;;  %v6662_v46 = vor.u32 %v7912_v32, %v6659_v0  ;;  %v6890_v47 = vor.u32 %v7717_v37, %v6889_v49  ;;  %v6643_v53 = vld [vmem:[#allocation14 + $0x2d8] sm:$0xf0]  ;;  %v6873_v33 = vld [vmem:[#allocation12 + $0xa0] sm:$0xf] }
 0x293   : > { %3803 = vmatpush.bf16.msra.mxu2 %v6594_v55  ;;  %v6670_v44 = vor.u32 %v7915_v20, %v6667_v42  ;;  %v8125_v55 = vld [vmem:[%s9013_s5] sm:$0xf]  ;;  %v6646_v5 = vor.u32 %v7908_v62, %v6643_v53  ;;  %v6579_v49 = vld [vmem:[#allocation14 + $0x258] sm:$0xf0]  ;;  %v7697_v37 = vld [vmem:[#allocation12 + $0x2c] sm:$0xf0] }
 0x294   : > { %v6937_v42 = vld [vmem:[#allocation12 + $0x120] sm:$0xf]  ;;  %v7693_v53 = vld [vmem:[#allocation12 + $0xc] sm:$0xf0] }
 0x295   : > { %3826 = vmatpush.bf16.msrb.mxu0 %v6390_v61  ;;  %3839 = vmatpush.bf16.msrb.mxu1 %v6518_v29  ;;  %v7856_v61 = vld [vmem:[#allocation14 + $0x12c] sm:$0xf]  ;;  %v2664_v29 = vpop.f32.mrf.mxu0 }
 0x296   : > { %3764 = vmatpush.bf16.msrb.mxu3 %v6718_v6  ;;  %v6438_v36 = vor.u32 %v7856_v61, %v6435_v2  ;;  %v7713_v6 = vld [vmem:[#allocation12 + $0xac] sm:$0xf0]  ;;  %v7904_v2 = vld [vmem:[#allocation14 + $0x2ac] sm:$0xf]  ;;  %v6857_v29 = vld [vmem:[#allocation12 + $0x80] sm:$0xf] }
 0x297   : > { %v2677_v12 = vpop.f32.mrf.mxu1  ;;  %3804 = vmatpush.bf16.msra.mxu2 %v6578_v34  ;;  %v6874_v61 = vor.u32 %v7713_v6, %v6873_v33  ;;  %v6630_v34 = vor.u32 %v7904_v2, %v6627_v8  ;;  %v6921_v33 = vld [vmem:[#allocation12 + $0x100] sm:$0xf] }
 0x298   : > { %v7741_v12 = vld [vmem:[#allocation12 + $0x18c] sm:$0xf0] }
 0x299   : > { %3827 = vmatpush.bf16.msrb.mxu0 %v6374_v52  ;;  %3840 = vmatpush.bf16.msrb.mxu1 %v6502_v4  ;;  %v7852_v52 = vld [vmem:[#allocation14 + $0x10c] sm:$0xf]  ;;  %v7721_v4 = vld [vmem:[#allocation12 + $0xec] sm:$0xf0]  ;;  %v8901_v21 = vpop.f32.mrf.mxu2 }
 0x29a   : > { %3765 = vmatpush.bf16.msrb.mxu3 %v6702_v11  ;;  %v8903_v50 = vpop.f32.mrf.mxu3  ;;  %v6906_v30 = vor.u32 %v7721_v4, %v6905_v17  ;;  %v7737_v17 = vld [vmem:[#allocation12 + $0x16c] sm:$0xf0] }
 0x29b   : > { %3805 = vmatpush.bf16.msra.mxu2 %v6562_v26  ;;  %v6595_v26 = vld [vmem:[#allocation14 + $0x278] sm:$0xf0] }
 0x29d   : > { %3828 = vmatpush.bf16.msrb.mxu0 %v6358_v13  ;;  %3841 = vmatpush.bf16.msrb.mxu1 %v6486_v28  ;;  %v6294_v13 = vor.u32 %v7820_v15, %v6291_v16  ;;  %v6422_v28 = vor.u32 %v7852_v52, %v6419_v48  ;;  %v6611_v15 = vld [vmem:[#allocation14 + $0x298] sm:$0xf0]  ;;  %v6841_v16 = vld [vmem:[#allocation12 + $0x60] sm:$0xf] }
 0x29e   : > { %3766 = vmatpush.bf16.msrb.mxu3 %v6686_v25  ;;  %v6969_v48 = vld [vmem:[#allocation12 + $0x160] sm:$0xf] }
 0x29f   : > { %v6970_v25 = vor.u32 %v7737_v17, %v6969_v48  ;;  %v7747_v48 = vld [vmem:[#allocation12 + $0x1c4] sm:$0xf]  ;;  %v7019_v17 = vld [vmem:[#allocation12 + $0x1d0] sm:$0xf0] }
 0x2a1   : > { %3829 = vmatpush.bf16.msrb.mxu0 %v6342_v43  ;;  %3842 = vmatpush.bf16.msrb.mxu1 %v6470_v45  ;;  %v7017_v43 = vld [vmem:[#allocation12 + $0x1c0] sm:$0xf]  ;;  %v6546_v45 = vor.u32 %v7886_v41, %v6545_v27  ;;  %v2690_v57 = vpop.f32.mrf.mxu2  ;;  %v7701_v27 = vld [vmem:[#allocation12 + $0x4c] sm:$0xf0] }
 0x2a2   : > { %v7018_v51 = vor.u32 %v7749_v63, %v7017_v43  ;;  %3767 = vmatpush.bf16.msrb.mxu3 %v6670_v44  ;;  %v2703_v3 = vpop.f32.mrf.mxu3  ;;  %v6953_v41 = vld [vmem:[#allocation12 + $0x140] sm:$0xf]  ;;  %v7729_v43 = vld [vmem:[#allocation12 + $0x12c] sm:$0xf0]  ;;  %v6907_v57 = vld [vmem:[#allocation12 + $0xf0] sm:$0xf0] }
 0x2a3   : > { %3806 = vmatpush.bf16.msra.mxu2 %v6546_v45  ;;  %v6938_v62 = vor.u32 %v7729_v43, %v6937_v42  ;;  %v7035_v3 = vld [vmem:[#allocation12 + $0x1f0] sm:$0xf0]  ;;  %v7938_v43 = vld [vmem:[#allocation14 + $0x3b4] sm:$0xf0] }
 0x2a5   : > { %3830 = vmatpush.bf16.msrb.mxu0 %v6326_v56  ;;  %3843 = vmatpush.bf16.msrb.mxu1 %v6454_v59  ;;  %v1056_v56 = vperm.slane %v8125_v55, 3  ;;  %v7745_v59 = vld [vmem:[#allocation12 + $0x1ac] sm:$0xf0] }
 0x2a6   : > { %v7002_v39 = vor.u32 %v7745_v59, %v7001_v58  ;;  %3807 = vmatmul.bf16.vlgmr.msra.gmra.mxu2 %v8891_v31  ;;  %v7725_v55 = vld [vmem:[#allocation12 + $0x10c] sm:$0xf0]  ;;  %v7751_v59 = vld [vmem:[#allocation12 + $0x1e4] sm:$0xf] }
 0x2a7   : > { %3851 = vmatpush.bf16.msrb.mxu2 %v6662_v46  ;;  %v2663_v11 = vadd.f32 %v8896_v38, %v1056_v56  ;;  %v7719_v56 = vld [vmem:[#allocation12 + $0xe4] sm:$0xf]  ;;  %v6922_v8 = vor.u32 %v7725_v55, %v6921_v33  ;;  %v7773_v33 = vld [vmem:[#allocation12 + $0x28c] sm:$0xf0]  ;;  %v7934_v55 = vld [vmem:[#allocation14 + $0x394] sm:$0xf0] }
 0x2a9   : > { %3831 = vmatpush.bf16.msrb.mxu0 %v6310_v7  ;;  %3844 = vmatpush.bf16.msrb.mxu1 %v6438_v36  ;;  %v7900_v7 = vld [vmem:[#allocation14 + $0x28c] sm:$0xf]  ;;  %v7705_v36 = vld [vmem:[#allocation12 + $0x6c] sm:$0xf0]  ;;  %v2676_v52 = vadd.f32 %v8898_v40, %v2663_v11  ;;  %v6547_v11 = vld [vmem:[#allocation14 + $0x218] sm:$0xf0] }
 0x2aa   : > { %v6614_v19 = vor.u32 %v7900_v7, %v6611_v15  ;;  %v6842_v22 = vor.u32 %v7705_v36, %v6841_v16  ;;  %v7785_v7 = vld [vmem:[#allocation12 + $0x2ec] sm:$0xf0]  ;;  %v7715_v15 = vld [vmem:[#allocation12 + $0xc4] sm:$0xf]  ;;  %v6891_v16 = vld [vmem:[#allocation12 + $0xd0] sm:$0xf0] }
 0x2ab   : > { %3852 = vmatpush.bf16.msrb.mxu2 %v6646_v5  ;;  %v2689_v38 = vadd.f32 %v8901_v21, %v2676_v52  ;;  %v7892_v21 = vld [vmem:[#allocation14 + $0x24c] sm:$0xf] }
 0x2ac   : > { %v6582_v45 = vor.u32 %v7892_v21, %v6579_v49 }
 0x2ad   : > { %3832 = vmatpush.bf16.msrb.mxu0 %v6294_v13  ;;  %3845 = vmatpush.bf16.msrb.mxu1 %v6422_v28  ;;  %v2714_v4 = vpop.f32.mrf.mxu0  ;;  %v6825_v13 = vld [vmem:[#allocation12 + $0x40] sm:$0xf]  ;;  %v7733_v28 = vld [vmem:[#allocation12 + $0x14c] sm:$0xf0]  ;;  %v2702_v40 = vadd.f32 %v8903_v50, %v2689_v38  ;;  %v7888_v50 = vld [vmem:[#allocation14 + $0x22c] sm:$0xf] }
 0x2ae   : > { %v6826_v32 = vor.u32 %v7701_v27, %v6825_v13  ;;  %v6954_v0 = vor.u32 %v7733_v28, %v6953_v41  ;;  %v6769_v38 = vld [vmem:[#allocation14 + $0x3c8] sm:$0xf]  ;;  %v7022_v13 = vor.u32 %v7747_v48, %v7019_v17  ;;  %v7942_v27 = vld [vmem:[#allocation14 + $0x3d4] sm:$0xf0]  ;;  %v7711_v41 = vld [vmem:[#allocation12 + $0xa4] sm:$0xf] }
 0x2af   : > { %v2727_v18 = vpop.f32.mrf.mxu1  ;;  %3853 = vmatpush.bf16.msrb.mxu2 %v6630_v34  ;;  %v2715_v20 = vadd.f32 %v2714_v4, %v2702_v40  ;;  %v6785_v34 = vld [vmem:[#allocation14 + $0x3e8] sm:$0xf]  ;;  %v6875_v28 = vld [vmem:[#allocation12 + $0xb0] sm:$0xf0]  ;;  %v7081_v48 = vld [vmem:[#allocation12 + $0x240] sm:$0xf] }
 0x2b0   : > { %3833 = vmatmul.bf16.vlgmr.msrb.gmra.mxu0 %v8866_v23  ;;  %3846 = vmatmul.bf16.vlgmr.msrb.gmra.mxu1 %v8869_v9  ;;  %v6985_v23 = vld [vmem:[#allocation12 + $0x180] sm:$0xf]  ;;  %v6858_v9 = vor.u32 %v7709_v10, %v6857_v29  ;;  %v6910_v29 = vor.u32 %v7719_v56, %v6907_v57  ;;  %v7884_v10 = vld [vmem:[#allocation14 + $0x20c] sm:$0xf]  ;;  %v6878_v49 = vor.u32 %v7711_v41, %v6875_v28  ;;  %v7703_v56 = vld [vmem:[#allocation12 + $0x64] sm:$0xf] }
 0x2b1   : > { %4517 = vmatpush.bf16.msra.mxu0 %v6906_v30  ;;  %4530 = vmatpush.bf16.msra.mxu1 %v7034_v35  ;;  %v6986_v14 = vor.u32 %v7741_v12, %v6985_v23  ;;  %v6598_v30 = vor.u32 %v7896_v24, %v6595_v26  ;;  %v6809_v35 = vld [vmem:[#allocation12 + $0x20] sm:$0xf]  ;;  %v2728_v6 = vadd.f32 %v2727_v18, %v2715_v20  ;;  %v7777_v20 = vld [vmem:[#allocation12 + $0x2ac] sm:$0xf0]  ;;  %v6689_v41 = vld [vmem:[#allocation14 + $0x328] sm:$0xf] }
 0x2b2   : > { %v6810_v46 = vor.u32 %v7697_v37, %v6809_v35  ;;  %v7038_v12 = vor.u32 %v7751_v59, %v7035_v3  ;;  %v6550_v52 = vor.u32 %v7884_v10, %v6547_v11  ;;  %v7145_v24 = vld [vmem:[#allocation12 + $0x2c0] sm:$0xf]  ;;  %v6753_v35 = vld [vmem:[#allocation14 + $0x3a8] sm:$0xf]  ;;  %v6971_v59 = vld [vmem:[#allocation12 + $0x170] sm:$0xf0] }
 0x2b3   : > { %3854 = vmatpush.bf16.msrb.mxu2 %v6614_v19  ;;  %v7129_v37 = vld [vmem:[#allocation12 + $0x2a0] sm:$0xf]  ;;  %v7769_v10 = vld [vmem:[#allocation12 + $0x26c] sm:$0xf0] }
 0x2b4   : > { %v7765_v17 = vld [vmem:[#allocation12 + $0x24c] sm:$0xf0] }
 0x2b5   : > { %4518 = vmatpush.bf16.msra.mxu0 %v6890_v47  ;;  %4531 = vmatpush.bf16.msra.mxu1 %v7018_v51  ;;  %v2716_v63 = vpop.f32.mrf.mxu0  ;;  %v6563_v47 = vld [vmem:[#allocation14 + $0x238] sm:$0xf0]  ;;  %v6793_v51 = vld [vmem:[#allocation12] sm:$0xf] }
 0x2b6   : > { %v6566_v2 = vor.u32 %v7888_v50, %v6563_v47  ;;  %v7707_v63 = vld [vmem:[#allocation12 + $0x84] sm:$0xf]  ;;  %v7130_v50 = vor.u32 %v7777_v20, %v7129_v37  ;;  %v6754_v47 = vor.u32 %v7938_v43, %v6753_v35  ;;  %v6795_v35 = vld [vmem:[#allocation12 + $0x10] sm:$0xf0]  ;;  %v7722_v43 = vld [vmem:[#allocation12 + $0xf4] sm:$0xf0] }
 0x2b7   : > { %v2729_v44 = vpop.f32.mrf.mxu1  ;;  %3855 = vmatpush.bf16.msrb.mxu2 %v6598_v30  ;;  %v7743_v30 = vld [vmem:[#allocation12 + $0x1a4] sm:$0xf]  ;;  %v6923_v20 = vld [vmem:[#allocation12 + $0x110] sm:$0xf0] }
 0x2b8   : > { %v6859_v44 = vld [vmem:[#allocation12 + $0x90] sm:$0xf0]  ;;  %v7723_v37 = vld [vmem:[#allocation12 + $0x104] sm:$0xf] }
 0x2b9   : > { %4519 = vmatpush.bf16.msra.mxu0 %v6874_v61  ;;  %4532 = vmatpush.bf16.msra.mxu1 %v7002_v39  ;;  %v2740_v58 = vpop.f32.mrf.mxu2  ;;  %v6794_v39 = vor.u32 %v7693_v53, %v6793_v51  ;;  %v6737_v51 = vld [vmem:[#allocation14 + $0x388] sm:$0xf]  ;;  %v7113_v53 = vld [vmem:[#allocation12 + $0x280] sm:$0xf] }
 0x2ba   : > { %v2741_v5 = vadd.f32 %v2740_v58, %v2728_v6  ;;  %v2753_v61 = vpop.f32.mrf.mxu3  ;;  %v7735_v58 = vld [vmem:[#allocation12 + $0x164] sm:$0xf] }
 0x2bb   : > { %3856 = vmatpush.bf16.msrb.mxu2 %v6582_v45  ;;  %v7739_v45 = vld [vmem:[#allocation12 + $0x184] sm:$0xf]  ;;  %v6974_v11 = vor.u32 %v7735_v58, %v6971_v59  ;;  %v7163_v58 = vld [vmem:[#allocation12 + $0x2f0] sm:$0xf0]  ;;  %v6897_v59 = vld [vmem:[#allocation12 + $0xc8] sm:$0xf] }
 0x2bc   : > { %v2754_v23 = vadd.f32 %v2753_v61, %v2741_v5  ;;  %v7114_v5 = vor.u32 %v7773_v33, %v7113_v53  ;;  %v6926_v53 = vor.u32 %v7723_v37, %v6923_v20  ;;  %v6849_v37 = vld [vmem:[#allocation12 + $0x68] sm:$0xf] }
 0x2bd   : > { %4520 = vmatpush.bf16.msra.mxu0 %v6858_v9  ;;  %4533 = vmatpush.bf16.msra.mxu1 %v6986_v14  ;;  %v7161_v9 = vld [vmem:[#allocation12 + $0x2e0] sm:$0xf]  ;;  %v7946_v14 = vld [vmem:[#allocation14 + $0x3f4] sm:$0xf0] }
 0x2be   : > { %v8915_v36 = vpack.c.bf16 %v2754_v23, %v2754_v23  ;;  %v7162_v4 = vor.u32 %v7785_v7, %v7161_v9  ;;  %v6786_v19 = vor.u32 %v7946_v14, %v6785_v34  ;;  %v7930_v23 = vld [vmem:[#allocation14 + $0x374] sm:$0xf0]  ;;  %v6827_v34 = vld [vmem:[#allocation12 + $0x50] sm:$0xf0]  ;;  %v7731_v9 = vld [vmem:[#allocation12 + $0x144] sm:$0xf] }
 0x2bf   : > { %3857 = vmatpush.bf16.msrb.mxu2 %v6566_v2  ;;  %v6738_v2 = vor.u32 %v7934_v55, %v6737_v51  ;;  %v6955_v7 = vld [vmem:[#allocation12 + $0x150] sm:$0xf0]  ;;  %v7757_v51 = vld [vmem:[#allocation12 + $0x20c] sm:$0xf0]  ;;  %v7944_v55 = vld [vmem:[#allocation14 + $0x3ec] sm:$0xf] }
 0x2c0   : > { %v8918_v18 = vrot.slane %v8915_v36, 1 }
 0x2c1   : > { %4521 = vmatpush.bf16.msra.mxu0 %v6842_v22  ;;  %4534 = vmatpush.bf16.msra.mxu1 %v6970_v25  ;;  %v6894_v22 = vor.u32 %v7715_v15, %v6891_v16  ;;  %v7781_v25 = vld [vmem:[#allocation12 + $0x2cc] sm:$0xf0]  ;;  %v2742_v26 = vpop.f32.mrf.mxu2 }
 0x2c2   : > { %v2755_v40 = vpop.f32.mrf.mxu3  ;;  %3716 = vmatmul.bf16.vlgmr.msra.gmra.mxu3 %v8918_v18  ;;  %v7146_v21 = vor.u32 %v7781_v25, %v7145_v24  ;;  %v7727_v25 = vld [vmem:[#allocation12 + $0x124] sm:$0xf]  ;;  %v6939_v26 = vld [vmem:[#allocation12 + $0x130] sm:$0xf0] }
 0x2c3   : > { %3858 = vmatpush.bf16.msrb.mxu2 %v6550_v52  ;;  %3812 = vmatpush.bf16.msra.mxu3 %v6786_v19  ;;  %v6705_v52 = vld [vmem:[#allocation14 + $0x348] sm:$0xf]  ;;  %v7695_v19 = vld [vmem:[#allocation12 + $0x24] sm:$0xf] }
 0x2c5   : > { %4522 = vmatpush.bf16.msra.mxu0 %v6826_v32  ;;  %4535 = vmatpush.bf16.msra.mxu1 %v6954_v0  ;;  %v7003_v32 = vld [vmem:[#allocation12 + $0x1b0] sm:$0xf0]  ;;  %v6770_v0 = vor.u32 %v7942_v27, %v6769_v38  ;;  %v7926_v38 = vld [vmem:[#allocation14 + $0x354] sm:$0xf0]  ;;  %v7082_v27 = vor.u32 %v7765_v17, %v7081_v48 }
 0x2c6   : > { %3859 = vmatmul.bf16.vlgmr.msrb.gmra.mxu2 %v8891_v31  ;;  %v7006_v42 = vor.u32 %v7743_v30, %v7003_v32  ;;  %v6843_v31 = vld [vmem:[#allocation12 + $0x70] sm:$0xf0]  ;;  %v6706_v28 = vor.u32 %v7926_v38, %v6705_v52  ;;  %v7922_v30 = vld [vmem:[#allocation14 + $0x334] sm:$0xf0]  ;;  %v7065_v32 = vld [vmem:[#allocation12 + $0x220] sm:$0xf] }
 0x2c7   : > { %4543 = vmatpush.bf16.msra.mxu2 %v7162_v4  ;;  %3813 = vmatpush.bf16.msra.mxu3 %v6770_v0  ;;  %v6958_v4 = vor.u32 %v7731_v9, %v6955_v7  ;;  %v6942_v0 = vor.u32 %v7727_v25, %v6939_v26  ;;  %v7779_v9 = vld [vmem:[#allocation12 + $0x2c4] sm:$0xf]  ;;  %v7147_v7 = vld [vmem:[#allocation12 + $0x2d0] sm:$0xf0]  ;;  %v7746_v52 = vld [vmem:[#allocation12 + $0x1b4] sm:$0xf0] }
 0x2c8   : > { %v7150_v17 = vor.u32 %v7779_v9, %v7147_v7  ;;  %v6755_v38 = vld [vmem:[#allocation14 + $0x3b8] sm:$0xf0]  ;;  %v7131_v25 = vld [vmem:[#allocation12 + $0x2b0] sm:$0xf0]  ;;  %v6865_v26 = vld [vmem:[#allocation12 + $0x88] sm:$0xf] }
 0x2c9   : > { %4523 = vmatpush.bf16.msra.mxu0 %v6810_v46  ;;  %4536 = vmatpush.bf16.msra.mxu1 %v6938_v62  ;;  %v6987_v46 = vld [vmem:[#allocation12 + $0x190] sm:$0xf0]  ;;  %v6862_v62 = vor.u32 %v7707_v63, %v6859_v44  ;;  %v7041_v44 = vld [vmem:[#allocation12 + $0x1e8] sm:$0xf] }
 0x2ca   : > { %v6990_v6 = vor.u32 %v7739_v45, %v6987_v46  ;;  %v7754_v45 = vld [vmem:[#allocation12 + $0x1f4] sm:$0xf0]  ;;  %v6690_v46 = vor.u32 %v7922_v30, %v6689_v41  ;;  %v7932_v30 = vld [vmem:[#allocation14 + $0x38c] sm:$0xf] }
 0x2cb   : > { %4544 = vmatpush.bf16.msra.mxu2 %v7146_v21  ;;  %3814 = vmatpush.bf16.msra.mxu3 %v6754_v47  ;;  %v7761_v21 = vld [vmem:[#allocation12 + $0x22c] sm:$0xf0]  ;;  %v6673_v47 = vld [vmem:[#allocation14 + $0x308] sm:$0xf]  ;;  %v7742_v41 = vld [vmem:[#allocation12 + $0x194] sm:$0xf0] }
 0x2cc   : > { %v7066_v63 = vor.u32 %v7761_v21, %v7065_v32  ;;  %v6739_v32 = vld [vmem:[#allocation14 + $0x398] sm:$0xf0] }
 0x2cd   : > { %4524 = vmatpush.bf16.msra.mxu0 %v6794_v39  ;;  %4537 = vmatpush.bf16.msra.mxu1 %v6922_v8  ;;  %v3678_v57 = vpop.f32.mrf.mxu0  ;;  %v3691_v3 = vpop.f32.mrf.mxu1  ;;  %v6846_v39 = vor.u32 %v7703_v56, %v6843_v31  ;;  %v6721_v8 = vld [vmem:[#allocation14 + $0x368] sm:$0xf]  ;;  %v6787_v56 = vld [vmem:[#allocation14 + $0x3f8] sm:$0xf0]  ;;  %v7042_v31 = vor.u32 %v7754_v45, %v7041_v44 }
 0x2ce   : > { %v8924_v61 = vadd.f32 %v3691_v3, %v3678_v57  ;;  %v6722_v15 = vor.u32 %v7930_v23, %v6721_v8  ;;  %v7783_v57 = vld [vmem:[#allocation12 + $0x2e4] sm:$0xf]  ;;  %v6771_v23 = vld [vmem:[#allocation14 + $0x3d8] sm:$0xf0] }
 0x2cf   : > { %4545 = vmatpush.bf16.msra.mxu2 %v7130_v50  ;;  %3815 = vmatpush.bf16.msra.mxu3 %v6738_v2  ;;  %v7025_v2 = vld [vmem:[#allocation12 + $0x1c8] sm:$0xf] }
 0x2d0   : > { %4525 = vmatmul.bf16.vlgmr.msra.gmra.mxu0 %v8861_v54  ;;  %4538 = vmatmul.bf16.vlgmr.msra.gmra.mxu1 %v8863_v1 }
 0x2d1   : > { %4569 = vmatpush.bf16.msrb.mxu0 %v6910_v29  ;;  %4582 = vmatpush.bf16.msrb.mxu1 %v7038_v12  ;;  %v7097_v29 = vld [vmem:[#allocation12 + $0x260] sm:$0xf]  ;;  %v7699_v12 = vld [vmem:[#allocation12 + $0x44] sm:$0xf] }
 0x2d2   : > { %v7098_v14 = vor.u32 %v7769_v10, %v7097_v29  ;;  %v6830_v16 = vor.u32 %v7699_v12, %v6827_v34  ;;  %3768 = vmatmul.bf16.vlgmr.msrb.gmra.mxu3 %v8918_v18  ;;  %v6790_v29 = vor.u32 %v7944_v55, %v6787_v56  ;;  %v7166_v10 = vor.u32 %v7783_v57, %v7163_v58  ;;  %v6833_v55 = vld [vmem:[#allocation12 + $0x48] sm:$0xf]  ;;  %v7702_v56 = vld [vmem:[#allocation12 + $0x54] sm:$0xf0] }
 0x2d3   : > { %4546 = vmatpush.bf16.msra.mxu2 %v7114_v5  ;;  %3816 = vmatpush.bf16.msra.mxu3 %v6722_v15  ;;  %v7718_v5 = vld [vmem:[#allocation12 + $0xd4] sm:$0xf0] }
 0x2d4   : > { %v6898_v12 = vor.u32 %v7718_v5, %v6897_v59  ;;  %v7714_v15 = vld [vmem:[#allocation12 + $0xb4] sm:$0xf0]  ;;  %v6707_v5 = vld [vmem:[#allocation14 + $0x358] sm:$0xf0] }
 0x2d5   : > { %4570 = vmatpush.bf16.msrb.mxu0 %v6894_v22  ;;  %4583 = vmatpush.bf16.msrb.mxu1 %v7022_v13  ;;  %v6811_v22 = vld [vmem:[#allocation12 + $0x30] sm:$0xf0]  ;;  %v3680_v24 = vpop.f32.mrf.mxu0  ;;  %v3693_v13 = vpop.f32.mrf.mxu1  ;;  %v7734_v57 = vld [vmem:[#allocation12 + $0x154] sm:$0xf0] }
 0x2d6   : > { %v6814_v40 = vor.u32 %v7695_v19, %v6811_v22  ;;  %v7775_v24 = vld [vmem:[#allocation12 + $0x2a4] sm:$0xf]  ;;  %v7710_v13 = vld [vmem:[#allocation12 + $0x94] sm:$0xf0] }
 0x2d7   : > { %4547 = vmatpush.bf16.msra.mxu2 %v7098_v14  ;;  %3817 = vmatpush.bf16.msra.mxu3 %v6706_v28  ;;  %v6881_v14 = vld [vmem:[#allocation12 + $0xa8] sm:$0xf]  ;;  %v6866_v21 = vor.u32 %v7710_v13, %v6865_v26  ;;  %v6915_v26 = vld [vmem:[#allocation12 + $0xf8] sm:$0xf0]  ;;  %v7752_v13 = vld [vmem:[#allocation12 + $0x1ec] sm:$0xf] }
 0x2d8   : > { %v6882_v19 = vor.u32 %v7714_v15, %v6881_v14  ;;  %v7920_v15 = vld [vmem:[#allocation14 + $0x32c] sm:$0xf] }
 0x2d9   : > { %4571 = vmatpush.bf16.msrb.mxu0 %v6878_v49  ;;  %4584 = vmatpush.bf16.msrb.mxu1 %v7006_v42  ;;  %v7691_v49 = vld [vmem:[#allocation12 + $0x4] sm:$0xf]  ;;  %v6913_v42 = vld [vmem:[#allocation12 + $0xe8] sm:$0xf] }
 0x2da   : > { %v6798_v50 = vor.u32 %v7691_v49, %v6795_v35  ;;  %v6914_v33 = vor.u32 %v7722_v43, %v6913_v42  ;;  %v7771_v49 = vld [vmem:[#allocation12 + $0x284] sm:$0xf]  ;;  %v7115_v35 = vld [vmem:[#allocation12 + $0x290] sm:$0xf0]  ;;  %v7706_v42 = vld [vmem:[#allocation12 + $0x74] sm:$0xf0] }
 0x2db   : > { %4548 = vmatpush.bf16.msra.mxu2 %v7082_v27  ;;  %3818 = vmatpush.bf16.msra.mxu3 %v6690_v46  ;;  %v6993_v27 = vld [vmem:[#allocation12 + $0x188] sm:$0xf]  ;;  %v6742_v46 = vor.u32 %v7932_v30, %v6739_v32 }
 0x2dc   : > { %v6977_v43 = vld [vmem:[#allocation12 + $0x168] sm:$0xf] }
 0x2dd   : > { %4572 = vmatpush.bf16.msrb.mxu0 %v6862_v62  ;;  %4585 = vmatpush.bf16.msrb.mxu1 %v6990_v6  ;;  %v7049_v62 = vld [vmem:[#allocation12 + $0x200] sm:$0xf]  ;;  %v7918_v6 = vld [vmem:[#allocation14 + $0x314] sm:$0xf0] }
 0x2de   : > { %v7050_v3 = vor.u32 %v7757_v51, %v7049_v62  ;;  %v6674_v8 = vor.u32 %v7918_v6, %v6673_v47  ;;  %v7928_v47 = vld [vmem:[#allocation14 + $0x36c] sm:$0xf]  ;;  %v6723_v62 = vld [vmem:[#allocation14 + $0x378] sm:$0xf0]  ;;  %v6850_v51 = vor.u32 %v7706_v42, %v6849_v37  ;;  %v7099_v6 = vld [vmem:[#allocation12 + $0x270] sm:$0xf0] }
 0x2df   : > { %4549 = vmatpush.bf16.msra.mxu2 %v7066_v63  ;;  %v7738_v63 = vld [vmem:[#allocation12 + $0x174] sm:$0xf0]  ;;  %v6726_v58 = vor.u32 %v7928_v47, %v6723_v62  ;;  %v7817_v42 = vld [vmem:[#allocation12 + $0x3ec] sm:$0xf0]  ;;  %v6899_v47 = vld [vmem:[#allocation12 + $0xd8] sm:$0xf0] }
 0x2e0   : > { %3819 = vmatpush.bf16.msra.mxu3 %v6674_v8  ;;  %v7763_v8 = vld [vmem:[#allocation12 + $0x244] sm:$0xf]  ;;  %v7748_v62 = vld [vmem:[#allocation12 + $0x1cc] sm:$0xf] }
 0x2e1   : > { %4573 = vmatpush.bf16.msrb.mxu0 %v6846_v39  ;;  %4586 = vmatpush.bf16.msrb.mxu1 %v6974_v11  ;;  %v7750_v39 = vld [vmem:[#allocation12 + $0x1d4] sm:$0xf0]  ;;  %v7940_v11 = vld [vmem:[#allocation14 + $0x3cc] sm:$0xf] }
 0x2e2   : > { %v7026_v34 = vor.u32 %v7750_v39, %v7025_v2  ;;  %v6774_v48 = vor.u32 %v7940_v11, %v6771_v23  ;;  %v6834_v2 = vor.u32 %v7702_v56, %v6833_v55  ;;  %v7698_v23 = vld [vmem:[#allocation12 + $0x34] sm:$0xf0]  ;;  %v7813_v55 = vld [vmem:[#allocation12 + $0x3cc] sm:$0xf0] }
 0x2e3   : > { %4550 = vmatpush.bf16.msra.mxu2 %v7050_v3  ;;  %3820 = vmatmul.bf16.vlgmr.msra.gmra.mxu3 %v8918_v18  ;;  %v7924_v3 = vld [vmem:[#allocation14 + $0x34c] sm:$0xf] }
 0x2e4   : > { %3864 = vmatpush.bf16.msrb.mxu3 %v6790_v29  ;;  %v7083_v29 = vld [vmem:[#allocation12 + $0x250] sm:$0xf0]  ;;  %v6710_v7 = vor.u32 %v7924_v3, %v6707_v5  ;;  %v6883_v3 = vld [vmem:[#allocation12 + $0xb8] sm:$0xf0]  ;;  %v7744_v5 = vld [vmem:[#allocation12 + $0x1ac] sm:$0xf] }
 0x2e5   : > { %4574 = vmatpush.bf16.msrb.mxu0 %v6830_v16  ;;  %4587 = vmatpush.bf16.msrb.mxu1 %v6958_v4  ;;  %v7009_v16 = vld [vmem:[#allocation12 + $0x1a8] sm:$0xf]  ;;  %v7936_v4 = vld [vmem:[#allocation14 + $0x3ac] sm:$0xf]  ;;  %v7086_v14 = vor.u32 %v7763_v8, %v7083_v29  ;;  %v7257_v29 = vld [vmem:[#allocation12 + $0x3a0] sm:$0xf] }
 0x2e6   : > { %v7010_v22 = vor.u32 %v7746_v52, %v7009_v16  ;;  %4551 = vmatmul.bf16.vlgmr.msra.gmra.mxu2 %v8888_v60  ;;  %v6758_v28 = vor.u32 %v7936_v4, %v6755_v38  ;;  %v6691_v16 = vld [vmem:[#allocation14 + $0x338] sm:$0xf0]  ;;  %v7759_v52 = vld [vmem:[#allocation12 + $0x224] sm:$0xf]  ;;  %v7067_v4 = vld [vmem:[#allocation12 + $0x230] sm:$0xf0] }
 0x2e7   : > { %4595 = vmatpush.bf16.msrb.mxu2 %v7166_v10  ;;  %v6817_v10 = vld [vmem:[#allocation12 + $0x28] sm:$0xf] }
 0x2e8   : > { %3865 = vmatpush.bf16.msrb.mxu3 %v6774_v48  ;;  %v6818_v48 = vor.u32 %v7698_v23, %v6817_v10  ;;  %v6801_v38 = vld [vmem:[#allocation12 + $0x8] sm:$0xf]  ;;  %v7809_v10 = vld [vmem:[#allocation12 + $0x3ac] sm:$0xf0] }
 0x2e9   : > { %4575 = vmatpush.bf16.msrb.mxu0 %v6814_v40  ;;  %4588 = vmatpush.bf16.msrb.mxu1 %v6942_v0  ;;  %v7134_v40 = vor.u32 %v7775_v24, %v7131_v25  ;;  %v6994_v0 = vor.u32 %v7742_v41, %v6993_v27  ;;  %v7726_v24 = vld [vmem:[#allocation12 + $0x114] sm:$0xf0]  ;;  %v7720_v25 = vld [vmem:[#allocation12 + $0xec] sm:$0xf]  ;;  %v7043_v27 = vld [vmem:[#allocation12 + $0x1f8] sm:$0xf0]  ;;  %v6694_v41 = vor.u32 %v7920_v15, %v6691_v16 }
 0x2ea   : > { %v7046_v37 = vor.u32 %v7752_v13, %v7043_v27  ;;  %v6995_v15 = vld [vmem:[#allocation12 + $0x198] sm:$0xf0]  ;;  %v7258_v16 = vor.u32 %v7809_v10, %v7257_v29  ;;  %v7736_v13 = vld [vmem:[#allocation12 + $0x16c] sm:$0xf]  ;;  %v7073_v29 = vld [vmem:[#allocation12 + $0x228] sm:$0xf] }
 0x2eb   : > { %4596 = vmatpush.bf16.msrb.mxu2 %v7150_v17  ;;  %v6979_v27 = vld [vmem:[#allocation12 + $0x178] sm:$0xf0]  ;;  %v7762_v10 = vld [vmem:[#allocation12 + $0x234] sm:$0xf0] }
 0x2ec   : > { %3866 = vmatpush.bf16.msrb.mxu3 %v6758_v28  ;;  %v7070_v28 = vor.u32 %v7759_v52, %v7067_v4 }
 0x2ed   : > { %4576 = vmatpush.bf16.msrb.mxu0 %v6798_v50  ;;  %4589 = vmatpush.bf16.msrb.mxu1 %v6926_v53  ;;  %v3730_v20 = vpop.f32.mrf.mxu0  ;;  %v3743_v44 = vpop.f32.mrf.mxu1  ;;  %v7118_v50 = vor.u32 %v7771_v49, %v7115_v35  ;;  %v6978_v53 = vor.u32 %v7738_v63, %v6977_v43  ;;  %v7051_v49 = vld [vmem:[#allocation12 + $0x210] sm:$0xf0]  ;;  %v6918_v35 = vor.u32 %v7720_v25, %v6915_v26  ;;  %v7169_v43 = vld [vmem:[#allocation12 + $0x2e8] sm:$0xf]  ;;  %v7786_v63 = vld [vmem:[#allocation12 + $0x2f4] sm:$0xf0] }
 0x2ee   : > { %v8931_v45 = vadd.f32 %v3743_v44, %v3730_v20  ;;  %v7289_v20 = vld [vmem:[#allocation12 + $0x3e0] sm:$0xf]  ;;  %v7716_v44 = vld [vmem:[#allocation12 + $0xcc] sm:$0xf]  ;;  %v6851_v26 = vld [vmem:[#allocation12 + $0x78] sm:$0xf0] }
 0x2ef   : > { %4597 = vmatpush.bf16.msrb.mxu2 %v7134_v40  ;;  %v7916_v40 = vld [vmem:[#allocation14 + $0x30c] sm:$0xf]  ;;  %v6902_v56 = vor.u32 %v7716_v44, %v6899_v47  ;;  %v7797_v47 = vld [vmem:[#allocation12 + $0x34c] sm:$0xf0] }
 0x2f0   : > { %4577 = vmatmul.bf16.vlgmr.msrb.gmra.mxu0 %v8861_v54  ;;  %4590 = vmatmul.bf16.vlgmr.msrb.gmra.mxu1 %v8863_v1  ;;  %v7704_v25 = vld [vmem:[#allocation12 + $0x6c] sm:$0xf] }
 0x2f1   : > { %4621 = vmatpush.bf16.msra.mxu0 %v6914_v33  ;;  %4634 = vmatpush.bf16.msra.mxu1 %v7042_v31  ;;  %v7767_v33 = vld [vmem:[#allocation12 + $0x264] sm:$0xf]  ;;  %v6961_v31 = vld [vmem:[#allocation12 + $0x148] sm:$0xf] }
 0x2f2   : > { %3867 = vmatpush.bf16.msrb.mxu3 %v6742_v46  ;;  %v7102_v59 = vor.u32 %v7767_v33, %v7099_v6  ;;  %v6962_v39 = vor.u32 %v7734_v57, %v6961_v31  ;;  %v7170_v33 = vor.u32 %v7786_v63, %v7169_v43  ;;  %v7273_v6 = vld [vmem:[#allocation12 + $0x3c0] sm:$0xf]  ;;  %v7153_v57 = vld [vmem:[#allocation12 + $0x2c8] sm:$0xf]  ;;  %v6963_v43 = vld [vmem:[#allocation12 + $0x158] sm:$0xf0] }
 0x2f3   : > { %4598 = vmatpush.bf16.msrb.mxu2 %v7118_v50 }
 0x2f5   : > { %4622 = vmatpush.bf16.msra.mxu0 %v6898_v12  ;;  %4635 = vmatpush.bf16.msra.mxu1 %v7026_v34  ;;  %v3732_v11 = vpop.f32.mrf.mxu0  ;;  %v6945_v12 = vld [vmem:[#allocation12 + $0x128] sm:$0xf]  ;;  %v7730_v34 = vld [vmem:[#allocation12 + $0x134] sm:$0xf0]  ;;  %v3745_v9 = vpop.f32.mrf.mxu1 }
 0x2f6   : > { %3868 = vmatpush.bf16.msrb.mxu3 %v6726_v58  ;;  %v6946_v17 = vor.u32 %v7730_v34, %v6945_v12  ;;  %v7782_v58 = vld [vmem:[#allocation12 + $0x2d4] sm:$0xf0]  ;;  %v7137_v12 = vld [vmem:[#allocation12 + $0x2a8] sm:$0xf]  ;;  %v7708_v9 = vld [vmem:[#allocation12 + $0x8c] sm:$0xf] }
 0x2f7   : > { %4599 = vmatpush.bf16.msrb.mxu2 %v7102_v59  ;;  %v7712_v59 = vld [vmem:[#allocation12 + $0xac] sm:$0xf]  ;;  %v7154_v8 = vor.u32 %v7782_v58, %v7153_v57  ;;  %v7778_v34 = vld [vmem:[#allocation12 + $0x2b4] sm:$0xf0]  ;;  %v6819_v57 = vld [vmem:[#allocation12 + $0x38] sm:$0xf0] }
 0x2f8   : > { %v6886_v11 = vor.u32 %v7712_v59, %v6883_v3  ;;  %v7138_v52 = vor.u32 %v7778_v34, %v7137_v12  ;;  %v7728_v58 = vld [vmem:[#allocation12 + $0x12c] sm:$0xf]  ;;  %v6947_v59 = vld [vmem:[#allocation12 + $0x138] sm:$0xf0] }
 0x2f9   : > { %4623 = vmatpush.bf16.msra.mxu0 %v6882_v19  ;;  %4636 = vmatpush.bf16.msra.mxu1 %v7010_v22  ;;  %v7694_v19 = vld [vmem:[#allocation12 + $0x14] sm:$0xf0]  ;;  %v6929_v22 = vld [vmem:[#allocation12 + $0x108] sm:$0xf]  ;;  %v7724_v12 = vld [vmem:[#allocation12 + $0x10c] sm:$0xf] }
 0x2fa   : > { %3869 = vmatpush.bf16.msrb.mxu3 %v6710_v7  ;;  %v6802_v30 = vor.u32 %v7694_v19, %v6801_v38  ;;  %v6930_v32 = vor.u32 %v7726_v24, %v6929_v22  ;;  %v6867_v7 = vld [vmem:[#allocation12 + $0x98] sm:$0xf0]  ;;  %v7121_v22 = vld [vmem:[#allocation12 + $0x288] sm:$0xf]  ;;  %v7774_v24 = vld [vmem:[#allocation12 + $0x294] sm:$0xf0] }
 0x2fb   : > { %4600 = vmatpush.bf16.msrb.mxu2 %v7086_v14  ;;  %v7740_v14 = vld [vmem:[#allocation12 + $0x18c] sm:$0xf]  ;;  %v6870_v38 = vor.u32 %v7708_v9, %v6867_v7  ;;  %v6931_v34 = vld [vmem:[#allocation12 + $0x118] sm:$0xf0] }
 0x2fc   : > { %v6998_v19 = vor.u32 %v7740_v14, %v6995_v15  ;;  %v7074_v14 = vor.u32 %v7762_v10, %v7073_v29  ;;  %v7177_v15 = vld [vmem:[#allocation12 + $0x300] sm:$0xf] }
 0x2fd   : > { %4624 = vmatpush.bf16.msra.mxu0 %v6866_v21  ;;  %4637 = vmatpush.bf16.msra.mxu1 %v6994_v0  ;;  %v6675_v21 = vld [vmem:[#allocation14 + $0x318] sm:$0xf0]  ;;  %v7755_v0 = vld [vmem:[#allocation12 + $0x204] sm:$0xf] }
 0x2fe   : > { %3870 = vmatpush.bf16.msrb.mxu3 %v6694_v41  ;;  %v6678_v46 = vor.u32 %v7916_v40, %v6675_v21  ;;  %v7054_v50 = vor.u32 %v7755_v0, %v7051_v49  ;;  %v7122_v40 = vor.u32 %v7774_v24, %v7121_v22  ;;  %v6854_v21 = vor.u32 %v7704_v25, %v6851_v26  ;;  %v7105_v49 = vld [vmem:[#allocation12 + $0x268] sm:$0xf]  ;;  %v7784_v22 = vld [vmem:[#allocation12 + $0x2ec] sm:$0xf]  ;;  %v7171_v24 = vld [vmem:[#allocation12 + $0x2f8] sm:$0xf0] }
 0x2ff   : > { %4601 = vmatpush.bf16.msrb.mxu2 %v7070_v28  ;;  %v6982_v0 = vor.u32 %v7736_v13, %v6979_v27  ;;  %v7174_v13 = vor.u32 %v7784_v22, %v7171_v24  ;;  %v7811_v27 = vld [vmem:[#allocation12 + $0x3c4] sm:$0xf]  ;;  %v7281_v24 = vld [vmem:[#allocation12 + $0x3c8] sm:$0xf] }
 0x301   : > { %4625 = vmatpush.bf16.msra.mxu0 %v6850_v51  ;;  %4638 = vmatpush.bf16.msra.mxu1 %v6978_v53  ;;  %v7027_v51 = vld [vmem:[#allocation12 + $0x1d8] sm:$0xf0]  ;;  %v7290_v53 = vor.u32 %v7817_v42, %v7289_v20  ;;  %v7732_v42 = vld [vmem:[#allocation12 + $0x14c] sm:$0xf] }
 0x302   : > { %v7030_v31 = vor.u32 %v7748_v62, %v7027_v51  ;;  %3871 = vmatpush.bf16.msrb.mxu3 %v6678_v46  ;;  %v6835_v20 = vld [vmem:[#allocation12 + $0x58] sm:$0xf0] }
 0x303   : > { %4602 = vmatpush.bf16.msrb.mxu2 %v7054_v50  ;;  %v7209_v50 = vld [vmem:[#allocation12 + $0x340] sm:$0xf] }
 0x304   : > { %v7210_v3 = vor.u32 %v7797_v47, %v7209_v50  ;;  %v7123_v50 = vld [vmem:[#allocation12 + $0x298] sm:$0xf0] }
 0x305   : > { %4626 = vmatpush.bf16.msra.mxu0 %v6834_v2  ;;  %4639 = vmatpush.bf16.msra.mxu1 %v6962_v39  ;;  %v7011_v2 = vld [vmem:[#allocation12 + $0x1b8] sm:$0xf0]  ;;  %v7274_v39 = vor.u32 %v7813_v55, %v7273_v6  ;;  %v3704_v63 = vpop.f32.mrf.mxu2  ;;  %v7089_v6 = vld [vmem:[#allocation12 + $0x248] sm:$0xf]  ;;  %v7766_v55 = vld [vmem:[#allocation12 + $0x254] sm:$0xf0] }
 0x306   : > { %4556 = vmatpush.bf16.msra.mxu3 %v7290_v53  ;;  %v7014_v23 = vor.u32 %v7744_v5, %v7011_v2  ;;  %4603 = vmatmul.bf16.vlgmr.msrb.gmra.mxu2 %v8888_v60  ;;  %v8940_v62 = vadd.f32 %v3704_v63, %v8924_v61  ;;  %v7090_v5 = vor.u32 %v7766_v55, %v7089_v6  ;;  %v7193_v2 = vld [vmem:[#allocation12 + $0x320] sm:$0xf]  ;;  %v7803_v63 = vld [vmem:[#allocation12 + $0x384] sm:$0xf]  ;;  %v7227_v55 = vld [vmem:[#allocation12 + $0x370] sm:$0xf0] }
 0x307   : > { %4647 = vmatpush.bf16.msra.mxu2 %v7170_v33  ;;  %3872 = vmatmul.bf16.vlgmr.msrb.gmra.mxu3 %v8918_v18  ;;  %v6966_v33 = vor.u32 %v7732_v42, %v6963_v43  ;;  %v7139_v42 = vld [vmem:[#allocation12 + $0x2b8] sm:$0xf0]  ;;  %v7799_v6 = vld [vmem:[#allocation12 + $0x364] sm:$0xf] }
 0x309   : > { %4627 = vmatpush.bf16.msra.mxu0 %v6818_v48  ;;  %4640 = vmatpush.bf16.msra.mxu1 %v6946_v17  ;;  %v7241_v48 = vld [vmem:[#allocation12 + $0x380] sm:$0xf]  ;;  %v7805_v17 = vld [vmem:[#allocation12 + $0x38c] sm:$0xf0] }
 0x30a   : > { %4557 = vmatpush.bf16.msra.mxu3 %v7274_v39  ;;  %v7242_v28 = vor.u32 %v7805_v17, %v7241_v48  ;;  %v7793_v39 = vld [vmem:[#allocation12 + $0x32c] sm:$0xf0]  ;;  %v7057_v17 = vld [vmem:[#allocation12 + $0x208] sm:$0xf] }
 0x30b   : > { %4648 = vmatpush.bf16.msra.mxu2 %v7154_v8  ;;  %v6950_v8 = vor.u32 %v7728_v58, %v6947_v59  ;;  %v7194_v7 = vor.u32 %v7793_v39, %v7193_v2  ;;  %v7789_v48 = vld [vmem:[#allocation12 + $0x30c] sm:$0xf0]  ;;  %v7230_v58 = vor.u32 %v7799_v6, %v7227_v55  ;;  %v7211_v2 = vld [vmem:[#allocation12 + $0x350] sm:$0xf0]  ;;  %v7764_v39 = vld [vmem:[#allocation12 + $0x24c] sm:$0xf] }
 0x30c   : > { %v7178_v25 = vor.u32 %v7789_v48, %v7177_v15  ;;  %v7787_v15 = vld [vmem:[#allocation12 + $0x304] sm:$0xf]  ;;  %v7059_v48 = vld [vmem:[#allocation12 + $0x218] sm:$0xf0]  ;;  %v7185_v55 = vld [vmem:[#allocation12 + $0x308] sm:$0xf] }
 0x30d   : > { %4628 = vmatpush.bf16.msra.mxu0 %v6802_v30  ;;  %4641 = vmatpush.bf16.msra.mxu1 %v6930_v32  ;;  %v3782_v4 = vpop.f32.mrf.mxu0  ;;  %v3795_v18 = vpop.f32.mrf.mxu1  ;;  %v7225_v30 = vld [vmem:[#allocation12 + $0x360] sm:$0xf]  ;;  %v7801_v32 = vld [vmem:[#allocation12 + $0x36c] sm:$0xf0] }
 0x30e   : > { %v8937_v41 = vadd.f32 %v3795_v18, %v3782_v4  ;;  %4558 = vmatpush.bf16.msra.mxu3 %v7258_v16  ;;  %v7226_v44 = vor.u32 %v7801_v32, %v7225_v30  ;;  %v3706_v9 = vpop.f32.mrf.mxu2  ;;  %v7758_v4 = vld [vmem:[#allocation12 + $0x214] sm:$0xf0]  ;;  %v7155_v30 = vld [vmem:[#allocation12 + $0x2d8] sm:$0xf0] }
 0x30f   : > { %4649 = vmatpush.bf16.msra.mxu2 %v7138_v52  ;;  %v6934_v52 = vor.u32 %v7724_v12, %v6931_v34  ;;  %v7058_v18 = vor.u32 %v7758_v4, %v7057_v17  ;;  %v7195_v12 = vld [vmem:[#allocation12 + $0x330] sm:$0xf0]  ;;  %v7760_v34 = vld [vmem:[#allocation12 + $0x22c] sm:$0xf]  ;;  %v7075_v9 = vld [vmem:[#allocation12 + $0x238] sm:$0xf0] }
 0x310   : > { %4629 = vmatmul.bf16.vlgmr.msra.gmra.mxu0 %v8861_v54  ;;  %4642 = vmatmul.bf16.vlgmr.msra.gmra.mxu1 %v8863_v1  ;;  %v7297_v4 = vld [vmem:[#allocation12 + $0x3e8] sm:$0xf] }
 0x311   : > { %4673 = vmatpush.bf16.msrb.mxu0 %v6918_v35  ;;  %4686 = vmatpush.bf16.msrb.mxu1 %v7046_v37  ;;  %v7770_v35 = vld [vmem:[#allocation12 + $0x274] sm:$0xf0]  ;;  %v7700_v37 = vld [vmem:[#allocation12 + $0x4c] sm:$0xf] }
 0x312   : > { %4559 = vmatpush.bf16.msra.mxu3 %v7242_v28  ;;  %v7106_v46 = vor.u32 %v7770_v35, %v7105_v49  ;;  %v6838_v53 = vor.u32 %v7700_v37, %v6835_v20  ;;  %v7275_v28 = vld [vmem:[#allocation12 + $0x3d0] sm:$0xf0]  ;;  %v7807_v35 = vld [vmem:[#allocation12 + $0x3a4] sm:$0xf]  ;;  %v7776_v20 = vld [vmem:[#allocation12 + $0x2ac] sm:$0xf] }
 0x313   : > { %4650 = vmatpush.bf16.msra.mxu2 %v7122_v40  ;;  %v7780_v40 = vld [vmem:[#allocation12 + $0x2cc] sm:$0xf]  ;;  %v7259_v37 = vld [vmem:[#allocation12 + $0x3b0] sm:$0xf0] }
 0x314   : > { %v7158_v49 = vor.u32 %v7780_v40, %v7155_v30  ;;  %v7262_v43 = vor.u32 %v7807_v35, %v7259_v37  ;;  %v7249_v30 = vld [vmem:[#allocation12 + $0x388] sm:$0xf]  ;;  %v7802_v35 = vld [vmem:[#allocation12 + $0x374] sm:$0xf0] }
 0x315   : > { %4674 = vmatpush.bf16.msrb.mxu0 %v6902_v56  ;;  %4687 = vmatpush.bf16.msrb.mxu1 %v7030_v31  ;;  %v3784_v51 = vpop.f32.mrf.mxu0  ;;  %v7696_v56 = vld [vmem:[#allocation12 + $0x2c] sm:$0xf]  ;;  %v3797_v31 = vpop.f32.mrf.mxu1 }
 0x316   : > { %4560 = vmatpush.bf16.msra.mxu3 %v7226_v44  ;;  %v6822_v61 = vor.u32 %v7696_v56, %v6819_v57  ;;  %v3756_v32 = vpop.f32.mrf.mxu2  ;;  %v7243_v44 = vld [vmem:[#allocation12 + $0x390] sm:$0xf0]  ;;  %v7768_v56 = vld [vmem:[#allocation12 + $0x26c] sm:$0xf]  ;;  %v7107_v31 = vld [vmem:[#allocation12 + $0x278] sm:$0xf0] }
 0x317   : > { %4651 = vmatpush.bf16.msra.mxu2 %v7106_v46  ;;  %v7772_v46 = vld [vmem:[#allocation12 + $0x28c] sm:$0xf]  ;;  %v7110_v59 = vor.u32 %v7768_v56, %v7107_v31  ;;  %v7790_v56 = vld [vmem:[#allocation12 + $0x314] sm:$0xf0] }
 0x318   : > { %v7816_v31 = vld [vmem:[#allocation12 + $0x3ec] sm:$0xf] }
 0x319   : > { %4675 = vmatpush.bf16.msrb.mxu0 %v6886_v11  ;;  %4688 = vmatpush.bf16.msrb.mxu1 %v7014_v23  ;;  %v7692_v11 = vld [vmem:[#allocation12 + $0xc] sm:$0xf]  ;;  %v6803_v23 = vld [vmem:[#allocation12 + $0x18] sm:$0xf0] }
 0x31a   : > { %4561 = vmatpush.bf16.msra.mxu3 %v7210_v3  ;;  %v6806_v16 = vor.u32 %v7692_v11, %v6803_v23  ;;  %v7795_v3 = vld [vmem:[#allocation12 + $0x344] sm:$0xf] }
 0x31b   : > { %4652 = vmatpush.bf16.msra.mxu2 %v7090_v5  ;;  %v7214_v10 = vor.u32 %v7795_v3, %v7211_v2  ;;  %v7791_v23 = vld [vmem:[#allocation12 + $0x324] sm:$0xf]  ;;  %v7812_v3 = vld [vmem:[#allocation12 + $0x3cc] sm:$0xf] }
 0x31d   : > { %4676 = vmatpush.bf16.msrb.mxu0 %v6870_v38  ;;  %4689 = vmatpush.bf16.msrb.mxu1 %v6998_v19  ;;  %v7815_v38 = vld [vmem:[#allocation12 + $0x3e4] sm:$0xf]  ;;  %v7291_v19 = vld [vmem:[#allocation12 + $0x3f0] sm:$0xf0] }
 0x31e   : > { %4562 = vmatpush.bf16.msra.mxu3 %v7194_v7  ;;  %v7294_v26 = vor.u32 %v7815_v38, %v7291_v19  ;;  %v3758_v51 = vpop.f32.mrf.mxu2  ;;  %v7198_v7 = vor.u32 %v7791_v23, %v7195_v12  ;;  %v7804_v23 = vld [vmem:[#allocation12 + $0x38c] sm:$0xf]  ;;  %v7251_v12 = vld [vmem:[#allocation12 + $0x398] sm:$0xf0] }
 0x31f   : > { %4653 = vmatpush.bf16.msra.mxu2 %v7074_v14  ;;  %v7078_v14 = vor.u32 %v7760_v34, %v7075_v9  ;;  %v7794_v51 = vld [vmem:[#allocation12 + $0x334] sm:$0xf0] }
 0x321   : > { %4677 = vmatpush.bf16.msrb.mxu0 %v6854_v21  ;;  %4690 = vmatpush.bf16.msrb.mxu1 %v6982_v0  ;;  %v8945_v21 = vadd.f32 %v3756_v32, %v8931_v45  ;;  %v7278_v0 = vor.u32 %v7811_v27, %v7275_v28  ;;  %v7806_v32 = vld [vmem:[#allocation12 + $0x394] sm:$0xf0] }
 0x322   : > { %4563 = vmatpush.bf16.msra.mxu3 %v7178_v25  ;;  %v7814_v25 = vld [vmem:[#allocation12 + $0x3d4] sm:$0xf0] }
 0x323   : > { %4654 = vmatpush.bf16.msra.mxu2 %v7058_v18  ;;  %v7282_v18 = vor.u32 %v7814_v25, %v7281_v24 }
 0x325   : > { %4678 = vmatpush.bf16.msrb.mxu0 %v6838_v53  ;;  %4691 = vmatpush.bf16.msrb.mxu1 %v6966_v33  ;;  %v7246_v53 = vor.u32 %v7803_v63, %v7243_v44  ;;  %v7126_v33 = vor.u32 %v7772_v46, %v7123_v50  ;;  %v7798_v63 = vld [vmem:[#allocation12 + $0x354] sm:$0xf0]  ;;  %v7201_v50 = vld [vmem:[#allocation12 + $0x328] sm:$0xf] }
 0x326   : > { %4608 = vmatpush.bf16.msrb.mxu3 %v7294_v26  ;;  %4655 = vmatmul.bf16.vlgmr.msra.gmra.mxu2 %v8888_v60  ;;  %v7265_v26 = vld [vmem:[#allocation12 + $0x3a8] sm:$0xf]  ;;  %v7202_v6 = vor.u32 %v7794_v51, %v7201_v50 }
 0x327   : > { %4699 = vmatpush.bf16.msrb.mxu2 %v7174_v13  ;;  %4564 = vmatmul.bf16.vlgmr.msra.gmra.mxu3 %v8915_v36  ;;  %v7810_v13 = vld [vmem:[#allocation12 + $0x3b4] sm:$0xf0]  ;;  %v7947_v50 = vld [vmem:[#allocation17] sm:$0xff] }
 0x328   : > { %v7266_v28 = vor.u32 %v7810_v13, %v7265_v26  ;;  %v7203_v26 = vld [vmem:[#allocation12 + $0x338] sm:$0xf0] }
 0x329   : > { %4679 = vmatpush.bf16.msrb.mxu0 %v6822_v61  ;;  %4692 = vmatpush.bf16.msrb.mxu1 %v6950_v8  ;;  %v7091_v61 = vld [vmem:[#allocation12 + $0x258] sm:$0xf0]  ;;  %v3808_v8 = vpop.f32.mrf.mxu2 }
 0x32a   : > { %4609 = vmatpush.bf16.msrb.mxu3 %v7278_v0  ;;  %v8952_v29 = vadd.f32 %v3808_v8, %v8937_v41  ;;  %v7094_v11 = vor.u32 %v7764_v39, %v7091_v61  ;;  %v7818_v41 = vld [vmem:[#allocation12 + $0x3f4] sm:$0xf0]  ;;  %v7250_v0 = vor.u32 %v7806_v32, %v7249_v30  ;;  %v7808_v61 = vld [vmem:[#allocation12 + $0x3ac] sm:$0xf]  ;;  %v7267_v8 = vld [vmem:[#allocation12 + $0x3b8] sm:$0xf0] }
 0x32b   : > { %4700 = vmatpush.bf16.msrb.mxu2 %v7158_v49  ;;  %v7298_v22 = vor.u32 %v7818_v41, %v7297_v4  ;;  %v7233_v49 = vld [vmem:[#allocation12 + $0x368] sm:$0xf]  ;;  %v7219_v4 = vld [vmem:[#allocation12 + $0x358] sm:$0xf0] }
 0x32d   : > { %4680 = vmatpush.bf16.msrb.mxu0 %v6806_v16  ;;  %4693 = vmatpush.bf16.msrb.mxu1 %v6934_v52  ;;  %v3847_v45 = vpop.f32.mrf.mxu1  ;;  %v7179_v16 = vld [vmem:[#allocation12 + $0x310] sm:$0xf0]  ;;  %v7756_v52 = vld [vmem:[#allocation12 + $0x20c] sm:$0xf] }
 0x32e   : > { %4610 = vmatpush.bf16.msrb.mxu3 %v7262_v43  ;;  %v7182_v38 = vor.u32 %v7787_v15, %v7179_v16  ;;  %v7062_v19 = vor.u32 %v7756_v52, %v7059_v48  ;;  %v7254_v15 = vor.u32 %v7804_v23, %v7251_v12  ;;  %v7800_v16 = vld [vmem:[#allocation12 + $0x36c] sm:$0xf]  ;;  %v7235_v52 = vld [vmem:[#allocation12 + $0x378] sm:$0xf0] }
 0x32f   : > { %v7970_v12 = vld [vmem:[#allocation17 + $0xb8] sm:$0xff] }
 0x330   : > { %4681 = vmatmul.bf16.vlgmr.msrb.gmra.mxu0 %v8861_v54  ;;  %4694 = vmatmul.bf16.vlgmr.msrb.gmra.mxu1 %v8863_v1  ;;  %v3834_v54 = vpop.f32.mrf.mxu0  ;;  %v7142_v1 = vor.u32 %v7776_v20, %v7139_v42  ;;  %v7234_v42 = vor.u32 %v7802_v35, %v7233_v49  ;;  %v7951_v35 = vld [vmem:[#allocation17 + $0x20] sm:$0xff] }
 0x331   : > { %v8949_v47 = vadd.f32 %v3847_v45, %v3834_v54  ;;  %v3810_v17 = vpop.f32.mrf.mxu2 }
 0x332   : > { %4701 = vmatpush.bf16.msrb.mxu2 %v7142_v1  ;;  %4611 = vmatpush.bf16.msrb.mxu3 %v7246_v53  ;;  %v7217_v1 = vld [vmem:[#allocation12 + $0x348] sm:$0xf]  ;;  %v7796_v17 = vld [vmem:[#allocation12 + $0x34c] sm:$0xf] }
 0x333   : > { %v7218_v46 = vor.u32 %v7798_v63, %v7217_v1  ;;  %v7222_v25 = vor.u32 %v7796_v17, %v7219_v4  ;;  %v7948_v1 = vld [vmem:[#allocation17 + $0x8] sm:$0xff]  ;;  %v7965_v17 = vld [vmem:[#allocation17 + $0x90] sm:$0xff] }
 0x334   : > { %v7964_v4 = vld [vmem:[#allocation17 + $0x88] sm:$0xff] }
 0x335   : > { %v3849_v5 = vpop.f32.mrf.mxu1 }
 0x336   : > { %4702 = vmatpush.bf16.msrb.mxu2 %v7126_v33  ;;  %4612 = vmatpush.bf16.msrb.mxu3 %v7230_v58  ;;  %v7186_v58 = vor.u32 %v7790_v56, %v7185_v55 }
 0x338   : > { %v3836_v57 = vpop.f32.mrf.mxu0 }
 0x339   : > { %v7299_v57 = vld [vmem:[#allocation12 + $0x3f8] sm:$0xf0] }
 0x33a   : > { %4703 = vmatpush.bf16.msrb.mxu2 %v7110_v59  ;;  %4613 = vmatpush.bf16.msrb.mxu3 %v7214_v10  ;;  %v7302_v59 = vor.u32 %v7816_v31, %v7299_v57  ;;  %v7270_v10 = vor.u32 %v7808_v61, %v7267_v8  ;;  %v7958_v31 = vld [vmem:[#allocation17 + $0x58] sm:$0xff]  ;;  %v7957_v57 = vld [vmem:[#allocation17 + $0x50] sm:$0xff] }
 0x33e   : > { %4704 = vmatpush.bf16.msrb.mxu2 %v7094_v11  ;;  %4614 = vmatpush.bf16.msrb.mxu3 %v7198_v7 }
 0x342   : > { %4705 = vmatpush.bf16.msrb.mxu2 %v7078_v14  ;;  %4615 = vmatpush.bf16.msrb.mxu3 %v7182_v38  ;;  %v7954_v38 = vld [vmem:[#allocation17 + $0x38] sm:$0xff] }
 0x343   : > { %5003 = vmatpush.bf16.msra.mxu0 %v7954_v38 }
 0x345   : > { %4616 = vmatmul.bf16.vlgmr.msrb.gmra.mxu3 %v8915_v36  ;;  %v3717_v37 = vpop.f32.mrf.mxu3 }
 0x346   : > { %4706 = vmatpush.bf16.msrb.mxu2 %v7062_v19  ;;  %4660 = vmatpush.bf16.msra.mxu3 %v7298_v22  ;;  %v3718_v54 = vadd.f32 %v3717_v37, %v8940_v62 }
 0x349   : > { %4707 = vmatmul.bf16.vlgmr.msrb.gmra.mxu2 %v8888_v60  ;;  %v3860_v60 = vpop.f32.mrf.mxu2 }
 0x34a   : > { %4661 = vmatpush.bf16.msra.mxu3 %v7282_v18  ;;  %v8958_v44 = vadd.f32 %v3860_v60, %v8949_v47  ;;  %v7283_v47 = vld [vmem:[#allocation12 + $0x3d8] sm:$0xf0]  ;;  %v7792_v18 = vld [vmem:[#allocation12 + $0x32c] sm:$0xf]  ;;  %5029 = vmatpush.bf16.msra.mxu2 %v7970_v12 }
 0x34b   : > { %v7286_v39 = vor.u32 %v7812_v3, %v7283_v47  ;;  %v7206_v13 = vor.u32 %v7792_v18, %v7203_v26 }
 0x34d   : > { %v4526_v27 = vpop.f32.mrf.mxu0  ;;  %v4539_v40 = vpop.f32.mrf.mxu1 }
 0x34e   : > { %4662 = vmatpush.bf16.msra.mxu3 %v7266_v28  ;;  %v4527_v45 = vadd.f32 %v4526_v27, %v3718_v54  ;;  %v3719_v33 = vpop.f32.mrf.mxu3  ;;  %v7788_v27 = vld [vmem:[#allocation12 + $0x30c] sm:$0xf]  ;;  %v7187_v28 = vld [vmem:[#allocation12 + $0x318] sm:$0xf0]  ;;  %v7949_v54 = vld [vmem:[#allocation17 + $0x10] sm:$0xff] }
 0x34f   : > { %v7190_v49 = vor.u32 %v7788_v27, %v7187_v28  ;;  %v7961_v33 = vld [vmem:[#allocation17 + $0x70] sm:$0xff]  ;;  %v7976_v28 = vld [vmem:[#allocation17 + $0xe8] sm:$0xff] }
 0x350   : > { %v8960_v53 = vadd.f32 %v4539_v40, %v4527_v45  ;;  %v7953_v40 = vld [vmem:[#allocation17 + $0x30] sm:$0xff] }
 0x351   : > { %v3862_v62 = vpop.f32.mrf.mxu2  ;;  %5004 = vmatpush.bf16.msra.mxu0 %v7953_v40 }
 0x352   : > { %4663 = vmatpush.bf16.msra.mxu3 %v7250_v0  ;;  %v7952_v0 = vld [vmem:[#allocation17 + $0x28] sm:$0xff]  ;;  %v7959_v62 = vld [vmem:[#allocation17 + $0x60] sm:$0xff] }
 0x355   : > { %v4528_v20 = vpop.f32.mrf.mxu0  ;;  %v4541_v43 = vpop.f32.mrf.mxu1  ;;  %5005 = vmatpush.bf16.msra.mxu0 %v7952_v0  ;;  %v7973_v0 = vld [vmem:[#allocation17 + $0xd0] sm:$0xff] }
 0x356   : > { %4664 = vmatpush.bf16.msra.mxu3 %v7234_v42  ;;  %v3769_v5 = vpop.f32.mrf.mxu3 }
 0x357   : > { %v3770_v2 = vadd.f32 %v3769_v5, %v8945_v21  ;;  %v7238_v21 = vor.u32 %v7800_v16, %v7235_v52  ;;  %v8973_v5 = vld [vmem:[#allocation15] sm:$0xf]  ;;  %v7968_v16 = vld [vmem:[#allocation17 + $0xa8] sm:$0xff] }
 0x358   : > { %v4727_v8 = vperm.slane %v8973_v5, 0  ;;  %v4728_v38 = vperm.slane %v8973_v5, 1 }
 0x359   : > { %5006 = vmatpush.bf16.msra.mxu0 %v7951_v35 }
 0x35a   : > { %4665 = vmatpush.bf16.msra.mxu3 %v7218_v46 }
 0x35e   : > { %4666 = vmatpush.bf16.msra.mxu3 %v7202_v6  ;;  %v3771_v7 = vpop.f32.mrf.mxu3  ;;  %v7960_v6 = vld [vmem:[#allocation17 + $0x68] sm:$0xff] }
 0x35f   : > { %v7969_v7 = vld [vmem:[#allocation17 + $0xb0] sm:$0xff] }
 0x360   : > { %5030 = vmatpush.bf16.msra.mxu2 %v7969_v7 }
 0x362   : > { %4667 = vmatpush.bf16.msra.mxu3 %v7186_v58 }
 0x364   : > { %5031 = vmatpush.bf16.msra.mxu2 %v7968_v16 }
 0x365   : > { %4668 = vmatmul.bf16.vlgmr.msra.gmra.mxu3 %v8915_v36 }
 0x366   : > { %4712 = vmatpush.bf16.msrb.mxu3 %v7302_v59  ;;  %v3821_v22 = vpop.f32.mrf.mxu3 }
 0x367   : > { %v3822_v24 = vadd.f32 %v3821_v22, %v8952_v29  ;;  %v7950_v29 = vld [vmem:[#allocation17 + $0x18] sm:$0xff] }
 0x368   : > { %5007 = vmatpush.bf16.msra.mxu0 %v7950_v29  ;;  %v4729_v29 = vperm.slane %v8973_v5, 2 }
 0x369   : > { %v4552_v19 = vpop.f32.mrf.mxu2 }
 0x36a   : > { %4713 = vmatpush.bf16.msrb.mxu3 %v7286_v39 }
 0x36c   : > { %5008 = vmatpush.bf16.msra.mxu0 %v7949_v54 }
 0x36d   : > { %v4578_v11 = vpop.f32.mrf.mxu0  ;;  %v4591_v9 = vpop.f32.mrf.mxu1 }
 0x36e   : > { %v4579_v34 = vadd.f32 %v4578_v11, %v3770_v2  ;;  %4714 = vmatpush.bf16.msrb.mxu3 %v7270_v10  ;;  %v3823_v32 = vpop.f32.mrf.mxu3  ;;  %v4553_v2 = vadd.f32 %v4552_v19, %v8960_v53  ;;  %v7955_v10 = vld [vmem:[#allocation17 + $0x40] sm:$0xff] }
 0x36f   : > { %v7967_v53 = vld [vmem:[#allocation17 + $0xa0] sm:$0xff] }
 0x370   : > { %v8964_v14 = vadd.f32 %v4591_v9, %v4579_v34  ;;  %5009 = vmatpush.bf16.msra.mxu0 %v7948_v1  ;;  %5032 = vmatpush.bf16.msra.mxu2 %v7967_v53  ;;  %v7963_v19 = vld [vmem:[#allocation17 + $0x80] sm:$0xff] }
 0x371   : > { %v4554_v30 = vpop.f32.mrf.mxu2  ;;  %v7975_v32 = vld [vmem:[#allocation17 + $0xe0] sm:$0xff] }
 0x372   : > { %4715 = vmatpush.bf16.msrb.mxu3 %v7254_v15 }
 0x374   : > { %5010 = vmatpush.bf16.msra.mxu0 %v7947_v50 }
 0x375   : > { %v4580_v48 = vpop.f32.mrf.mxu0  ;;  %v4593_v41 = vpop.f32.mrf.mxu1 }
 0x376   : > { %4716 = vmatpush.bf16.msrb.mxu3 %v7238_v21  ;;  %v7966_v48 = vld [vmem:[#allocation17 + $0x98] sm:$0xff] }
 0x377   : > { %5033 = vmatpush.bf16.msra.mxu2 %v7966_v48 }
 0x37a   : > { %4717 = vmatpush.bf16.msrb.mxu3 %v7222_v25  ;;  %v7978_v25 = vld [vmem:[#allocation17 + $0xf8] sm:$0xff] }
 0x37b   : > { %5034 = vmatpush.bf16.msra.mxu2 %v7965_v17 }
 0x37e   : > { %4718 = vmatpush.bf16.msrb.mxu3 %v7206_v13  ;;  %v7977_v13 = vld [vmem:[#allocation17 + $0xf0] sm:$0xff] }
 0x37f   : > { %5035 = vmatpush.bf16.msra.mxu2 %v7964_v4 }
 0x382   : > { %4719 = vmatpush.bf16.msrb.mxu3 %v7190_v49  ;;  %v7972_v49 = vld [vmem:[#allocation17 + $0xc8] sm:$0xff] }
 0x383   : > { %5036 = vmatpush.bf16.msra.mxu2 %v7963_v19 }
 0x385   : > { %4720 = vmatmul.bf16.vlgmr.msrb.gmra.mxu3 %v8915_v36  ;;  %v7962_v36 = vld [vmem:[#allocation17 + $0x78] sm:$0xff] }
 0x386   : > { %5016 = vmatpush.bf16.msra.mxu1 %v7962_v36  ;;  %5042 = vmatpush.bf16.msra.mxu3 %v7978_v25 }
 0x389   : > { %v4604_v46 = vpop.f32.mrf.mxu2 }
 0x38a   : > { %v3873_v45 = vpop.f32.mrf.mxu3  ;;  %5017 = vmatpush.bf16.msra.mxu1 %v7961_v33  ;;  %v4605_v41 = vadd.f32 %v4604_v46, %v8964_v14  ;;  %5043 = vmatpush.bf16.msra.mxu3 %v7977_v13  ;;  %v7974_v14 = vld [vmem:[#allocation17 + $0xd8] sm:$0xff] }
 0x38b   : > { %v3874_v51 = vadd.f32 %v3873_v45, %v8958_v44  ;;  %v7956_v44 = vld [vmem:[#allocation17 + $0x48] sm:$0xff]  ;;  %v4730_v45 = vperm.slane %v8973_v5, 3 }
 0x38d   : > { %v4630_v37 = vpop.f32.mrf.mxu0  ;;  %v4643_v20 = vpop.f32.mrf.mxu1 }
 0x38e   : > { %v4631_v42 = vadd.f32 %v4630_v37, %v3822_v24  ;;  %5018 = vmatpush.bf16.msra.mxu1 %v7960_v6  ;;  %5044 = vmatpush.bf16.msra.mxu3 %v7976_v28  ;;  %v7971_v37 = vld [vmem:[#allocation17 + $0xc0] sm:$0xff] }
 0x390   : > { %v8968_v43 = vadd.f32 %v4643_v20, %v4631_v42 }
 0x391   : > { %v4606_v56 = vpop.f32.mrf.mxu2 }
 0x392   : > { %v3875_v55 = vpop.f32.mrf.mxu3  ;;  %5019 = vmatpush.bf16.msra.mxu1 %v7959_v62  ;;  %5045 = vmatpush.bf16.msra.mxu3 %v7975_v32 }
 0x395   : > { %v4632_v63 = vpop.f32.mrf.mxu0  ;;  %v4645_v60 = vpop.f32.mrf.mxu1 }
 0x396   : > { %5020 = vmatpush.bf16.msra.mxu1 %v7958_v31  ;;  %5046 = vmatpush.bf16.msra.mxu3 %v7974_v14 }
 0x39a   : > { %5021 = vmatpush.bf16.msra.mxu1 %v7957_v57  ;;  %5047 = vmatpush.bf16.msra.mxu3 %v7973_v0  ;;  %v8124_v57 = vld [vmem:[%s9043_s16] ss:$0 sm:$0xff] }
 0x39e   : > { %5022 = vmatpush.bf16.msra.mxu1 %v7956_v44  ;;  %5048 = vmatpush.bf16.msra.mxu3 %v7972_v49 }
 0x3a2   : > { %5023 = vmatpush.bf16.msra.mxu1 %v7955_v10  ;;  %5049 = vmatpush.bf16.msra.mxu3 %v7971_v37 }
 0x3a9   : > { %v4656_v23 = vpop.f32.mrf.mxu2 }
 0x3aa   : > { %v4565_v11 = vpop.f32.mrf.mxu3  ;;  %v4657_v35 = vadd.f32 %v4656_v23, %v8968_v43 }
 0x3ab   : > { %v4566_v34 = vadd.f32 %v4565_v11, %v4553_v2 }
 0x3ad   : > { %v4682_v58 = vpop.f32.mrf.mxu0  ;;  %v4695_v59 = vpop.f32.mrf.mxu1  ;;  %v4735_v9 = vadd.f32 %v4727_v8, %v4566_v34 }
 0x3ae   : > { %v4683_v3 = vadd.f32 %v4682_v58, %v3874_v51 }
 0x3af   : > { %v4739_v15 = vpack.c.bf16 %v4735_v9, %v4735_v9 }
 0x3b0   : > { %v8971_v47 = vadd.f32 %v4695_v59, %v4683_v3 }
 0x3b1   : > { %5011 = vmatmul.bf16.vlgmr.msra.gmra.mxu0 %v4739_v15  ;;  %v4658_v21 = vpop.f32.mrf.mxu2 }
 0x3b2   : > { %v4567_v52 = vpop.f32.mrf.mxu3 }
 0x3b5   : > { %v4684_v39 = vpop.f32.mrf.mxu0  ;;  %v4697_v61 = vpop.f32.mrf.mxu1 }
 0x3c8   : > { %v4617_v22 = vpop.f32.mrf.mxu3 }
 0x3c9   : > { %v4618_v18 = vadd.f32 %v4617_v22, %v4605_v41 }
 0x3cb   : > { %v4736_v26 = vadd.f32 %v4728_v38, %v4618_v18 }
 0x3cc   : > { %v4708_v24 = vpop.f32.mrf.mxu2 }
 0x3cd   : > { %v4740_v27 = vpack.c.bf16 %v4736_v26, %v4736_v26  ;;  %v4709_v60 = vadd.f32 %v4708_v24, %v8971_v47 }
 0x3cf   : > { %5024 = vmatmul.bf16.vlgmr.msra.gmra.mxu1 %v4740_v27 }
 0x3d0   : > { %v4619_v40 = vpop.f32.mrf.mxu3 }
 0x3d4   : > { %v4710_v30 = vpop.f32.mrf.mxu2 }
 0x3e8   : > { %v4669_v20 = vpop.f32.mrf.mxu3 }
 0x3e9   : > { %v4670_v42 = vadd.f32 %v4669_v20, %v4657_v35 }
 0x3eb   : > { %v4737_v54 = vadd.f32 %v4729_v29, %v4670_v42 }
 0x3ed   : > { %v4741_v1 = vpack.c.bf16 %v4737_v54, %v4737_v54 }
 0x3ef   : > { %5037 = vmatmul.bf16.vlgmr.msra.gmra.mxu2 %v4741_v1 }
 0x3f0   : > { %v4671_v63 = vpop.f32.mrf.mxu3 }
 0x408   : > { %v4721_v46 = vpop.f32.mrf.mxu3 }
 0x409   : > { %v4722_v50 = vadd.f32 %v4721_v46, %v4709_v60 }
 0x40b   : > { %v4738_v51 = vadd.f32 %v4730_v45, %v4722_v50 }
 0x40d   : > { %v4742_v36 = vpack.c.bf16 %v4738_v51, %v4738_v51 }
 0x40f   : > { %5050 = vmatmul.bf16.vlgmr.msra.gmra.mxu3 %v4742_v36 }
 0x410   : > { %v4723_v43 = vpop.f32.mrf.mxu3 }
 0x42e   : > { %v5012_v33 = vpop.f32.mrf.mxu0 }
 0x42f   : > { %v5013_v58 = vadd.f32 %v8124_v57, %v5012_v33 }
 0x436   : > { %v5014_v6 = vpop.f32.mrf.mxu0 }
 0x44c   : > { %v5025_v55 = vpop.f32.mrf.mxu1 }
 0x44d   : > { %v5026_v59 = vadd.f32 %v5025_v55, %v5013_v58 }
 0x454   : > { %v5027_v56 = vpop.f32.mrf.mxu1 }
 0x472   : > { %v5038_v62 = vpop.f32.mrf.mxu2 }
 0x473   : > { %v5039_v3 = vadd.f32 %v5038_v62, %v5026_v59 }
 0x47a   : > { %v5040_v31 = vpop.f32.mrf.mxu2 }
 0x492   : > { %v5051_v47 = vpop.f32.mrf.mxu3 }
 0x493   : > { %v5052_v44 = vadd.f32 %v5051_v47, %v5039_v3 }
 0x495   : > { %5055 = vst [vmem:[#allocation18] sm:$0x3] %v5052_v44 }
 0x49a   : > { %v5053_v5 = vpop.f32.mrf.mxu3 }
 0x49b PF: > { %p8059_p3 = scmp.eq.s32.totalorder %s8606_s23, 1  ;;  %s9044_s2 = sld [smem:[#allocation34_spill]] }
 0x49c   : > { %s8514_s11 = smov [#allocation18]  }
 0x49d   : > { %s5064_s29 = sshll.u32 %s8514_s11, 4  ;;  %s5065_s29 = int_to_ptr.vmem [resolvable:$true] %s5064_s29 }
 0x4a1   : > { %s5066_s26 = sshll.u32 %s9044_s2, 4  ;;  %s5067_s26 = int_to_ptr.hbm [resolvable:$true] %s5066_s26 }
 0x4a2   : > { %8012 = dma.vmem_to_hbm [thread:$0]  (%p8059_p3), %s5065_s29, 32, %s5067_s26, [#allocation5]  }
 0x4a3   : > { %8473 = dma.done.wait (%p8059_p3), [#allocation5], 32  }
 0x4a4   : > { %8475 = vsyncadd (%p8059_p3), [#allocation5], 4294967264 }
 0x4a5 PF: > { %s31_s22 = sadd.s32 1, %s8498_s22   ;;  %s9045_s17 = smov %s8482_s18 }
 0x4a6   : > { %p28_p4 = scmp.ge.s32.totalorder %s31_s22, 4   ;;  %s9046_s18 = smov %s8486_s19 }
 0x4a7   : > { %s9047_s19 = smov %s8685_s28  ;;  %s9048_s20 = smov %s8494_s21 }
 0x4a8   : > { %s9049_s21 = smov %s9051_s25  ;;  %30 = sbr.rel (!%p28_p4) target bundleno = 20 (0x14), region = 152 }
 0x4ad   :  { %5080 = vsyncpa [#allocation4], 1 }
 0x4ae   :  { %5082 = vsyncpa [#allocation4 + $0x1], 1 }
 0x4af   :  { %5083 = vsyncpa [#allocation7], 1 }
 0x4b0   :  { %5085 = vsyncpa [#allocation7 + $0x1], 1 }
 0x4b1   :  { %5086 = vsyncpa [#allocation10], 1 }
 0x4b2   :  { %5087 = vsyncpa [#allocation13], 1 }
 0x4b3   :  { %5088 = vsyncpa [#allocation16], 1 }
 0x4b4   :  { %5089 = vsyncpa [#allocation5], 1 }
 0x4b5   :  { %5091 = vsyncpa [#allocation5 + $0x1], 1 }

</bundles_post_ra>
